<compile_context>
chip_gen: v7x
topology: tpu7x:2x2x1
jax: 0.10.0
libtpu: 0.0.40
codegen_flags: <defaults>
</compile_context>

<pallas_src>
import functools
import math

import jax
import jax.numpy as jnp
from jax.experimental import pallas as pl
from jax.experimental.pallas import tpu as pltpu


def _recip(x):
  # EUP reciprocal (free slot); fall back to a divide if unavailable.
  if hasattr(pl, "reciprocal"):
    return pl.reciprocal(x, approx=True)
  return 1.0 / x


# ----------------------------------------------------------------------------
# Kernel
# ----------------------------------------------------------------------------
def _rope_encoder_layer_kernel(
    x_ref, mb_ref,
    wq_ref, bq_ref, wk_ref, bk_ref, wv_ref, bv_ref, wo_ref, bo_ref,
    g1_ref, be1_ref, g2_ref, be2_ref,
    w1_ref, b1_ref, w2_ref, b2_ref,
    cos_ref, sin_ref,
    o_ref,
    k_scr, v_scr, attn_scr,
    *, nhead: int, tq: int, eps: float):
  """grid = (B, L // TQ).

  x_ref:    (L, D)   full input row (batch dim squeezed; same block for all qi)
  mb_ref:   (1, L)   additive key-padding bias (0 = attend, -1e30 = masked)
  w*_ref:   bf16 linear weights, (in, out) layout; wq/wk columns pre-permuted
            (evens-first per head) so RoPE is rotate-half.
  b*_ref:   f32 biases as (1, out)
  g/be:     f32 LayerNorm weight / bias as (1, D)
  cos/sin:  (L, head_dim) f32 RoPE tables; sin already sign-folded [-sin, +sin]
  o_ref:    (TQ, D)  output tile
  k_scr/v_scr:  (L, D) bf16 scratch — RoPE'd K and V, written once per row
  attn_scr:     (TQ, D) f32 scratch — per-head attention outputs
  """
  L, D = k_scr.shape
  hd = D // nhead
  hd2 = hd // 2
  scale = 1.0 / math.sqrt(hd)
  qi = pl.program_id(1)

  def _layer_norm(t, g, b):
    mu = jnp.mean(t, axis=-1, keepdims=True)
    c = t - mu
    var = jnp.mean(c * c, axis=-1, keepdims=True)
    return c * jax.lax.rsqrt(var + eps) * g + b

  def _rope(t, c, s):
    # rotate-half form; `s` already carries the [-sin, +sin] sign.
    rolled = jnp.concatenate([t[:, hd2:], t[:, :hd2]], axis=-1)
    return t * c + rolled * s

  # ---- K / V for the whole row: once per batch row, kept resident ----------
  @pl.when(qi == 0)
  def _init_kv():
    xf = x_ref[...].astype(jnp.float32)                           # (L, D)
    h1 = _layer_norm(xf, g1_ref[...], be1_ref[...]).astype(jnp.bfloat16)
    k = jnp.dot(h1, wk_ref[...], preferred_element_type=jnp.float32) + bk_ref[...]
    v = jnp.dot(h1, wv_ref[...], preferred_element_type=jnp.float32) + bv_ref[...]
    v_scr[...] = v.astype(jnp.bfloat16)
    c_all = cos_ref[...]
    s_all = sin_ref[...]
    for h in range(nhead):                       # static head-aligned offsets
      lo = h * hd
      k_scr[:, lo:lo + hd] = _rope(k[:, lo:lo + hd], c_all, s_all
                                   ).astype(jnp.bfloat16)

  # ---- query tile -----------------------------------------------------------
  if hasattr(pl, "multiple_of"):
    row0 = pl.multiple_of(qi * tq, tq)
  else:
    row0 = qi * tq
  xq = x_ref[pl.ds(row0, tq), :].astype(jnp.float32)              # (TQ, D)
  h1q = _layer_norm(xq, g1_ref[...], be1_ref[...]).astype(jnp.bfloat16)
  q = jnp.dot(h1q, wq_ref[...], preferred_element_type=jnp.float32) + bq_ref[...]
  cq = cos_ref[pl.ds(row0, tq), :]                                # (TQ, hd)
  sq = sin_ref[pl.ds(row0, tq), :]
  bias = mb_ref[...]                                              # (1, L)

  # TODO(synk): use lax.fori_loop over heads once offsets are made dynamic-safe;
  # static unroll is fine for the small nhead typical of this model.
  for h in range(nhead):
    lo = h * hd
    qh = (_rope(q[:, lo:lo + hd], cq, sq) * scale).astype(jnp.bfloat16)
    kh = k_scr[:, lo:lo + hd]                                     # (L, hd) bf16
    vh = v_scr[:, lo:lo + hd]
    sc = jax.lax.dot_general(qh, kh, (((1,), (1,)), ((), ())),
                             preferred_element_type=jnp.float32) + bias
    m = jnp.max(sc, axis=-1, keepdims=True)
    e = jnp.exp(sc - m)
    denom = jnp.sum(e, axis=-1, keepdims=True)                    # (TQ, 1)
    oh = jnp.dot(e.astype(jnp.bfloat16), vh,
                 preferred_element_type=jnp.float32)              # (TQ, hd)
    attn_scr[:, lo:lo + hd] = oh * _recip(denom)                  # deferred norm

  attn = jnp.dot(attn_scr[...].astype(jnp.bfloat16), wo_ref[...],
                 preferred_element_type=jnp.float32) + bo_ref[...]
  # dropout1 is identity in eval mode
  y = xq + attn

  h2 = _layer_norm(y, g2_ref[...], be2_ref[...]).astype(jnp.bfloat16)
  ff = jnp.dot(h2, w1_ref[...], preferred_element_type=jnp.float32) + b1_ref[...]
  ff = jnp.maximum(ff, 0.0).astype(jnp.bfloat16)
  ff = jnp.dot(ff, w2_ref[...], preferred_element_type=jnp.float32) + b2_ref[...]
  # dropout2 / ff_dropout are identity in eval mode
  o_ref[...] = (y + ff).astype(o_ref.dtype)


# ----------------------------------------------------------------------------
# Host-side helpers
# ----------------------------------------------------------------------------
def make_rope_tables(head_dim: int, seq_len: int, base: float = 10000.0):
  """Same tables as RotaryPositionalEmbedding.__init__ (cos/sin of t * inv_freq)."""
  inv_freq = 1.0 / (base ** (jnp.arange(0, head_dim, 2, dtype=jnp.float32) / head_dim))
  t = jnp.arange(seq_len, dtype=jnp.float32)
  freqs = jnp.einsum("i,j->ij", t, inv_freq)                     # (L, head_dim // 2)
  return jnp.cos(freqs), jnp.sin(freqs)


def _even_odd_perm(d_model: int, nhead: int):
  """Within each head block: even pair-members first, odd pair-members second."""
  hd = d_model // nhead
  idx = []
  for h in range(nhead):
    base = h * hd
    idx.extend(base + 2 * j for j in range(hd // 2))
    idx.extend(base + 2 * j + 1 for j in range(hd // 2))
  return jnp.asarray(idx, dtype=jnp.int32)


def rope_encoder_layer_forward(x, params, *, nhead, key_padding_mask=None,
                               dropout_p: float = 0.0, training: bool = False,
                               eps: float = 1e-5, block_q: int = 256,
                               vmem_limit_mb: int = 56):
  """Pallas forward pass.

  x: (B, L, D) float.
  params: dict with weights already in (in, out) layout (i.e. torch weight.T):
    wq, bq, wk, bk, wv, bv, wo, bo, w1, b1, w2, b2, ln1_g, ln1_b, ln2_g, ln2_b.
  key_padding_mask: optional bool (B, L); True = attend.
  """
  if training and dropout_p > 0.0:
    # TODO(synk): training-mode dropout not implemented (eval-mode forward).
    pass

  B, L, D = x.shape
  hd = D // nhead
  assert hd * nhead == D and hd % 2 == 0
  FF = params["w1"].shape[1]
  tq = min(block_q, L)
  assert L % tq == 0, f"L ({L}) must be a multiple of the query tile ({tq})"
  nq = L // tq

  # Compact RoPE tables (L, head_dim); sign folded into sin for rotate-half.
  cos, sin = make_rope_tables(hd, L)
  cos_cat = jnp.concatenate([cos, cos], axis=-1).astype(jnp.float32)
  sin_sgn = jnp.concatenate([-sin, sin], axis=-1).astype(jnp.float32)

  # Permute q/k projection output columns so interleaved RoPE == rotate-half.
  perm = _even_odd_perm(D, nhead)
  bf16 = jnp.bfloat16
  f32 = jnp.float32
  wq = params["wq"][:, perm].astype(bf16)
  wk = params["wk"][:, perm].astype(bf16)
  wv = params["wv"].astype(bf16)
  wo = params["wo"].astype(bf16)
  w1 = params["w1"].astype(bf16)
  w2 = params["w2"].astype(bf16)
  bq = params["bq"][perm].reshape(1, D).astype(f32)
  bk = params["bk"][perm].reshape(1, D).astype(f32)
  bv = params["bv"].reshape(1, D).astype(f32)
  bo = params["bo"].reshape(1, D).astype(f32)
  b1 = params["b1"].reshape(1, FF).astype(f32)
  b2 = params["b2"].reshape(1, D).astype(f32)
  g1 = params["ln1_g"].reshape(1, D).astype(f32)
  be1 = params["ln1_b"].reshape(1, D).astype(f32)
  g2 = params["ln2_g"].reshape(1, D).astype(f32)
  be2 = params["ln2_b"].reshape(1, D).astype(f32)

  if key_padding_mask is None:
    mask_bias = jnp.zeros((B, 1, L), f32)
  else:
    mask_bias = jnp.where(key_padding_mask, 0.0, -1e30).astype(f32)[:, None, :]

  kernel = functools.partial(_rope_encoder_layer_kernel,
                             nhead=nhead, tq=tq, eps=float(eps))

  def _const_spec(a, single_buffer):
    zeros = (0,) * a.ndim
    index_map = lambda b, q, _z=zeros: _z
    if single_buffer and hasattr(pl, "Buffered"):
      try:  # single-buffer constant weights: they never change block index.
        return pl.BlockSpec(a.shape, index_map, pipeline_mode=pl.Buffered(1))
      except TypeError:
        pass
    return pl.BlockSpec(a.shape, index_map)

  def _call(single_buffer):
    cspec = lambda a: _const_spec(a, single_buffer)
    return pl.pallas_call(
        kernel,
        out_shape=jax.ShapeDtypeStruct((B, L, D), x.dtype),
        grid=(B, nq),
        in_specs=[
            pl.BlockSpec((None, L, D), lambda b, q: (b, 0, 0)),   # x (full row)
            pl.BlockSpec((None, 1, L), lambda b, q: (b, 0, 0)),   # mask bias
            cspec(wq), cspec(bq), cspec(wk), cspec(bk),
            cspec(wv), cspec(bv), cspec(wo), cspec(bo),
            cspec(g1), cspec(be1), cspec(g2), cspec(be2),
            cspec(w1), cspec(b1), cspec(w2), cspec(b2),
            cspec(cos_cat), cspec(sin_sgn),
        ],
        out_specs=pl.BlockSpec((None, tq, D), lambda b, q: (b, q, 0)),
        scratch_shapes=[
            pltpu.VMEM((L, D), jnp.bfloat16),    # RoPE'd K, resident per row
            pltpu.VMEM((L, D), jnp.bfloat16),    # V, resident per row
            pltpu.VMEM((tq, D), jnp.float32),    # per-head attention outputs
        ],
        compiler_params=pltpu.CompilerParams(
            dimension_semantics=("parallel", "arbitrary"),
            vmem_limit_bytes=int(vmem_limit_mb) * 1024 * 1024),
    )(x, mask_bias,
      wq, bq, wk, bk, wv, bv, wo, bo,
      g1, be1, g2, be2,
      w1, b1, w2, b2,
      cos_cat, sin_sgn)

  try:
    return _call(True)
  except Exception:
    # Fallback in case single-buffered (Buffered(1)) pipelining is unsupported.
    return _call(False)


# ----------------------------------------------------------------------------
# Pure-JAX reference (mirrors the PyTorch module's math, eval mode)
# ----------------------------------------------------------------------------
def reference_forward(x, params, *, nhead, key_padding_mask=None, eps=1e-5):
  B, L, D = x.shape
  hd = D // nhead

  def layer_norm(t, g, b):
    mu = t.mean(-1, keepdims=True)
    var = ((t - mu) ** 2).mean(-1, keepdims=True)
    return (t - mu) / jnp.sqrt(var + eps) * g + b

  cos, sin = make_rope_tables(hd, L)                      # (L, hd//2)

  h1 = layer_norm(x, params["ln1_g"], params["ln1_b"])
  q = h1 @ params["wq"] + params["bq"]
  k = h1 @ params["wk"] + params["bk"]
  v = h1 @ params["wv"] + params["bv"]
  q = q.reshape(B, L, nhead, hd).transpose(0, 2, 1, 3)
  k = k.reshape(B, L, nhead, hd).transpose(0, 2, 1, 3)
  v = v.reshape(B, L, nhead, hd).transpose(0, 2, 1, 3)

  def rope(t):  # interleaved, same as apply_rotary_pos_emb
    tr = t.reshape(B, nhead, L, hd // 2, 2)
    te, to = tr[..., 0], tr[..., 1]
    c, s = cos[None, None], sin[None, None]
    out = jnp.stack([te * c - to * s, te * s + to * c], axis=-1)
    return out.reshape(B, nhead, L, hd)

  q, k = rope(q), rope(k)
  scores = jnp.einsum("bhld,bhmd->bhlm", q, k) / math.sqrt(hd)
  if key_padding_mask is not None:
    scores = scores + jnp.where(key_padding_mask, 0.0, -1e30)[:, None, None, :]
  p = jax.nn.softmax(scores, axis=-1)
  attn = jnp.einsum("bhlm,bhmd->bhld", p, v)
  attn = attn.transpose(0, 2, 1, 3).reshape(B, L, D)
  attn = attn @ params["wo"] + params["bo"]
  y = x + attn
  h2 = layer_norm(y, params["ln2_g"], params["ln2_b"])
  ff = jax.nn.relu(h2 @ params["w1"] + params["b1"]) @ params["w2"] + params["b2"]
  return y + ff


# ----------------------------------------------------------------------------
# Demo / self-check
# ----------------------------------------------------------------------------
if __name__ == "__main__":
  B, L, D, NHEAD, FF = 2, 16, 32, 4, 64      # small; 2 query tiles of 8

  keys = jax.random.split(jax.random.PRNGKey(0), 17)

  def w(k, shape, scale=0.1):
    return scale * jax.random.normal(k, shape, dtype=jnp.float32)

  params = dict(
      wq=w(keys[0], (D, D)), bq=w(keys[1], (D,), 0.02),
      wk=w(keys[2], (D, D)), bk=w(keys[3], (D,), 0.02),
      wv=w(keys[4], (D, D)), bv=w(keys[5], (D,), 0.02),
      wo=w(keys[6], (D, D)), bo=w(keys[7], (D,), 0.02),
      w1=w(keys[8], (D, FF)), b1=w(keys[9], (FF,), 0.02),
      w2=w(keys[10], (FF, D)), b2=w(keys[11], (D,), 0.02),
      ln1_g=1.0 + w(keys[12], (D,), 0.05), ln1_b=w(keys[13], (D,), 0.05),
      ln2_g=1.0 + w(keys[14], (D,), 0.05), ln2_b=w(keys[15], (D,), 0.05),
  )
  x = jax.random.normal(keys[16], (B, L, D), dtype=jnp.float32)
  # Key-padding mask (True = attend); batch row 1 has its last 3 positions padded.
  mask = jnp.array([[True] * L,
                    [True] * (L - 3) + [False] * 3])

  out = rope_encoder_layer_forward(x, params, nhead=NHEAD,
                                   key_padding_mask=mask, block_q=8)
  out = jax.block_until_ready(out)

  ref = reference_forward(x, params, nhead=NHEAD, key_padding_mask=mask)
  assert out.shape == (B, L, D) and out.dtype == x.dtype
  err = float(jnp.max(jnp.abs(out - ref)))
  # bf16 matmul operands -> slightly loose tolerance vs. the f32 reference.
  assert err < 6e-2, f"max abs err vs reference: {err}"

  print("KERNEL_OK")
</pallas_src>

<mosaic_0001>
module attributes {stable_mosaic.version = 11 : i64} {
  func.func @_rope_encoder_layer_kernel(%arg0: i32, %arg1: i32, %arg2: memref<1x16x32xf32, #tpu.memory_space<vmem>>, %arg3: memref<1x1x16xf32, #tpu.memory_space<vmem>>, %arg4: memref<32x32xbf16, #tpu.memory_space<vmem>>, %arg5: memref<1x32xf32, #tpu.memory_space<vmem>>, %arg6: memref<32x32xbf16, #tpu.memory_space<vmem>>, %arg7: memref<1x32xf32, #tpu.memory_space<vmem>>, %arg8: memref<32x32xbf16, #tpu.memory_space<vmem>>, %arg9: memref<1x32xf32, #tpu.memory_space<vmem>>, %arg10: memref<32x32xbf16, #tpu.memory_space<vmem>>, %arg11: memref<1x32xf32, #tpu.memory_space<vmem>>, %arg12: memref<1x32xf32, #tpu.memory_space<vmem>>, %arg13: memref<1x32xf32, #tpu.memory_space<vmem>>, %arg14: memref<1x32xf32, #tpu.memory_space<vmem>>, %arg15: memref<1x32xf32, #tpu.memory_space<vmem>>, %arg16: memref<32x64xbf16, #tpu.memory_space<vmem>>, %arg17: memref<1x64xf32, #tpu.memory_space<vmem>>, %arg18: memref<64x32xbf16, #tpu.memory_space<vmem>>, %arg19: memref<1x32xf32, #tpu.memory_space<vmem>>, %arg20: memref<16x8xf32, #tpu.memory_space<vmem>>, %arg21: memref<16x8xf32, #tpu.memory_space<vmem>>, %arg22: memref<1x8x32xf32, #tpu.memory_space<vmem>>, %arg23: memref<16x32xbf16, #tpu.memory_space<vmem>>, %arg24: memref<16x32xbf16, #tpu.memory_space<vmem>>, %arg25: memref<8x32xf32, #tpu.memory_space<vmem>>) attributes {dimension_semantics = [#tpu.dimension_semantics<parallel>, #tpu.dimension_semantics<arbitrary>], iteration_bounds = array<i64: 2, 2>, scalar_prefetch = 0 : i64, scratch_operands = 3 : i64, tpu.core_type = #tpu.core_type<tc>, window_params = [{transform_indices = @transform_0, window_bounds = array<i64: 1, 16, 32>}, {transform_indices = @transform_1, window_bounds = array<i64: 1, 1, 16>}, {pipeline_mode = #tpu.pipeline_mode<synchronous>, transform_indices = @transform_2, window_bounds = array<i64: 32, 32>}, {pipeline_mode = #tpu.pipeline_mode<synchronous>, transform_indices = @transform_3, window_bounds = array<i64: 1, 32>}, {pipeline_mode = #tpu.pipeline_mode<synchronous>, transform_indices = @transform_4, window_bounds = array<i64: 32, 32>}, {pipeline_mode = #tpu.pipeline_mode<synchronous>, transform_indices = @transform_5, window_bounds = array<i64: 1, 32>}, {pipeline_mode = #tpu.pipeline_mode<synchronous>, transform_indices = @transform_6, window_bounds = array<i64: 32, 32>}, {pipeline_mode = #tpu.pipeline_mode<synchronous>, transform_indices = @transform_7, window_bounds = array<i64: 1, 32>}, {pipeline_mode = #tpu.pipeline_mode<synchronous>, transform_indices = @transform_8, window_bounds = array<i64: 32, 32>}, {pipeline_mode = #tpu.pipeline_mode<synchronous>, transform_indices = @transform_9, window_bounds = array<i64: 1, 32>}, {pipeline_mode = #tpu.pipeline_mode<synchronous>, transform_indices = @transform_10, window_bounds = array<i64: 1, 32>}, {pipeline_mode = #tpu.pipeline_mode<synchronous>, transform_indices = @transform_11, window_bounds = array<i64: 1, 32>}, {pipeline_mode = #tpu.pipeline_mode<synchronous>, transform_indices = @transform_12, window_bounds = array<i64: 1, 32>}, {pipeline_mode = #tpu.pipeline_mode<synchronous>, transform_indices = @transform_13, window_bounds = array<i64: 1, 32>}, {pipeline_mode = #tpu.pipeline_mode<synchronous>, transform_indices = @transform_14, window_bounds = array<i64: 32, 64>}, {pipeline_mode = #tpu.pipeline_mode<synchronous>, transform_indices = @transform_15, window_bounds = array<i64: 1, 64>}, {pipeline_mode = #tpu.pipeline_mode<synchronous>, transform_indices = @transform_16, window_bounds = array<i64: 64, 32>}, {pipeline_mode = #tpu.pipeline_mode<synchronous>, transform_indices = @transform_17, window_bounds = array<i64: 1, 32>}, {pipeline_mode = #tpu.pipeline_mode<synchronous>, transform_indices = @transform_18, window_bounds = array<i64: 16, 8>}, {pipeline_mode = #tpu.pipeline_mode<synchronous>, transform_indices = @transform_19, window_bounds = array<i64: 16, 8>}, {transform_indices = @transform_20, window_bounds = array<i64: 1, 8, 32>}]} {
    %c0_i32 = arith.constant 0 : i32
    %0 = arith.cmpi eq, %arg1, %c0_i32 : i32
    %1 = arith.extui %0 : i1 to i32
    %c0_i32_0 = arith.constant 0 : i32
    %2 = arith.cmpi ne, %1, %c0_i32_0 : i32
    scf.if %2 {
      %c0_91 = arith.constant 0 : index
      %c0_92 = arith.constant 0 : index
      %c0_93 = arith.constant 0 : index
      %202 = vector.load %arg2[%c0_91, %c0_92, %c0_93] : memref<1x16x32xf32, #tpu.memory_space<vmem>>, vector<1x16x32xf32>
      %203 = vector.shape_cast %202 : vector<1x16x32xf32> to vector<16x32xf32>
      %c0_94 = arith.constant 0 : index
      %c0_95 = arith.constant 0 : index
      %204 = vector.load %arg12[%c0_94, %c0_95] : memref<1x32xf32, #tpu.memory_space<vmem>>, vector<1x32xf32>
      %c0_96 = arith.constant 0 : index
      %c0_97 = arith.constant 0 : index
      %205 = vector.load %arg13[%c0_96, %c0_97] : memref<1x32xf32, #tpu.memory_space<vmem>>, vector<1x32xf32>
      %cst_98 = arith.constant dense<0.000000e+00> : vector<16xf32>
      %206 = vector.multi_reduction <add>, %203, %cst_98 [1] : vector<16x32xf32> to vector<16xf32>
      %207 = vector.shape_cast %206 : vector<16xf32> to vector<16x1xf32>
      %cst_99 = arith.constant 3.200000e+01 : f32
      %208 = vector.broadcast %cst_99 : f32 to vector<16x1xf32>
      %209 = arith.divf %207, %208 : vector<16x1xf32>
      %210 = vector.broadcast %209 : vector<16x1xf32> to vector<16x32xf32>
      %211 = arith.subf %203, %210 : vector<16x32xf32>
      %212 = arith.mulf %211, %211 : vector<16x32xf32>
      %cst_100 = arith.constant dense<0.000000e+00> : vector<16xf32>
      %213 = vector.multi_reduction <add>, %212, %cst_100 [1] : vector<16x32xf32> to vector<16xf32>
      %214 = vector.shape_cast %213 : vector<16xf32> to vector<16x1xf32>
      %cst_101 = arith.constant 3.200000e+01 : f32
      %215 = vector.broadcast %cst_101 : f32 to vector<16x1xf32>
      %216 = arith.divf %214, %215 : vector<16x1xf32>
      %cst_102 = arith.constant 9.99999974E-6 : f32
      %217 = vector.broadcast %cst_102 : f32 to vector<16x1xf32>
      %218 = arith.addf %216, %217 : vector<16x1xf32>
      %219 = math.rsqrt %218 : vector<16x1xf32>
      %220 = vector.broadcast %219 : vector<16x1xf32> to vector<16x32xf32>
      %221 = arith.mulf %211, %220 : vector<16x32xf32>
      %222 = vector.broadcast %204 : vector<1x32xf32> to vector<16x32xf32>
      %223 = arith.mulf %221, %222 : vector<16x32xf32>
      %224 = vector.broadcast %205 : vector<1x32xf32> to vector<16x32xf32>
      %225 = arith.addf %223, %224 : vector<16x32xf32>
      %226 = arith.truncf %225 : vector<16x32xf32> to vector<16x32xbf16>
      %c0_103 = arith.constant 0 : index
      %c0_104 = arith.constant 0 : index
      %227 = vector.load %arg6[%c0_103, %c0_104] : memref<32x32xbf16, #tpu.memory_space<vmem>>, vector<32x32xbf16>
      %cst_105 = arith.constant dense<0.000000e+00> : vector<16x32xf32>
      %228 = tpu.matmul %226, %227, %cst_105 {dimension_numbers = #tpu.dot_dimension_numbers<[1], [0], [0], [1], [0, 0, 1, 1], [], []>} : vector<16x32xbf16>, vector<32x32xbf16>, vector<16x32xf32> -> vector<16x32xf32>
      %c0_106 = arith.constant 0 : index
      %c0_107 = arith.constant 0 : index
      %229 = vector.load %arg7[%c0_106, %c0_107] : memref<1x32xf32, #tpu.memory_space<vmem>>, vector<1x32xf32>
      %230 = vector.broadcast %229 : vector<1x32xf32> to vector<16x32xf32>
      %231 = arith.addf %228, %230 : vector<16x32xf32>
      %c0_108 = arith.constant 0 : index
      %c0_109 = arith.constant 0 : index
      %232 = vector.load %arg8[%c0_108, %c0_109] : memref<32x32xbf16, #tpu.memory_space<vmem>>, vector<32x32xbf16>
      %cst_110 = arith.constant dense<0.000000e+00> : vector<16x32xf32>
      %233 = tpu.matmul %226, %232, %cst_110 {dimension_numbers = #tpu.dot_dimension_numbers<[1], [0], [0], [1], [0, 0, 1, 1], [], []>} : vector<16x32xbf16>, vector<32x32xbf16>, vector<16x32xf32> -> vector<16x32xf32>
      %c0_111 = arith.constant 0 : index
      %c0_112 = arith.constant 0 : index
      %234 = vector.load %arg9[%c0_111, %c0_112] : memref<1x32xf32, #tpu.memory_space<vmem>>, vector<1x32xf32>
      %235 = vector.broadcast %234 : vector<1x32xf32> to vector<16x32xf32>
      %236 = arith.addf %233, %235 : vector<16x32xf32>
      %237 = arith.truncf %236 : vector<16x32xf32> to vector<16x32xbf16>
      %c0_113 = arith.constant 0 : index
      %c0_114 = arith.constant 0 : index
      %238 = vector.load %arg24[%c0_113, %c0_114] : memref<16x32xbf16, #tpu.memory_space<vmem>>, vector<16x32xbf16>
      tpu.vector_store %arg24[%c0_113, %c0_114], %237 {strides = array<i32>} : memref<16x32xbf16, #tpu.memory_space<vmem>>, vector<16x32xbf16>,
      %c0_115 = arith.constant 0 : index
      %c0_116 = arith.constant 0 : index
      %239 = vector.load %arg20[%c0_115, %c0_116] : memref<16x8xf32, #tpu.memory_space<vmem>>, vector<16x8xf32>
      %c0_117 = arith.constant 0 : index
      %c0_118 = arith.constant 0 : index
      %240 = vector.load %arg21[%c0_117, %c0_118] : memref<16x8xf32, #tpu.memory_space<vmem>>, vector<16x8xf32>
      %241 = vector.extract_strided_slice %231 {offsets = [0, 0], sizes = [16, 8], strides = [1, 1]} : vector<16x32xf32> to vector<16x8xf32>
      %242 = vector.extract_strided_slice %241 {offsets = [0, 4], sizes = [16, 4], strides = [1, 1]} : vector<16x8xf32> to vector<16x4xf32>
      %243 = vector.extract_strided_slice %241 {offsets = [0, 0], sizes = [16, 4], strides = [1, 1]} : vector<16x8xf32> to vector<16x4xf32>
      %244 = tpu.concatenate %242, %243 in 1 : vector<16x4xf32>, vector<16x4xf32> -> vector<16x8xf32>
      %245 = arith.mulf %241, %239 : vector<16x8xf32>
      %246 = arith.mulf %244, %240 : vector<16x8xf32>
      %247 = arith.addf %245, %246 : vector<16x8xf32>
      %248 = arith.truncf %247 : vector<16x8xf32> to vector<16x8xbf16>
      %c0_119 = arith.constant 0 : index
      %c0_120 = arith.constant 0 : index
      %249 = vector.load %arg23[%c0_119, %c0_120] : memref<16x32xbf16, #tpu.memory_space<vmem>>, vector<16x8xbf16>
      tpu.vector_store %arg23[%c0_119, %c0_120], %248 {strides = array<i32>} : memref<16x32xbf16, #tpu.memory_space<vmem>>, vector<16x8xbf16>,
      %250 = vector.extract_strided_slice %231 {offsets = [0, 8], sizes = [16, 8], strides = [1, 1]} : vector<16x32xf32> to vector<16x8xf32>
      %251 = vector.extract_strided_slice %250 {offsets = [0, 4], sizes = [16, 4], strides = [1, 1]} : vector<16x8xf32> to vector<16x4xf32>
      %252 = vector.extract_strided_slice %250 {offsets = [0, 0], sizes = [16, 4], strides = [1, 1]} : vector<16x8xf32> to vector<16x4xf32>
      %253 = tpu.concatenate %251, %252 in 1 : vector<16x4xf32>, vector<16x4xf32> -> vector<16x8xf32>
      %254 = arith.mulf %250, %239 : vector<16x8xf32>
      %255 = arith.mulf %253, %240 : vector<16x8xf32>
      %256 = arith.addf %254, %255 : vector<16x8xf32>
      %257 = arith.truncf %256 : vector<16x8xf32> to vector<16x8xbf16>
      %c0_121 = arith.constant 0 : index
      %c8_122 = arith.constant 8 : index
      %258 = vector.load %arg23[%c0_121, %c8_122] : memref<16x32xbf16, #tpu.memory_space<vmem>>, vector<16x8xbf16>
      tpu.vector_store %arg23[%c0_121, %c8_122], %257 {strides = array<i32>} : memref<16x32xbf16, #tpu.memory_space<vmem>>, vector<16x8xbf16>,
      %259 = vector.extract_strided_slice %231 {offsets = [0, 16], sizes = [16, 8], strides = [1, 1]} : vector<16x32xf32> to vector<16x8xf32>
      %260 = vector.extract_strided_slice %259 {offsets = [0, 4], sizes = [16, 4], strides = [1, 1]} : vector<16x8xf32> to vector<16x4xf32>
      %261 = vector.extract_strided_slice %259 {offsets = [0, 0], sizes = [16, 4], strides = [1, 1]} : vector<16x8xf32> to vector<16x4xf32>
      %262 = tpu.concatenate %260, %261 in 1 : vector<16x4xf32>, vector<16x4xf32> -> vector<16x8xf32>
      %263 = arith.mulf %259, %239 : vector<16x8xf32>
      %264 = arith.mulf %262, %240 : vector<16x8xf32>
      %265 = arith.addf %263, %264 : vector<16x8xf32>
      %266 = arith.truncf %265 : vector<16x8xf32> to vector<16x8xbf16>
      %c0_123 = arith.constant 0 : index
      %c16_124 = arith.constant 16 : index
      %267 = vector.load %arg23[%c0_123, %c16_124] : memref<16x32xbf16, #tpu.memory_space<vmem>>, vector<16x8xbf16>
      tpu.vector_store %arg23[%c0_123, %c16_124], %266 {strides = array<i32>} : memref<16x32xbf16, #tpu.memory_space<vmem>>, vector<16x8xbf16>,
      %268 = vector.extract_strided_slice %231 {offsets = [0, 24], sizes = [16, 8], strides = [1, 1]} : vector<16x32xf32> to vector<16x8xf32>
      %269 = vector.extract_strided_slice %268 {offsets = [0, 4], sizes = [16, 4], strides = [1, 1]} : vector<16x8xf32> to vector<16x4xf32>
      %270 = vector.extract_strided_slice %268 {offsets = [0, 0], sizes = [16, 4], strides = [1, 1]} : vector<16x8xf32> to vector<16x4xf32>
      %271 = tpu.concatenate %269, %270 in 1 : vector<16x4xf32>, vector<16x4xf32> -> vector<16x8xf32>
      %272 = arith.mulf %268, %239 : vector<16x8xf32>
      %273 = arith.mulf %271, %240 : vector<16x8xf32>
      %274 = arith.addf %272, %273 : vector<16x8xf32>
      %275 = arith.truncf %274 : vector<16x8xf32> to vector<16x8xbf16>
      %c0_125 = arith.constant 0 : index
      %c24_126 = arith.constant 24 : index
      %276 = vector.load %arg23[%c0_125, %c24_126] : memref<16x32xbf16, #tpu.memory_space<vmem>>, vector<16x8xbf16>
      tpu.vector_store %arg23[%c0_125, %c24_126], %275 {strides = array<i32>} : memref<16x32xbf16, #tpu.memory_space<vmem>>, vector<16x8xbf16>,
    } else {
    }
    %c8_i32 = arith.constant 8 : i32
    %3 = arith.muli %arg1, %c8_i32 : i32
    %4 = tpu.assume_multiple %3, 8 : i32
    %c0 = arith.constant 0 : index
    %5 = arith.index_cast %4 : i32 to index
    %c0_1 = arith.constant 0 : index
    %6 = vector.load %arg2[%c0, %5, %c0_1] : memref<1x16x32xf32, #tpu.memory_space<vmem>>, vector<1x8x32xf32>
    %7 = vector.shape_cast %6 : vector<1x8x32xf32> to vector<8x32xf32>
    %c0_2 = arith.constant 0 : index
    %c0_3 = arith.constant 0 : index
    %8 = vector.load %arg12[%c0_2, %c0_3] : memref<1x32xf32, #tpu.memory_space<vmem>>, vector<1x32xf32>
    %c0_4 = arith.constant 0 : index
    %c0_5 = arith.constant 0 : index
    %9 = vector.load %arg13[%c0_4, %c0_5] : memref<1x32xf32, #tpu.memory_space<vmem>>, vector<1x32xf32>
    %cst = arith.constant dense<0.000000e+00> : vector<8xf32>
    %10 = vector.multi_reduction <add>, %7, %cst [1] : vector<8x32xf32> to vector<8xf32>
    %11 = vector.shape_cast %10 : vector<8xf32> to vector<8x1xf32>
    %cst_6 = arith.constant 3.200000e+01 : f32
    %12 = vector.broadcast %cst_6 : f32 to vector<8x1xf32>
    %13 = arith.divf %11, %12 : vector<8x1xf32>
    %14 = vector.broadcast %13 : vector<8x1xf32> to vector<8x32xf32>
    %15 = arith.subf %7, %14 : vector<8x32xf32>
    %16 = arith.mulf %15, %15 : vector<8x32xf32>
    %cst_7 = arith.constant dense<0.000000e+00> : vector<8xf32>
    %17 = vector.multi_reduction <add>, %16, %cst_7 [1] : vector<8x32xf32> to vector<8xf32>
    %18 = vector.shape_cast %17 : vector<8xf32> to vector<8x1xf32>
    %cst_8 = arith.constant 3.200000e+01 : f32
    %19 = vector.broadcast %cst_8 : f32 to vector<8x1xf32>
    %20 = arith.divf %18, %19 : vector<8x1xf32>
    %cst_9 = arith.constant 9.99999974E-6 : f32
    %21 = vector.broadcast %cst_9 : f32 to vector<8x1xf32>
    %22 = arith.addf %20, %21 : vector<8x1xf32>
    %23 = math.rsqrt %22 : vector<8x1xf32>
    %24 = vector.broadcast %23 : vector<8x1xf32> to vector<8x32xf32>
    %25 = arith.mulf %15, %24 : vector<8x32xf32>
    %26 = vector.broadcast %8 : vector<1x32xf32> to vector<8x32xf32>
    %27 = arith.mulf %25, %26 : vector<8x32xf32>
    %28 = vector.broadcast %9 : vector<1x32xf32> to vector<8x32xf32>
    %29 = arith.addf %27, %28 : vector<8x32xf32>
    %30 = arith.truncf %29 : vector<8x32xf32> to vector<8x32xbf16>
    %c0_10 = arith.constant 0 : index
    %c0_11 = arith.constant 0 : index
    %31 = vector.load %arg4[%c0_10, %c0_11] : memref<32x32xbf16, #tpu.memory_space<vmem>>, vector<32x32xbf16>
    %cst_12 = arith.constant dense<0.000000e+00> : vector<8x32xf32>
    %32 = tpu.matmul %30, %31, %cst_12 {dimension_numbers = #tpu.dot_dimension_numbers<[1], [0], [0], [1], [0, 0, 1, 1], [], []>} : vector<8x32xbf16>, vector<32x32xbf16>, vector<8x32xf32> -> vector<8x32xf32>
    %c0_13 = arith.constant 0 : index
    %c0_14 = arith.constant 0 : index
    %33 = vector.load %arg5[%c0_13, %c0_14] : memref<1x32xf32, #tpu.memory_space<vmem>>, vector<1x32xf32>
    %34 = vector.broadcast %33 : vector<1x32xf32> to vector<8x32xf32>
    %35 = arith.addf %32, %34 : vector<8x32xf32>
    %36 = arith.index_cast %4 : i32 to index
    %c0_15 = arith.constant 0 : index
    %37 = vector.load %arg20[%36, %c0_15] : memref<16x8xf32, #tpu.memory_space<vmem>>, vector<8x8xf32>
    %38 = arith.index_cast %4 : i32 to index
    %c0_16 = arith.constant 0 : index
    %39 = vector.load %arg21[%38, %c0_16] : memref<16x8xf32, #tpu.memory_space<vmem>>, vector<8x8xf32>
    %c0_17 = arith.constant 0 : index
    %c0_18 = arith.constant 0 : index
    %c0_19 = arith.constant 0 : index
    %40 = vector.load %arg3[%c0_17, %c0_18, %c0_19] : memref<1x1x16xf32, #tpu.memory_space<vmem>>, vector<1x1x16xf32>
    %41 = vector.shape_cast %40 : vector<1x1x16xf32> to vector<1x16xf32>
    %42 = vector.extract_strided_slice %35 {offsets = [0, 0], sizes = [8, 8], strides = [1, 1]} : vector<8x32xf32> to vector<8x8xf32>
    %43 = vector.extract_strided_slice %42 {offsets = [0, 4], sizes = [8, 4], strides = [1, 1]} : vector<8x8xf32> to vector<8x4xf32>
    %44 = vector.extract_strided_slice %42 {offsets = [0, 0], sizes = [8, 4], strides = [1, 1]} : vector<8x8xf32> to vector<8x4xf32>
    %45 = tpu.concatenate %43, %44 in 1 : vector<8x4xf32>, vector<8x4xf32> -> vector<8x8xf32>
    %46 = arith.mulf %42, %37 : vector<8x8xf32>
    %47 = arith.mulf %45, %39 : vector<8x8xf32>
    %48 = arith.addf %46, %47 : vector<8x8xf32>
    %cst_20 = arith.constant 0.353553385 : f32
    %49 = vector.broadcast %cst_20 : f32 to vector<8x8xf32>
    %50 = arith.mulf %48, %49 : vector<8x8xf32>
    %51 = arith.truncf %50 : vector<8x8xf32> to vector<8x8xbf16>
    %c0_21 = arith.constant 0 : index
    %c0_22 = arith.constant 0 : index
    %52 = vector.load %arg23[%c0_21, %c0_22] : memref<16x32xbf16, #tpu.memory_space<vmem>>, vector<16x8xbf16>
    %c0_23 = arith.constant 0 : index
    %c0_24 = arith.constant 0 : index
    %53 = vector.load %arg24[%c0_23, %c0_24] : memref<16x32xbf16, #tpu.memory_space<vmem>>, vector<16x8xbf16>
    %cst_25 = arith.constant dense<0.000000e+00> : vector<8x16xf32>
    %54 = tpu.matmul %51, %52, %cst_25 {dimension_numbers = #tpu.dot_dimension_numbers<[1], [1], [0], [0], [0, 0, 1, 0], [], []>} : vector<8x8xbf16>, vector<16x8xbf16>, vector<8x16xf32> -> vector<8x16xf32>
    %55 = vector.broadcast %41 : vector<1x16xf32> to vector<8x16xf32>
    %56 = arith.addf %54, %55 : vector<8x16xf32>
    %cst_26 = arith.constant dense<0xFF800000> : vector<8xf32>
    %57 = vector.multi_reduction <maximumf>, %56, %cst_26 [1] : vector<8x16xf32> to vector<8xf32>
    %58 = vector.shape_cast %57 : vector<8xf32> to vector<8x1xf32>
    %59 = vector.broadcast %58 : vector<8x1xf32> to vector<8x16xf32>
    %60 = arith.subf %56, %59 : vector<8x16xf32>
    %61 = math.exp %60 : vector<8x16xf32>
    %cst_27 = arith.constant dense<0.000000e+00> : vector<8xf32>
    %62 = vector.multi_reduction <add>, %61, %cst_27 [1] : vector<8x16xf32> to vector<8xf32>
    %63 = vector.shape_cast %62 : vector<8xf32> to vector<8x1xf32>
    %64 = arith.truncf %61 : vector<8x16xf32> to vector<8x16xbf16>
    %cst_28 = arith.constant dense<0.000000e+00> : vector<8x8xf32>
    %65 = tpu.matmul %64, %53, %cst_28 {dimension_numbers = #tpu.dot_dimension_numbers<[1], [0], [0], [1], [0, 0, 1, 1], [], []>} : vector<8x16xbf16>, vector<16x8xbf16>, vector<8x8xf32> -> vector<8x8xf32>
    %66 = tpu.reciprocal %63 {approx = true} : vector<8x1xf32> -> vector<8x1xf32>
    %67 = vector.broadcast %66 : vector<8x1xf32> to vector<8x8xf32>
    %68 = arith.mulf %65, %67 : vector<8x8xf32>
    %c0_29 = arith.constant 0 : index
    %c0_30 = arith.constant 0 : index
    %69 = vector.load %arg25[%c0_29, %c0_30] : memref<8x32xf32, #tpu.memory_space<vmem>>, vector<8x8xf32>
    tpu.vector_store %arg25[%c0_29, %c0_30], %68 {strides = array<i32>} : memref<8x32xf32, #tpu.memory_space<vmem>>, vector<8x8xf32>,
    %70 = vector.extract_strided_slice %35 {offsets = [0, 8], sizes = [8, 8], strides = [1, 1]} : vector<8x32xf32> to vector<8x8xf32>
    %71 = vector.extract_strided_slice %70 {offsets = [0, 4], sizes = [8, 4], strides = [1, 1]} : vector<8x8xf32> to vector<8x4xf32>
    %72 = vector.extract_strided_slice %70 {offsets = [0, 0], sizes = [8, 4], strides = [1, 1]} : vector<8x8xf32> to vector<8x4xf32>
    %73 = tpu.concatenate %71, %72 in 1 : vector<8x4xf32>, vector<8x4xf32> -> vector<8x8xf32>
    %74 = arith.mulf %70, %37 : vector<8x8xf32>
    %75 = arith.mulf %73, %39 : vector<8x8xf32>
    %76 = arith.addf %74, %75 : vector<8x8xf32>
    %cst_31 = arith.constant 0.353553385 : f32
    %77 = vector.broadcast %cst_31 : f32 to vector<8x8xf32>
    %78 = arith.mulf %76, %77 : vector<8x8xf32>
    %79 = arith.truncf %78 : vector<8x8xf32> to vector<8x8xbf16>
    %c0_32 = arith.constant 0 : index
    %c8 = arith.constant 8 : index
    %80 = vector.load %arg23[%c0_32, %c8] : memref<16x32xbf16, #tpu.memory_space<vmem>>, vector<16x8xbf16>
    %c0_33 = arith.constant 0 : index
    %c8_34 = arith.constant 8 : index
    %81 = vector.load %arg24[%c0_33, %c8_34] : memref<16x32xbf16, #tpu.memory_space<vmem>>, vector<16x8xbf16>
    %cst_35 = arith.constant dense<0.000000e+00> : vector<8x16xf32>
    %82 = tpu.matmul %79, %80, %cst_35 {dimension_numbers = #tpu.dot_dimension_numbers<[1], [1], [0], [0], [0, 0, 1, 0], [], []>} : vector<8x8xbf16>, vector<16x8xbf16>, vector<8x16xf32> -> vector<8x16xf32>
    %83 = vector.broadcast %41 : vector<1x16xf32> to vector<8x16xf32>
    %84 = arith.addf %82, %83 : vector<8x16xf32>
    %cst_36 = arith.constant dense<0xFF800000> : vector<8xf32>
    %85 = vector.multi_reduction <maximumf>, %84, %cst_36 [1] : vector<8x16xf32> to vector<8xf32>
    %86 = vector.shape_cast %85 : vector<8xf32> to vector<8x1xf32>
    %87 = vector.broadcast %86 : vector<8x1xf32> to vector<8x16xf32>
    %88 = arith.subf %84, %87 : vector<8x16xf32>
    %89 = math.exp %88 : vector<8x16xf32>
    %cst_37 = arith.constant dense<0.000000e+00> : vector<8xf32>
    %90 = vector.multi_reduction <add>, %89, %cst_37 [1] : vector<8x16xf32> to vector<8xf32>
    %91 = vector.shape_cast %90 : vector<8xf32> to vector<8x1xf32>
    %92 = arith.truncf %89 : vector<8x16xf32> to vector<8x16xbf16>
    %cst_38 = arith.constant dense<0.000000e+00> : vector<8x8xf32>
    %93 = tpu.matmul %92, %81, %cst_38 {dimension_numbers = #tpu.dot_dimension_numbers<[1], [0], [0], [1], [0, 0, 1, 1], [], []>} : vector<8x16xbf16>, vector<16x8xbf16>, vector<8x8xf32> -> vector<8x8xf32>
    %94 = tpu.reciprocal %91 {approx = true} : vector<8x1xf32> -> vector<8x1xf32>
    %95 = vector.broadcast %94 : vector<8x1xf32> to vector<8x8xf32>
    %96 = arith.mulf %93, %95 : vector<8x8xf32>
    %c0_39 = arith.constant 0 : index
    %c8_40 = arith.constant 8 : index
    %97 = vector.load %arg25[%c0_39, %c8_40] : memref<8x32xf32, #tpu.memory_space<vmem>>, vector<8x8xf32>
    tpu.vector_store %arg25[%c0_39, %c8_40], %96 {strides = array<i32>} : memref<8x32xf32, #tpu.memory_space<vmem>>, vector<8x8xf32>,
    %98 = vector.extract_strided_slice %35 {offsets = [0, 16], sizes = [8, 8], strides = [1, 1]} : vector<8x32xf32> to vector<8x8xf32>
    %99 = vector.extract_strided_slice %98 {offsets = [0, 4], sizes = [8, 4], strides = [1, 1]} : vector<8x8xf32> to vector<8x4xf32>
    %100 = vector.extract_strided_slice %98 {offsets = [0, 0], sizes = [8, 4], strides = [1, 1]} : vector<8x8xf32> to vector<8x4xf32>
    %101 = tpu.concatenate %99, %100 in 1 : vector<8x4xf32>, vector<8x4xf32> -> vector<8x8xf32>
    %102 = arith.mulf %98, %37 : vector<8x8xf32>
    %103 = arith.mulf %101, %39 : vector<8x8xf32>
    %104 = arith.addf %102, %103 : vector<8x8xf32>
    %cst_41 = arith.constant 0.353553385 : f32
    %105 = vector.broadcast %cst_41 : f32 to vector<8x8xf32>
    %106 = arith.mulf %104, %105 : vector<8x8xf32>
    %107 = arith.truncf %106 : vector<8x8xf32> to vector<8x8xbf16>
    %c0_42 = arith.constant 0 : index
    %c16 = arith.constant 16 : index
    %108 = vector.load %arg23[%c0_42, %c16] : memref<16x32xbf16, #tpu.memory_space<vmem>>, vector<16x8xbf16>
    %c0_43 = arith.constant 0 : index
    %c16_44 = arith.constant 16 : index
    %109 = vector.load %arg24[%c0_43, %c16_44] : memref<16x32xbf16, #tpu.memory_space<vmem>>, vector<16x8xbf16>
    %cst_45 = arith.constant dense<0.000000e+00> : vector<8x16xf32>
    %110 = tpu.matmul %107, %108, %cst_45 {dimension_numbers = #tpu.dot_dimension_numbers<[1], [1], [0], [0], [0, 0, 1, 0], [], []>} : vector<8x8xbf16>, vector<16x8xbf16>, vector<8x16xf32> -> vector<8x16xf32>
    %111 = vector.broadcast %41 : vector<1x16xf32> to vector<8x16xf32>
    %112 = arith.addf %110, %111 : vector<8x16xf32>
    %cst_46 = arith.constant dense<0xFF800000> : vector<8xf32>
    %113 = vector.multi_reduction <maximumf>, %112, %cst_46 [1] : vector<8x16xf32> to vector<8xf32>
    %114 = vector.shape_cast %113 : vector<8xf32> to vector<8x1xf32>
    %115 = vector.broadcast %114 : vector<8x1xf32> to vector<8x16xf32>
    %116 = arith.subf %112, %115 : vector<8x16xf32>
    %117 = math.exp %116 : vector<8x16xf32>
    %cst_47 = arith.constant dense<0.000000e+00> : vector<8xf32>
    %118 = vector.multi_reduction <add>, %117, %cst_47 [1] : vector<8x16xf32> to vector<8xf32>
    %119 = vector.shape_cast %118 : vector<8xf32> to vector<8x1xf32>
    %120 = arith.truncf %117 : vector<8x16xf32> to vector<8x16xbf16>
    %cst_48 = arith.constant dense<0.000000e+00> : vector<8x8xf32>
    %121 = tpu.matmul %120, %109, %cst_48 {dimension_numbers = #tpu.dot_dimension_numbers<[1], [0], [0], [1], [0, 0, 1, 1], [], []>} : vector<8x16xbf16>, vector<16x8xbf16>, vector<8x8xf32> -> vector<8x8xf32>
    %122 = tpu.reciprocal %119 {approx = true} : vector<8x1xf32> -> vector<8x1xf32>
    %123 = vector.broadcast %122 : vector<8x1xf32> to vector<8x8xf32>
    %124 = arith.mulf %121, %123 : vector<8x8xf32>
    %c0_49 = arith.constant 0 : index
    %c16_50 = arith.constant 16 : index
    %125 = vector.load %arg25[%c0_49, %c16_50] : memref<8x32xf32, #tpu.memory_space<vmem>>, vector<8x8xf32>
    tpu.vector_store %arg25[%c0_49, %c16_50], %124 {strides = array<i32>} : memref<8x32xf32, #tpu.memory_space<vmem>>, vector<8x8xf32>,
    %126 = vector.extract_strided_slice %35 {offsets = [0, 24], sizes = [8, 8], strides = [1, 1]} : vector<8x32xf32> to vector<8x8xf32>
    %127 = vector.extract_strided_slice %126 {offsets = [0, 4], sizes = [8, 4], strides = [1, 1]} : vector<8x8xf32> to vector<8x4xf32>
    %128 = vector.extract_strided_slice %126 {offsets = [0, 0], sizes = [8, 4], strides = [1, 1]} : vector<8x8xf32> to vector<8x4xf32>
    %129 = tpu.concatenate %127, %128 in 1 : vector<8x4xf32>, vector<8x4xf32> -> vector<8x8xf32>
    %130 = arith.mulf %126, %37 : vector<8x8xf32>
    %131 = arith.mulf %129, %39 : vector<8x8xf32>
    %132 = arith.addf %130, %131 : vector<8x8xf32>
    %cst_51 = arith.constant 0.353553385 : f32
    %133 = vector.broadcast %cst_51 : f32 to vector<8x8xf32>
    %134 = arith.mulf %132, %133 : vector<8x8xf32>
    %135 = arith.truncf %134 : vector<8x8xf32> to vector<8x8xbf16>
    %c0_52 = arith.constant 0 : index
    %c24 = arith.constant 24 : index
    %136 = vector.load %arg23[%c0_52, %c24] : memref<16x32xbf16, #tpu.memory_space<vmem>>, vector<16x8xbf16>
    %c0_53 = arith.constant 0 : index
    %c24_54 = arith.constant 24 : index
    %137 = vector.load %arg24[%c0_53, %c24_54] : memref<16x32xbf16, #tpu.memory_space<vmem>>, vector<16x8xbf16>
    %cst_55 = arith.constant dense<0.000000e+00> : vector<8x16xf32>
    %138 = tpu.matmul %135, %136, %cst_55 {dimension_numbers = #tpu.dot_dimension_numbers<[1], [1], [0], [0], [0, 0, 1, 0], [], []>} : vector<8x8xbf16>, vector<16x8xbf16>, vector<8x16xf32> -> vector<8x16xf32>
    %139 = vector.broadcast %41 : vector<1x16xf32> to vector<8x16xf32>
    %140 = arith.addf %138, %139 : vector<8x16xf32>
    %cst_56 = arith.constant dense<0xFF800000> : vector<8xf32>
    %141 = vector.multi_reduction <maximumf>, %140, %cst_56 [1] : vector<8x16xf32> to vector<8xf32>
    %142 = vector.shape_cast %141 : vector<8xf32> to vector<8x1xf32>
    %143 = vector.broadcast %142 : vector<8x1xf32> to vector<8x16xf32>
    %144 = arith.subf %140, %143 : vector<8x16xf32>
    %145 = math.exp %144 : vector<8x16xf32>
    %cst_57 = arith.constant dense<0.000000e+00> : vector<8xf32>
    %146 = vector.multi_reduction <add>, %145, %cst_57 [1] : vector<8x16xf32> to vector<8xf32>
    %147 = vector.shape_cast %146 : vector<8xf32> to vector<8x1xf32>
    %148 = arith.truncf %145 : vector<8x16xf32> to vector<8x16xbf16>
    %cst_58 = arith.constant dense<0.000000e+00> : vector<8x8xf32>
    %149 = tpu.matmul %148, %137, %cst_58 {dimension_numbers = #tpu.dot_dimension_numbers<[1], [0], [0], [1], [0, 0, 1, 1], [], []>} : vector<8x16xbf16>, vector<16x8xbf16>, vector<8x8xf32> -> vector<8x8xf32>
    %150 = tpu.reciprocal %147 {approx = true} : vector<8x1xf32> -> vector<8x1xf32>
    %151 = vector.broadcast %150 : vector<8x1xf32> to vector<8x8xf32>
    %152 = arith.mulf %149, %151 : vector<8x8xf32>
    %c0_59 = arith.constant 0 : index
    %c24_60 = arith.constant 24 : index
    %153 = vector.load %arg25[%c0_59, %c24_60] : memref<8x32xf32, #tpu.memory_space<vmem>>, vector<8x8xf32>
    tpu.vector_store %arg25[%c0_59, %c24_60], %152 {strides = array<i32>} : memref<8x32xf32, #tpu.memory_space<vmem>>, vector<8x8xf32>,
    %c0_61 = arith.constant 0 : index
    %c0_62 = arith.constant 0 : index
    %154 = vector.load %arg25[%c0_61, %c0_62] : memref<8x32xf32, #tpu.memory_space<vmem>>, vector<8x32xf32>
    %155 = arith.truncf %154 : vector<8x32xf32> to vector<8x32xbf16>
    %c0_63 = arith.constant 0 : index
    %c0_64 = arith.constant 0 : index
    %156 = vector.load %arg10[%c0_63, %c0_64] : memref<32x32xbf16, #tpu.memory_space<vmem>>, vector<32x32xbf16>
    %cst_65 = arith.constant dense<0.000000e+00> : vector<8x32xf32>
    %157 = tpu.matmul %155, %156, %cst_65 {dimension_numbers = #tpu.dot_dimension_numbers<[1], [0], [0], [1], [0, 0, 1, 1], [], []>} : vector<8x32xbf16>, vector<32x32xbf16>, vector<8x32xf32> -> vector<8x32xf32>
    %c0_66 = arith.constant 0 : index
    %c0_67 = arith.constant 0 : index
    %158 = vector.load %arg11[%c0_66, %c0_67] : memref<1x32xf32, #tpu.memory_space<vmem>>, vector<1x32xf32>
    %159 = vector.broadcast %158 : vector<1x32xf32> to vector<8x32xf32>
    %160 = arith.addf %157, %159 : vector<8x32xf32>
    %161 = arith.addf %7, %160 : vector<8x32xf32>
    %c0_68 = arith.constant 0 : index
    %c0_69 = arith.constant 0 : index
    %162 = vector.load %arg14[%c0_68, %c0_69] : memref<1x32xf32, #tpu.memory_space<vmem>>, vector<1x32xf32>
    %c0_70 = arith.constant 0 : index
    %c0_71 = arith.constant 0 : index
    %163 = vector.load %arg15[%c0_70, %c0_71] : memref<1x32xf32, #tpu.memory_space<vmem>>, vector<1x32xf32>
    %cst_72 = arith.constant dense<0.000000e+00> : vector<8xf32>
    %164 = vector.multi_reduction <add>, %161, %cst_72 [1] : vector<8x32xf32> to vector<8xf32>
    %165 = vector.shape_cast %164 : vector<8xf32> to vector<8x1xf32>
    %cst_73 = arith.constant 3.200000e+01 : f32
    %166 = vector.broadcast %cst_73 : f32 to vector<8x1xf32>
    %167 = arith.divf %165, %166 : vector<8x1xf32>
    %168 = vector.broadcast %167 : vector<8x1xf32> to vector<8x32xf32>
    %169 = arith.subf %161, %168 : vector<8x32xf32>
    %170 = arith.mulf %169, %169 : vector<8x32xf32>
    %cst_74 = arith.constant dense<0.000000e+00> : vector<8xf32>
    %171 = vector.multi_reduction <add>, %170, %cst_74 [1] : vector<8x32xf32> to vector<8xf32>
    %172 = vector.shape_cast %171 : vector<8xf32> to vector<8x1xf32>
    %cst_75 = arith.constant 3.200000e+01 : f32
    %173 = vector.broadcast %cst_75 : f32 to vector<8x1xf32>
    %174 = arith.divf %172, %173 : vector<8x1xf32>
    %cst_76 = arith.constant 9.99999974E-6 : f32
    %175 = vector.broadcast %cst_76 : f32 to vector<8x1xf32>
    %176 = arith.addf %174, %175 : vector<8x1xf32>
    %177 = math.rsqrt %176 : vector<8x1xf32>
    %178 = vector.broadcast %177 : vector<8x1xf32> to vector<8x32xf32>
    %179 = arith.mulf %169, %178 : vector<8x32xf32>
    %180 = vector.broadcast %162 : vector<1x32xf32> to vector<8x32xf32>
    %181 = arith.mulf %179, %180 : vector<8x32xf32>
    %182 = vector.broadcast %163 : vector<1x32xf32> to vector<8x32xf32>
    %183 = arith.addf %181, %182 : vector<8x32xf32>
    %184 = arith.truncf %183 : vector<8x32xf32> to vector<8x32xbf16>
    %c0_77 = arith.constant 0 : index
    %c0_78 = arith.constant 0 : index
    %185 = vector.load %arg16[%c0_77, %c0_78] : memref<32x64xbf16, #tpu.memory_space<vmem>>, vector<32x64xbf16>
    %cst_79 = arith.constant dense<0.000000e+00> : vector<8x64xf32>
    %186 = tpu.matmul %184, %185, %cst_79 {dimension_numbers = #tpu.dot_dimension_numbers<[1], [0], [0], [1], [0, 0, 1, 1], [], []>} : vector<8x32xbf16>, vector<32x64xbf16>, vector<8x64xf32> -> vector<8x64xf32>
    %c0_80 = arith.constant 0 : index
    %c0_81 = arith.constant 0 : index
    %187 = vector.load %arg17[%c0_80, %c0_81] : memref<1x64xf32, #tpu.memory_space<vmem>>, vector<1x64xf32>
    %188 = vector.broadcast %187 : vector<1x64xf32> to vector<8x64xf32>
    %189 = arith.addf %186, %188 : vector<8x64xf32>
    %cst_82 = arith.constant 0.000000e+00 : f32
    %190 = vector.broadcast %cst_82 : f32 to vector<8x64xf32>
    %191 = arith.maximumf %189, %190 : vector<8x64xf32>
    %192 = arith.truncf %191 : vector<8x64xf32> to vector<8x64xbf16>
    %c0_83 = arith.constant 0 : index
    %c0_84 = arith.constant 0 : index
    %193 = vector.load %arg18[%c0_83, %c0_84] : memref<64x32xbf16, #tpu.memory_space<vmem>>, vector<64x32xbf16>
    %cst_85 = arith.constant dense<0.000000e+00> : vector<8x32xf32>
    %194 = tpu.matmul %192, %193, %cst_85 {dimension_numbers = #tpu.dot_dimension_numbers<[1], [0], [0], [1], [0, 0, 1, 1], [], []>} : vector<8x64xbf16>, vector<64x32xbf16>, vector<8x32xf32> -> vector<8x32xf32>
    %c0_86 = arith.constant 0 : index
    %c0_87 = arith.constant 0 : index
    %195 = vector.load %arg19[%c0_86, %c0_87] : memref<1x32xf32, #tpu.memory_space<vmem>>, vector<1x32xf32>
    %196 = vector.broadcast %195 : vector<1x32xf32> to vector<8x32xf32>
    %197 = arith.addf %194, %196 : vector<8x32xf32>
    %198 = arith.addf %161, %197 : vector<8x32xf32>
    %c0_88 = arith.constant 0 : index
    %c0_89 = arith.constant 0 : index
    %c0_90 = arith.constant 0 : index
    %199 = vector.load %arg22[%c0_88, %c0_89, %c0_90] : memref<1x8x32xf32, #tpu.memory_space<vmem>>, vector<1x8x32xf32>
    %200 = vector.shape_cast %199 : vector<1x8x32xf32> to vector<8x32xf32>
    %201 = vector.shape_cast %198 : vector<8x32xf32> to vector<1x8x32xf32>
    tpu.vector_store %arg22[%c0_88, %c0_89, %c0_90], %201 {strides = array<i32>} : memref<1x8x32xf32, #tpu.memory_space<vmem>>, vector<1x8x32xf32>,
    return
  }
  func.func @transform_0(%arg0: i32, %arg1: i32) -> (i32, i32, i32) {
    %c0_i32 = arith.constant 0 : i32
    %c0_i32_0 = arith.constant 0 : i32
    %c0_i32_1 = arith.constant 0 : i32
    return %arg0, %c0_i32, %c0_i32_0 : i32, i32, i32
  }
  func.func @transform_1(%arg0: i32, %arg1: i32) -> (i32, i32, i32) {
    %c0_i32 = arith.constant 0 : i32
    %c0_i32_0 = arith.constant 0 : i32
    %c0_i32_1 = arith.constant 0 : i32
    return %arg0, %c0_i32, %c0_i32_0 : i32, i32, i32
  }
  func.func @transform_2(%arg0: i32, %arg1: i32) -> (i32, i32) {
    %c0_i32 = arith.constant 0 : i32
    %c0_i32_0 = arith.constant 0 : i32
    %c0_i32_1 = arith.constant 0 : i32
    return %c0_i32, %c0_i32_0 : i32, i32
  }
  func.func @transform_3(%arg0: i32, %arg1: i32) -> (i32, i32) {
    %c0_i32 = arith.constant 0 : i32
    %c0_i32_0 = arith.constant 0 : i32
    %c0_i32_1 = arith.constant 0 : i32
    return %c0_i32, %c0_i32_0 : i32, i32
  }
  func.func @transform_4(%arg0: i32, %arg1: i32) -> (i32, i32) {
    %c0_i32 = arith.constant 0 : i32
    %c0_i32_0 = arith.constant 0 : i32
    %c0_i32_1 = arith.constant 0 : i32
    return %c0_i32, %c0_i32_0 : i32, i32
  }
  func.func @transform_5(%arg0: i32, %arg1: i32) -> (i32, i32) {
    %c0_i32 = arith.constant 0 : i32
    %c0_i32_0 = arith.constant 0 : i32
    %c0_i32_1 = arith.constant 0 : i32
    return %c0_i32, %c0_i32_0 : i32, i32
  }
  func.func @transform_6(%arg0: i32, %arg1: i32) -> (i32, i32) {
    %c0_i32 = arith.constant 0 : i32
    %c0_i32_0 = arith.constant 0 : i32
    %c0_i32_1 = arith.constant 0 : i32
    return %c0_i32, %c0_i32_0 : i32, i32
  }
  func.func @transform_7(%arg0: i32, %arg1: i32) -> (i32, i32) {
    %c0_i32 = arith.constant 0 : i32
    %c0_i32_0 = arith.constant 0 : i32
    %c0_i32_1 = arith.constant 0 : i32
    return %c0_i32, %c0_i32_0 : i32, i32
  }
  func.func @transform_8(%arg0: i32, %arg1: i32) -> (i32, i32) {
    %c0_i32 = arith.constant 0 : i32
    %c0_i32_0 = arith.constant 0 : i32
    %c0_i32_1 = arith.constant 0 : i32
    return %c0_i32, %c0_i32_0 : i32, i32
  }
  func.func @transform_9(%arg0: i32, %arg1: i32) -> (i32, i32) {
    %c0_i32 = arith.constant 0 : i32
    %c0_i32_0 = arith.constant 0 : i32
    %c0_i32_1 = arith.constant 0 : i32
    return %c0_i32, %c0_i32_0 : i32, i32
  }
  func.func @transform_10(%arg0: i32, %arg1: i32) -> (i32, i32) {
    %c0_i32 = arith.constant 0 : i32
    %c0_i32_0 = arith.constant 0 : i32
    %c0_i32_1 = arith.constant 0 : i32
    return %c0_i32, %c0_i32_0 : i32, i32
  }
  func.func @transform_11(%arg0: i32, %arg1: i32) -> (i32, i32) {
    %c0_i32 = arith.constant 0 : i32
    %c0_i32_0 = arith.constant 0 : i32
    %c0_i32_1 = arith.constant 0 : i32
    return %c0_i32, %c0_i32_0 : i32, i32
  }
  func.func @transform_12(%arg0: i32, %arg1: i32) -> (i32, i32) {
    %c0_i32 = arith.constant 0 : i32
    %c0_i32_0 = arith.constant 0 : i32
    %c0_i32_1 = arith.constant 0 : i32
    return %c0_i32, %c0_i32_0 : i32, i32
  }
  func.func @transform_13(%arg0: i32, %arg1: i32) -> (i32, i32) {
    %c0_i32 = arith.constant 0 : i32
    %c0_i32_0 = arith.constant 0 : i32
    %c0_i32_1 = arith.constant 0 : i32
    return %c0_i32, %c0_i32_0 : i32, i32
  }
  func.func @transform_14(%arg0: i32, %arg1: i32) -> (i32, i32) {
    %c0_i32 = arith.constant 0 : i32
    %c0_i32_0 = arith.constant 0 : i32
    %c0_i32_1 = arith.constant 0 : i32
    return %c0_i32, %c0_i32_0 : i32, i32
  }
  func.func @transform_15(%arg0: i32, %arg1: i32) -> (i32, i32) {
    %c0_i32 = arith.constant 0 : i32
    %c0_i32_0 = arith.constant 0 : i32
    %c0_i32_1 = arith.constant 0 : i32
    return %c0_i32, %c0_i32_0 : i32, i32
  }
  func.func @transform_16(%arg0: i32, %arg1: i32) -> (i32, i32) {
    %c0_i32 = arith.constant 0 : i32
    %c0_i32_0 = arith.constant 0 : i32
    %c0_i32_1 = arith.constant 0 : i32
    return %c0_i32, %c0_i32_0 : i32, i32
  }
  func.func @transform_17(%arg0: i32, %arg1: i32) -> (i32, i32) {
    %c0_i32 = arith.constant 0 : i32
    %c0_i32_0 = arith.constant 0 : i32
    %c0_i32_1 = arith.constant 0 : i32
    return %c0_i32, %c0_i32_0 : i32, i32
  }
  func.func @transform_18(%arg0: i32, %arg1: i32) -> (i32, i32) {
    %c0_i32 = arith.constant 0 : i32
    %c0_i32_0 = arith.constant 0 : i32
    %c0_i32_1 = arith.constant 0 : i32
    return %c0_i32, %c0_i32_0 : i32, i32
  }
  func.func @transform_19(%arg0: i32, %arg1: i32) -> (i32, i32) {
    %c0_i32 = arith.constant 0 : i32
    %c0_i32_0 = arith.constant 0 : i32
    %c0_i32_1 = arith.constant 0 : i32
    return %c0_i32, %c0_i32_0 : i32, i32
  }
  func.func @transform_20(%arg0: i32, %arg1: i32) -> (i32, i32, i32) {
    %c0_i32 = arith.constant 0 : i32
    %c0_i32_0 = arith.constant 0 : i32
    return %arg0, %arg1, %c0_i32 : i32, i32, i32
  }
}

module attributes {stable_mosaic.version = 11 : i64} {
  func.func @_rope_encoder_layer_kernel(%arg0: i32, %arg1: i32, %arg2: memref<1x16x32xf32, #tpu.memory_space<vmem>>, %arg3: memref<1x1x16xf32, #tpu.memory_space<vmem>>, %arg4: memref<32x32xbf16, #tpu.memory_space<vmem>>, %arg5: memref<1x32xf32, #tpu.memory_space<vmem>>, %arg6: memref<32x32xbf16, #tpu.memory_space<vmem>>, %arg7: memref<1x32xf32, #tpu.memory_space<vmem>>, %arg8: memref<32x32xbf16, #tpu.memory_space<vmem>>, %arg9: memref<1x32xf32, #tpu.memory_space<vmem>>, %arg10: memref<32x32xbf16, #tpu.memory_space<vmem>>, %arg11: memref<1x32xf32, #tpu.memory_space<vmem>>, %arg12: memref<1x32xf32, #tpu.memory_space<vmem>>, %arg13: memref<1x32xf32, #tpu.memory_space<vmem>>, %arg14: memref<1x32xf32, #tpu.memory_space<vmem>>, %arg15: memref<1x32xf32, #tpu.memory_space<vmem>>, %arg16: memref<32x64xbf16, #tpu.memory_space<vmem>>, %arg17: memref<1x64xf32, #tpu.memory_space<vmem>>, %arg18: memref<64x32xbf16, #tpu.memory_space<vmem>>, %arg19: memref<1x32xf32, #tpu.memory_space<vmem>>, %arg20: memref<16x8xf32, #tpu.memory_space<vmem>>, %arg21: memref<16x8xf32, #tpu.memory_space<vmem>>, %arg22: memref<1x8x32xf32, #tpu.memory_space<vmem>>, %arg23: memref<16x32xbf16, #tpu.memory_space<vmem>>, %arg24: memref<16x32xbf16, #tpu.memory_space<vmem>>, %arg25: memref<8x32xf32, #tpu.memory_space<vmem>>) attributes {dimension_semantics = [#tpu.dimension_semantics<parallel>, #tpu.dimension_semantics<arbitrary>], iteration_bounds = array<i64: 2, 2>, scalar_prefetch = 0 : i64, scratch_operands = 3 : i64, tpu.core_type = #tpu.core_type<tc>, window_params = [{transform_indices = @transform_0, window_bounds = array<i64: 1, 16, 32>}, {transform_indices = @transform_1, window_bounds = array<i64: 1, 1, 16>}, {pipeline_mode = #tpu.pipeline_mode<synchronous>, transform_indices = @transform_2, window_bounds = array<i64: 32, 32>}, {pipeline_mode = #tpu.pipeline_mode<synchronous>, transform_indices = @transform_3, window_bounds = array<i64: 1, 32>}, {pipeline_mode = #tpu.pipeline_mode<synchronous>, transform_indices = @transform_4, window_bounds = array<i64: 32, 32>}, {pipeline_mode = #tpu.pipeline_mode<synchronous>, transform_indices = @transform_5, window_bounds = array<i64: 1, 32>}, {pipeline_mode = #tpu.pipeline_mode<synchronous>, transform_indices = @transform_6, window_bounds = array<i64: 32, 32>}, {pipeline_mode = #tpu.pipeline_mode<synchronous>, transform_indices = @transform_7, window_bounds = array<i64: 1, 32>}, {pipeline_mode = #tpu.pipeline_mode<synchronous>, transform_indices = @transform_8, window_bounds = array<i64: 32, 32>}, {pipeline_mode = #tpu.pipeline_mode<synchronous>, transform_indices = @transform_9, window_bounds = array<i64: 1, 32>}, {pipeline_mode = #tpu.pipeline_mode<synchronous>, transform_indices = @transform_10, window_bounds = array<i64: 1, 32>}, {pipeline_mode = #tpu.pipeline_mode<synchronous>, transform_indices = @transform_11, window_bounds = array<i64: 1, 32>}, {pipeline_mode = #tpu.pipeline_mode<synchronous>, transform_indices = @transform_12, window_bounds = array<i64: 1, 32>}, {pipeline_mode = #tpu.pipeline_mode<synchronous>, transform_indices = @transform_13, window_bounds = array<i64: 1, 32>}, {pipeline_mode = #tpu.pipeline_mode<synchronous>, transform_indices = @transform_14, window_bounds = array<i64: 32, 64>}, {pipeline_mode = #tpu.pipeline_mode<synchronous>, transform_indices = @transform_15, window_bounds = array<i64: 1, 64>}, {pipeline_mode = #tpu.pipeline_mode<synchronous>, transform_indices = @transform_16, window_bounds = array<i64: 64, 32>}, {pipeline_mode = #tpu.pipeline_mode<synchronous>, transform_indices = @transform_17, window_bounds = array<i64: 1, 32>}, {pipeline_mode = #tpu.pipeline_mode<synchronous>, transform_indices = @transform_18, window_bounds = array<i64: 16, 8>}, {pipeline_mode = #tpu.pipeline_mode<synchronous>, transform_indices = @transform_19, window_bounds = array<i64: 16, 8>}, {transform_indices = @transform_20, window_bounds = array<i64: 1, 8, 32>}]} {
    %c0_i32 = arith.constant 0 : i32
    %0 = arith.cmpi eq, %arg1, %c0_i32 : i32
    %1 = arith.extui %0 : i1 to i32
    %c0_i32_0 = arith.constant 0 : i32
    %2 = arith.cmpi ne, %1, %c0_i32_0 : i32
    scf.if %2 {
      %c0_91 = arith.constant 0 : index
      %c0_92 = arith.constant 0 : index
      %c0_93 = arith.constant 0 : index
      %202 = vector.load %arg2[%c0_91, %c0_92, %c0_93] : memref<1x16x32xf32, #tpu.memory_space<vmem>>, vector<1x16x32xf32>
      %203 = vector.shape_cast %202 : vector<1x16x32xf32> to vector<16x32xf32>
      %c0_94 = arith.constant 0 : index
      %c0_95 = arith.constant 0 : index
      %204 = vector.load %arg12[%c0_94, %c0_95] : memref<1x32xf32, #tpu.memory_space<vmem>>, vector<1x32xf32>
      %c0_96 = arith.constant 0 : index
      %c0_97 = arith.constant 0 : index
      %205 = vector.load %arg13[%c0_96, %c0_97] : memref<1x32xf32, #tpu.memory_space<vmem>>, vector<1x32xf32>
      %cst_98 = arith.constant dense<0.000000e+00> : vector<16xf32>
      %206 = vector.multi_reduction <add>, %203, %cst_98 [1] : vector<16x32xf32> to vector<16xf32>
      %207 = vector.shape_cast %206 : vector<16xf32> to vector<16x1xf32>
      %cst_99 = arith.constant 3.200000e+01 : f32
      %208 = vector.broadcast %cst_99 : f32 to vector<16x1xf32>
      %209 = arith.divf %207, %208 : vector<16x1xf32>
      %210 = vector.broadcast %209 : vector<16x1xf32> to vector<16x32xf32>
      %211 = arith.subf %203, %210 : vector<16x32xf32>
      %212 = arith.mulf %211, %211 : vector<16x32xf32>
      %cst_100 = arith.constant dense<0.000000e+00> : vector<16xf32>
      %213 = vector.multi_reduction <add>, %212, %cst_100 [1] : vector<16x32xf32> to vector<16xf32>
      %214 = vector.shape_cast %213 : vector<16xf32> to vector<16x1xf32>
      %cst_101 = arith.constant 3.200000e+01 : f32
      %215 = vector.broadcast %cst_101 : f32 to vector<16x1xf32>
      %216 = arith.divf %214, %215 : vector<16x1xf32>
      %cst_102 = arith.constant 9.99999974E-6 : f32
      %217 = vector.broadcast %cst_102 : f32 to vector<16x1xf32>
      %218 = arith.addf %216, %217 : vector<16x1xf32>
      %219 = math.rsqrt %218 : vector<16x1xf32>
      %220 = vector.broadcast %219 : vector<16x1xf32> to vector<16x32xf32>
      %221 = arith.mulf %211, %220 : vector<16x32xf32>
      %222 = vector.broadcast %204 : vector<1x32xf32> to vector<16x32xf32>
      %223 = arith.mulf %221, %222 : vector<16x32xf32>
      %224 = vector.broadcast %205 : vector<1x32xf32> to vector<16x32xf32>
      %225 = arith.addf %223, %224 : vector<16x32xf32>
      %226 = arith.truncf %225 : vector<16x32xf32> to vector<16x32xbf16>
      %c0_103 = arith.constant 0 : index
      %c0_104 = arith.constant 0 : index
      %227 = vector.load %arg6[%c0_103, %c0_104] : memref<32x32xbf16, #tpu.memory_space<vmem>>, vector<32x32xbf16>
      %cst_105 = arith.constant dense<0.000000e+00> : vector<16x32xf32>
      %228 = tpu.matmul %226, %227, %cst_105 {dimension_numbers = #tpu.dot_dimension_numbers<[1], [0], [0], [1], [0, 0, 1, 1], [], []>} : vector<16x32xbf16>, vector<32x32xbf16>, vector<16x32xf32> -> vector<16x32xf32>
      %c0_106 = arith.constant 0 : index
      %c0_107 = arith.constant 0 : index
      %229 = vector.load %arg7[%c0_106, %c0_107] : memref<1x32xf32, #tpu.memory_space<vmem>>, vector<1x32xf32>
      %230 = vector.broadcast %229 : vector<1x32xf32> to vector<16x32xf32>
      %231 = arith.addf %228, %230 : vector<16x32xf32>
      %c0_108 = arith.constant 0 : index
      %c0_109 = arith.constant 0 : index
      %232 = vector.load %arg8[%c0_108, %c0_109] : memref<32x32xbf16, #tpu.memory_space<vmem>>, vector<32x32xbf16>
      %cst_110 = arith.constant dense<0.000000e+00> : vector<16x32xf32>
      %233 = tpu.matmul %226, %232, %cst_110 {dimension_numbers = #tpu.dot_dimension_numbers<[1], [0], [0], [1], [0, 0, 1, 1], [], []>} : vector<16x32xbf16>, vector<32x32xbf16>, vector<16x32xf32> -> vector<16x32xf32>
      %c0_111 = arith.constant 0 : index
      %c0_112 = arith.constant 0 : index
      %234 = vector.load %arg9[%c0_111, %c0_112] : memref<1x32xf32, #tpu.memory_space<vmem>>, vector<1x32xf32>
      %235 = vector.broadcast %234 : vector<1x32xf32> to vector<16x32xf32>
      %236 = arith.addf %233, %235 : vector<16x32xf32>
      %237 = arith.truncf %236 : vector<16x32xf32> to vector<16x32xbf16>
      %c0_113 = arith.constant 0 : index
      %c0_114 = arith.constant 0 : index
      %238 = vector.load %arg24[%c0_113, %c0_114] : memref<16x32xbf16, #tpu.memory_space<vmem>>, vector<16x32xbf16>
      tpu.vector_store %arg24[%c0_113, %c0_114], %237 {strides = array<i32>} : memref<16x32xbf16, #tpu.memory_space<vmem>>, vector<16x32xbf16>,
      %c0_115 = arith.constant 0 : index
      %c0_116 = arith.constant 0 : index
      %239 = vector.load %arg20[%c0_115, %c0_116] : memref<16x8xf32, #tpu.memory_space<vmem>>, vector<16x8xf32>
      %c0_117 = arith.constant 0 : index
      %c0_118 = arith.constant 0 : index
      %240 = vector.load %arg21[%c0_117, %c0_118] : memref<16x8xf32, #tpu.memory_space<vmem>>, vector<16x8xf32>
      %241 = vector.extract_strided_slice %231 {offsets = [0, 0], sizes = [16, 8], strides = [1, 1]} : vector<16x32xf32> to vector<16x8xf32>
      %242 = vector.extract_strided_slice %241 {offsets = [0, 4], sizes = [16, 4], strides = [1, 1]} : vector<16x8xf32> to vector<16x4xf32>
      %243 = vector.extract_strided_slice %241 {offsets = [0, 0], sizes = [16, 4], strides = [1, 1]} : vector<16x8xf32> to vector<16x4xf32>
      %244 = tpu.concatenate %242, %243 in 1 : vector<16x4xf32>, vector<16x4xf32> -> vector<16x8xf32>
      %245 = arith.mulf %241, %239 : vector<16x8xf32>
      %246 = arith.mulf %244, %240 : vector<16x8xf32>
      %247 = arith.addf %245, %246 : vector<16x8xf32>
      %248 = arith.truncf %247 : vector<16x8xf32> to vector<16x8xbf16>
      %c0_119 = arith.constant 0 : index
      %c0_120 = arith.constant 0 : index
      %249 = vector.load %arg23[%c0_119, %c0_120] : memref<16x32xbf16, #tpu.memory_space<vmem>>, vector<16x8xbf16>
      tpu.vector_store %arg23[%c0_119, %c0_120], %248 {strides = array<i32>} : memref<16x32xbf16, #tpu.memory_space<vmem>>, vector<16x8xbf16>,
      %250 = vector.extract_strided_slice %231 {offsets = [0, 8], sizes = [16, 8], strides = [1, 1]} : vector<16x32xf32> to vector<16x8xf32>
      %251 = vector.extract_strided_slice %250 {offsets = [0, 4], sizes = [16, 4], strides = [1, 1]} : vector<16x8xf32> to vector<16x4xf32>
      %252 = vector.extract_strided_slice %250 {offsets = [0, 0], sizes = [16, 4], strides = [1, 1]} : vector<16x8xf32> to vector<16x4xf32>
      %253 = tpu.concatenate %251, %252 in 1 : vector<16x4xf32>, vector<16x4xf32> -> vector<16x8xf32>
      %254 = arith.mulf %250, %239 : vector<16x8xf32>
      %255 = arith.mulf %253, %240 : vector<16x8xf32>
      %256 = arith.addf %254, %255 : vector<16x8xf32>
      %257 = arith.truncf %256 : vector<16x8xf32> to vector<16x8xbf16>
      %c0_121 = arith.constant 0 : index
      %c8_122 = arith.constant 8 : index
      %258 = vector.load %arg23[%c0_121, %c8_122] : memref<16x32xbf16, #tpu.memory_space<vmem>>, vector<16x8xbf16>
      tpu.vector_store %arg23[%c0_121, %c8_122], %257 {strides = array<i32>} : memref<16x32xbf16, #tpu.memory_space<vmem>>, vector<16x8xbf16>,
      %259 = vector.extract_strided_slice %231 {offsets = [0, 16], sizes = [16, 8], strides = [1, 1]} : vector<16x32xf32> to vector<16x8xf32>
      %260 = vector.extract_strided_slice %259 {offsets = [0, 4], sizes = [16, 4], strides = [1, 1]} : vector<16x8xf32> to vector<16x4xf32>
      %261 = vector.extract_strided_slice %259 {offsets = [0, 0], sizes = [16, 4], strides = [1, 1]} : vector<16x8xf32> to vector<16x4xf32>
      %262 = tpu.concatenate %260, %261 in 1 : vector<16x4xf32>, vector<16x4xf32> -> vector<16x8xf32>
      %263 = arith.mulf %259, %239 : vector<16x8xf32>
      %264 = arith.mulf %262, %240 : vector<16x8xf32>
      %265 = arith.addf %263, %264 : vector<16x8xf32>
      %266 = arith.truncf %265 : vector<16x8xf32> to vector<16x8xbf16>
      %c0_123 = arith.constant 0 : index
      %c16_124 = arith.constant 16 : index
      %267 = vector.load %arg23[%c0_123, %c16_124] : memref<16x32xbf16, #tpu.memory_space<vmem>>, vector<16x8xbf16>
      tpu.vector_store %arg23[%c0_123, %c16_124], %266 {strides = array<i32>} : memref<16x32xbf16, #tpu.memory_space<vmem>>, vector<16x8xbf16>,
      %268 = vector.extract_strided_slice %231 {offsets = [0, 24], sizes = [16, 8], strides = [1, 1]} : vector<16x32xf32> to vector<16x8xf32>
      %269 = vector.extract_strided_slice %268 {offsets = [0, 4], sizes = [16, 4], strides = [1, 1]} : vector<16x8xf32> to vector<16x4xf32>
      %270 = vector.extract_strided_slice %268 {offsets = [0, 0], sizes = [16, 4], strides = [1, 1]} : vector<16x8xf32> to vector<16x4xf32>
      %271 = tpu.concatenate %269, %270 in 1 : vector<16x4xf32>, vector<16x4xf32> -> vector<16x8xf32>
      %272 = arith.mulf %268, %239 : vector<16x8xf32>
      %273 = arith.mulf %271, %240 : vector<16x8xf32>
      %274 = arith.addf %272, %273 : vector<16x8xf32>
      %275 = arith.truncf %274 : vector<16x8xf32> to vector<16x8xbf16>
      %c0_125 = arith.constant 0 : index
      %c24_126 = arith.constant 24 : index
      %276 = vector.load %arg23[%c0_125, %c24_126] : memref<16x32xbf16, #tpu.memory_space<vmem>>, vector<16x8xbf16>
      tpu.vector_store %arg23[%c0_125, %c24_126], %275 {strides = array<i32>} : memref<16x32xbf16, #tpu.memory_space<vmem>>, vector<16x8xbf16>,
    } else {
    }
    %c8_i32 = arith.constant 8 : i32
    %3 = arith.muli %arg1, %c8_i32 : i32
    %4 = tpu.assume_multiple %3, 8 : i32
    %c0 = arith.constant 0 : index
    %5 = arith.index_cast %4 : i32 to index
    %c0_1 = arith.constant 0 : index
    %6 = vector.load %arg2[%c0, %5, %c0_1] : memref<1x16x32xf32, #tpu.memory_space<vmem>>, vector<1x8x32xf32>
    %7 = vector.shape_cast %6 : vector<1x8x32xf32> to vector<8x32xf32>
    %c0_2 = arith.constant 0 : index
    %c0_3 = arith.constant 0 : index
    %8 = vector.load %arg12[%c0_2, %c0_3] : memref<1x32xf32, #tpu.memory_space<vmem>>, vector<1x32xf32>
    %c0_4 = arith.constant 0 : index
    %c0_5 = arith.constant 0 : index
    %9 = vector.load %arg13[%c0_4, %c0_5] : memref<1x32xf32, #tpu.memory_space<vmem>>, vector<1x32xf32>
    %cst = arith.constant dense<0.000000e+00> : vector<8xf32>
    %10 = vector.multi_reduction <add>, %7, %cst [1] : vector<8x32xf32> to vector<8xf32>
    %11 = vector.shape_cast %10 : vector<8xf32> to vector<8x1xf32>
    %cst_6 = arith.constant 3.200000e+01 : f32
    %12 = vector.broadcast %cst_6 : f32 to vector<8x1xf32>
    %13 = arith.divf %11, %12 : vector<8x1xf32>
    %14 = vector.broadcast %13 : vector<8x1xf32> to vector<8x32xf32>
    %15 = arith.subf %7, %14 : vector<8x32xf32>
    %16 = arith.mulf %15, %15 : vector<8x32xf32>
    %cst_7 = arith.constant dense<0.000000e+00> : vector<8xf32>
    %17 = vector.multi_reduction <add>, %16, %cst_7 [1] : vector<8x32xf32> to vector<8xf32>
    %18 = vector.shape_cast %17 : vector<8xf32> to vector<8x1xf32>
    %cst_8 = arith.constant 3.200000e+01 : f32
    %19 = vector.broadcast %cst_8 : f32 to vector<8x1xf32>
    %20 = arith.divf %18, %19 : vector<8x1xf32>
    %cst_9 = arith.constant 9.99999974E-6 : f32
    %21 = vector.broadcast %cst_9 : f32 to vector<8x1xf32>
    %22 = arith.addf %20, %21 : vector<8x1xf32>
    %23 = math.rsqrt %22 : vector<8x1xf32>
    %24 = vector.broadcast %23 : vector<8x1xf32> to vector<8x32xf32>
    %25 = arith.mulf %15, %24 : vector<8x32xf32>
    %26 = vector.broadcast %8 : vector<1x32xf32> to vector<8x32xf32>
    %27 = arith.mulf %25, %26 : vector<8x32xf32>
    %28 = vector.broadcast %9 : vector<1x32xf32> to vector<8x32xf32>
    %29 = arith.addf %27, %28 : vector<8x32xf32>
    %30 = arith.truncf %29 : vector<8x32xf32> to vector<8x32xbf16>
    %c0_10 = arith.constant 0 : index
    %c0_11 = arith.constant 0 : index
    %31 = vector.load %arg4[%c0_10, %c0_11] : memref<32x32xbf16, #tpu.memory_space<vmem>>, vector<32x32xbf16>
    %cst_12 = arith.constant dense<0.000000e+00> : vector<8x32xf32>
    %32 = tpu.matmul %30, %31, %cst_12 {dimension_numbers = #tpu.dot_dimension_numbers<[1], [0], [0], [1], [0, 0, 1, 1], [], []>} : vector<8x32xbf16>, vector<32x32xbf16>, vector<8x32xf32> -> vector<8x32xf32>
    %c0_13 = arith.constant 0 : index
    %c0_14 = arith.constant 0 : index
    %33 = vector.load %arg5[%c0_13, %c0_14] : memref<1x32xf32, #tpu.memory_space<vmem>>, vector<1x32xf32>
    %34 = vector.broadcast %33 : vector<1x32xf32> to vector<8x32xf32>
    %35 = arith.addf %32, %34 : vector<8x32xf32>
    %36 = arith.index_cast %4 : i32 to index
    %c0_15 = arith.constant 0 : index
    %37 = vector.load %arg20[%36, %c0_15] : memref<16x8xf32, #tpu.memory_space<vmem>>, vector<8x8xf32>
    %38 = arith.index_cast %4 : i32 to index
    %c0_16 = arith.constant 0 : index
    %39 = vector.load %arg21[%38, %c0_16] : memref<16x8xf32, #tpu.memory_space<vmem>>, vector<8x8xf32>
    %c0_17 = arith.constant 0 : index
    %c0_18 = arith.constant 0 : index
    %c0_19 = arith.constant 0 : index
    %40 = vector.load %arg3[%c0_17, %c0_18, %c0_19] : memref<1x1x16xf32, #tpu.memory_space<vmem>>, vector<1x1x16xf32>
    %41 = vector.shape_cast %40 : vector<1x1x16xf32> to vector<1x16xf32>
    %42 = vector.extract_strided_slice %35 {offsets = [0, 0], sizes = [8, 8], strides = [1, 1]} : vector<8x32xf32> to vector<8x8xf32>
    %43 = vector.extract_strided_slice %42 {offsets = [0, 4], sizes = [8, 4], strides = [1, 1]} : vector<8x8xf32> to vector<8x4xf32>
    %44 = vector.extract_strided_slice %42 {offsets = [0, 0], sizes = [8, 4], strides = [1, 1]} : vector<8x8xf32> to vector<8x4xf32>
    %45 = tpu.concatenate %43, %44 in 1 : vector<8x4xf32>, vector<8x4xf32> -> vector<8x8xf32>
    %46 = arith.mulf %42, %37 : vector<8x8xf32>
    %47 = arith.mulf %45, %39 : vector<8x8xf32>
    %48 = arith.addf %46, %47 : vector<8x8xf32>
    %cst_20 = arith.constant 0.353553385 : f32
    %49 = vector.broadcast %cst_20 : f32 to vector<8x8xf32>
    %50 = arith.mulf %48, %49 : vector<8x8xf32>
    %51 = arith.truncf %50 : vector<8x8xf32> to vector<8x8xbf16>
    %c0_21 = arith.constant 0 : index
    %c0_22 = arith.constant 0 : index
    %52 = vector.load %arg23[%c0_21, %c0_22] : memref<16x32xbf16, #tpu.memory_space<vmem>>, vector<16x8xbf16>
    %c0_23 = arith.constant 0 : index
    %c0_24 = arith.constant 0 : index
    %53 = vector.load %arg24[%c0_23, %c0_24] : memref<16x32xbf16, #tpu.memory_space<vmem>>, vector<16x8xbf16>
    %cst_25 = arith.constant dense<0.000000e+00> : vector<8x16xf32>
    %54 = tpu.matmul %51, %52, %cst_25 {dimension_numbers = #tpu.dot_dimension_numbers<[1], [1], [0], [0], [0, 0, 1, 0], [], []>} : vector<8x8xbf16>, vector<16x8xbf16>, vector<8x16xf32> -> vector<8x16xf32>
    %55 = vector.broadcast %41 : vector<1x16xf32> to vector<8x16xf32>
    %56 = arith.addf %54, %55 : vector<8x16xf32>
    %cst_26 = arith.constant dense<0xFF800000> : vector<8xf32>
    %57 = vector.multi_reduction <maximumf>, %56, %cst_26 [1] : vector<8x16xf32> to vector<8xf32>
    %58 = vector.shape_cast %57 : vector<8xf32> to vector<8x1xf32>
    %59 = vector.broadcast %58 : vector<8x1xf32> to vector<8x16xf32>
    %60 = arith.subf %56, %59 : vector<8x16xf32>
    %61 = math.exp %60 : vector<8x16xf32>
    %cst_27 = arith.constant dense<0.000000e+00> : vector<8xf32>
    %62 = vector.multi_reduction <add>, %61, %cst_27 [1] : vector<8x16xf32> to vector<8xf32>
    %63 = vector.shape_cast %62 : vector<8xf32> to vector<8x1xf32>
    %64 = arith.truncf %61 : vector<8x16xf32> to vector<8x16xbf16>
    %cst_28 = arith.constant dense<0.000000e+00> : vector<8x8xf32>
    %65 = tpu.matmul %64, %53, %cst_28 {dimension_numbers = #tpu.dot_dimension_numbers<[1], [0], [0], [1], [0, 0, 1, 1], [], []>} : vector<8x16xbf16>, vector<16x8xbf16>, vector<8x8xf32> -> vector<8x8xf32>
    %66 = tpu.reciprocal %63 {approx = true} : vector<8x1xf32> -> vector<8x1xf32>
    %67 = vector.broadcast %66 : vector<8x1xf32> to vector<8x8xf32>
    %68 = arith.mulf %65, %67 : vector<8x8xf32>
    %c0_29 = arith.constant 0 : index
    %c0_30 = arith.constant 0 : index
    %69 = vector.load %arg25[%c0_29, %c0_30] : memref<8x32xf32, #tpu.memory_space<vmem>>, vector<8x8xf32>
    tpu.vector_store %arg25[%c0_29, %c0_30], %68 {strides = array<i32>} : memref<8x32xf32, #tpu.memory_space<vmem>>, vector<8x8xf32>,
    %70 = vector.extract_strided_slice %35 {offsets = [0, 8], sizes = [8, 8], strides = [1, 1]} : vector<8x32xf32> to vector<8x8xf32>
    %71 = vector.extract_strided_slice %70 {offsets = [0, 4], sizes = [8, 4], strides = [1, 1]} : vector<8x8xf32> to vector<8x4xf32>
    %72 = vector.extract_strided_slice %70 {offsets = [0, 0], sizes = [8, 4], strides = [1, 1]} : vector<8x8xf32> to vector<8x4xf32>
    %73 = tpu.concatenate %71, %72 in 1 : vector<8x4xf32>, vector<8x4xf32> -> vector<8x8xf32>
    %74 = arith.mulf %70, %37 : vector<8x8xf32>
    %75 = arith.mulf %73, %39 : vector<8x8xf32>
    %76 = arith.addf %74, %75 : vector<8x8xf32>
    %cst_31 = arith.constant 0.353553385 : f32
    %77 = vector.broadcast %cst_31 : f32 to vector<8x8xf32>
    %78 = arith.mulf %76, %77 : vector<8x8xf32>
    %79 = arith.truncf %78 : vector<8x8xf32> to vector<8x8xbf16>
    %c0_32 = arith.constant 0 : index
    %c8 = arith.constant 8 : index
    %80 = vector.load %arg23[%c0_32, %c8] : memref<16x32xbf16, #tpu.memory_space<vmem>>, vector<16x8xbf16>
    %c0_33 = arith.constant 0 : index
    %c8_34 = arith.constant 8 : index
    %81 = vector.load %arg24[%c0_33, %c8_34] : memref<16x32xbf16, #tpu.memory_space<vmem>>, vector<16x8xbf16>
    %cst_35 = arith.constant dense<0.000000e+00> : vector<8x16xf32>
    %82 = tpu.matmul %79, %80, %cst_35 {dimension_numbers = #tpu.dot_dimension_numbers<[1], [1], [0], [0], [0, 0, 1, 0], [], []>} : vector<8x8xbf16>, vector<16x8xbf16>, vector<8x16xf32> -> vector<8x16xf32>
    %83 = vector.broadcast %41 : vector<1x16xf32> to vector<8x16xf32>
    %84 = arith.addf %82, %83 : vector<8x16xf32>
    %cst_36 = arith.constant dense<0xFF800000> : vector<8xf32>
    %85 = vector.multi_reduction <maximumf>, %84, %cst_36 [1] : vector<8x16xf32> to vector<8xf32>
    %86 = vector.shape_cast %85 : vector<8xf32> to vector<8x1xf32>
    %87 = vector.broadcast %86 : vector<8x1xf32> to vector<8x16xf32>
    %88 = arith.subf %84, %87 : vector<8x16xf32>
    %89 = math.exp %88 : vector<8x16xf32>
    %cst_37 = arith.constant dense<0.000000e+00> : vector<8xf32>
    %90 = vector.multi_reduction <add>, %89, %cst_37 [1] : vector<8x16xf32> to vector<8xf32>
    %91 = vector.shape_cast %90 : vector<8xf32> to vector<8x1xf32>
    %92 = arith.truncf %89 : vector<8x16xf32> to vector<8x16xbf16>
    %cst_38 = arith.constant dense<0.000000e+00> : vector<8x8xf32>
    %93 = tpu.matmul %92, %81, %cst_38 {dimension_numbers = #tpu.dot_dimension_numbers<[1], [0], [0], [1], [0, 0, 1, 1], [], []>} : vector<8x16xbf16>, vector<16x8xbf16>, vector<8x8xf32> -> vector<8x8xf32>
    %94 = tpu.reciprocal %91 {approx = true} : vector<8x1xf32> -> vector<8x1xf32>
    %95 = vector.broadcast %94 : vector<8x1xf32> to vector<8x8xf32>
    %96 = arith.mulf %93, %95 : vector<8x8xf32>
    %c0_39 = arith.constant 0 : index
    %c8_40 = arith.constant 8 : index
    %97 = vector.load %arg25[%c0_39, %c8_40] : memref<8x32xf32, #tpu.memory_space<vmem>>, vector<8x8xf32>
    tpu.vector_store %arg25[%c0_39, %c8_40], %96 {strides = array<i32>} : memref<8x32xf32, #tpu.memory_space<vmem>>, vector<8x8xf32>,
    %98 = vector.extract_strided_slice %35 {offsets = [0, 16], sizes = [8, 8], strides = [1, 1]} : vector<8x32xf32> to vector<8x8xf32>
    %99 = vector.extract_strided_slice %98 {offsets = [0, 4], sizes = [8, 4], strides = [1, 1]} : vector<8x8xf32> to vector<8x4xf32>
    %100 = vector.extract_strided_slice %98 {offsets = [0, 0], sizes = [8, 4], strides = [1, 1]} : vector<8x8xf32> to vector<8x4xf32>
    %101 = tpu.concatenate %99, %100 in 1 : vector<8x4xf32>, vector<8x4xf32> -> vector<8x8xf32>
    %102 = arith.mulf %98, %37 : vector<8x8xf32>
    %103 = arith.mulf %101, %39 : vector<8x8xf32>
    %104 = arith.addf %102, %103 : vector<8x8xf32>
    %cst_41 = arith.constant 0.353553385 : f32
    %105 = vector.broadcast %cst_41 : f32 to vector<8x8xf32>
    %106 = arith.mulf %104, %105 : vector<8x8xf32>
    %107 = arith.truncf %106 : vector<8x8xf32> to vector<8x8xbf16>
    %c0_42 = arith.constant 0 : index
    %c16 = arith.constant 16 : index
    %108 = vector.load %arg23[%c0_42, %c16] : memref<16x32xbf16, #tpu.memory_space<vmem>>, vector<16x8xbf16>
    %c0_43 = arith.constant 0 : index
    %c16_44 = arith.constant 16 : index
    %109 = vector.load %arg24[%c0_43, %c16_44] : memref<16x32xbf16, #tpu.memory_space<vmem>>, vector<16x8xbf16>
    %cst_45 = arith.constant dense<0.000000e+00> : vector<8x16xf32>
    %110 = tpu.matmul %107, %108, %cst_45 {dimension_numbers = #tpu.dot_dimension_numbers<[1], [1], [0], [0], [0, 0, 1, 0], [], []>} : vector<8x8xbf16>, vector<16x8xbf16>, vector<8x16xf32> -> vector<8x16xf32>
    %111 = vector.broadcast %41 : vector<1x16xf32> to vector<8x16xf32>
    %112 = arith.addf %110, %111 : vector<8x16xf32>
    %cst_46 = arith.constant dense<0xFF800000> : vector<8xf32>
    %113 = vector.multi_reduction <maximumf>, %112, %cst_46 [1] : vector<8x16xf32> to vector<8xf32>
    %114 = vector.shape_cast %113 : vector<8xf32> to vector<8x1xf32>
    %115 = vector.broadcast %114 : vector<8x1xf32> to vector<8x16xf32>
    %116 = arith.subf %112, %115 : vector<8x16xf32>
    %117 = math.exp %116 : vector<8x16xf32>
    %cst_47 = arith.constant dense<0.000000e+00> : vector<8xf32>
    %118 = vector.multi_reduction <add>, %117, %cst_47 [1] : vector<8x16xf32> to vector<8xf32>
    %119 = vector.shape_cast %118 : vector<8xf32> to vector<8x1xf32>
    %120 = arith.truncf %117 : vector<8x16xf32> to vector<8x16xbf16>
    %cst_48 = arith.constant dense<0.000000e+00> : vector<8x8xf32>
    %121 = tpu.matmul %120, %109, %cst_48 {dimension_numbers = #tpu.dot_dimension_numbers<[1], [0], [0], [1], [0, 0, 1, 1], [], []>} : vector<8x16xbf16>, vector<16x8xbf16>, vector<8x8xf32> -> vector<8x8xf32>
    %122 = tpu.reciprocal %119 {approx = true} : vector<8x1xf32> -> vector<8x1xf32>
    %123 = vector.broadcast %122 : vector<8x1xf32> to vector<8x8xf32>
    %124 = arith.mulf %121, %123 : vector<8x8xf32>
    %c0_49 = arith.constant 0 : index
    %c16_50 = arith.constant 16 : index
    %125 = vector.load %arg25[%c0_49, %c16_50] : memref<8x32xf32, #tpu.memory_space<vmem>>, vector<8x8xf32>
    tpu.vector_store %arg25[%c0_49, %c16_50], %124 {strides = array<i32>} : memref<8x32xf32, #tpu.memory_space<vmem>>, vector<8x8xf32>,
    %126 = vector.extract_strided_slice %35 {offsets = [0, 24], sizes = [8, 8], strides = [1, 1]} : vector<8x32xf32> to vector<8x8xf32>
    %127 = vector.extract_strided_slice %126 {offsets = [0, 4], sizes = [8, 4], strides = [1, 1]} : vector<8x8xf32> to vector<8x4xf32>
    %128 = vector.extract_strided_slice %126 {offsets = [0, 0], sizes = [8, 4], strides = [1, 1]} : vector<8x8xf32> to vector<8x4xf32>
    %129 = tpu.concatenate %127, %128 in 1 : vector<8x4xf32>, vector<8x4xf32> -> vector<8x8xf32>
    %130 = arith.mulf %126, %37 : vector<8x8xf32>
    %131 = arith.mulf %129, %39 : vector<8x8xf32>
    %132 = arith.addf %130, %131 : vector<8x8xf32>
    %cst_51 = arith.constant 0.353553385 : f32
    %133 = vector.broadcast %cst_51 : f32 to vector<8x8xf32>
    %134 = arith.mulf %132, %133 : vector<8x8xf32>
    %135 = arith.truncf %134 : vector<8x8xf32> to vector<8x8xbf16>
    %c0_52 = arith.constant 0 : index
    %c24 = arith.constant 24 : index
    %136 = vector.load %arg23[%c0_52, %c24] : memref<16x32xbf16, #tpu.memory_space<vmem>>, vector<16x8xbf16>
    %c0_53 = arith.constant 0 : index
    %c24_54 = arith.constant 24 : index
    %137 = vector.load %arg24[%c0_53, %c24_54] : memref<16x32xbf16, #tpu.memory_space<vmem>>, vector<16x8xbf16>
    %cst_55 = arith.constant dense<0.000000e+00> : vector<8x16xf32>
    %138 = tpu.matmul %135, %136, %cst_55 {dimension_numbers = #tpu.dot_dimension_numbers<[1], [1], [0], [0], [0, 0, 1, 0], [], []>} : vector<8x8xbf16>, vector<16x8xbf16>, vector<8x16xf32> -> vector<8x16xf32>
    %139 = vector.broadcast %41 : vector<1x16xf32> to vector<8x16xf32>
    %140 = arith.addf %138, %139 : vector<8x16xf32>
    %cst_56 = arith.constant dense<0xFF800000> : vector<8xf32>
    %141 = vector.multi_reduction <maximumf>, %140, %cst_56 [1] : vector<8x16xf32> to vector<8xf32>
    %142 = vector.shape_cast %141 : vector<8xf32> to vector<8x1xf32>
    %143 = vector.broadcast %142 : vector<8x1xf32> to vector<8x16xf32>
    %144 = arith.subf %140, %143 : vector<8x16xf32>
    %145 = math.exp %144 : vector<8x16xf32>
    %cst_57 = arith.constant dense<0.000000e+00> : vector<8xf32>
    %146 = vector.multi_reduction <add>, %145, %cst_57 [1] : vector<8x16xf32> to vector<8xf32>
    %147 = vector.shape_cast %146 : vector<8xf32> to vector<8x1xf32>
    %148 = arith.truncf %145 : vector<8x16xf32> to vector<8x16xbf16>
    %cst_58 = arith.constant dense<0.000000e+00> : vector<8x8xf32>
    %149 = tpu.matmul %148, %137, %cst_58 {dimension_numbers = #tpu.dot_dimension_numbers<[1], [0], [0], [1], [0, 0, 1, 1], [], []>} : vector<8x16xbf16>, vector<16x8xbf16>, vector<8x8xf32> -> vector<8x8xf32>
    %150 = tpu.reciprocal %147 {approx = true} : vector<8x1xf32> -> vector<8x1xf32>
    %151 = vector.broadcast %150 : vector<8x1xf32> to vector<8x8xf32>
    %152 = arith.mulf %149, %151 : vector<8x8xf32>
    %c0_59 = arith.constant 0 : index
    %c24_60 = arith.constant 24 : index
    %153 = vector.load %arg25[%c0_59, %c24_60] : memref<8x32xf32, #tpu.memory_space<vmem>>, vector<8x8xf32>
    tpu.vector_store %arg25[%c0_59, %c24_60], %152 {strides = array<i32>} : memref<8x32xf32, #tpu.memory_space<vmem>>, vector<8x8xf32>,
    %c0_61 = arith.constant 0 : index
    %c0_62 = arith.constant 0 : index
    %154 = vector.load %arg25[%c0_61, %c0_62] : memref<8x32xf32, #tpu.memory_space<vmem>>, vector<8x32xf32>
    %155 = arith.truncf %154 : vector<8x32xf32> to vector<8x32xbf16>
    %c0_63 = arith.constant 0 : index
    %c0_64 = arith.constant 0 : index
    %156 = vector.load %arg10[%c0_63, %c0_64] : memref<32x32xbf16, #tpu.memory_space<vmem>>, vector<32x32xbf16>
    %cst_65 = arith.constant dense<0.000000e+00> : vector<8x32xf32>
    %157 = tpu.matmul %155, %156, %cst_65 {dimension_numbers = #tpu.dot_dimension_numbers<[1], [0], [0], [1], [0, 0, 1, 1], [], []>} : vector<8x32xbf16>, vector<32x32xbf16>, vector<8x32xf32> -> vector<8x32xf32>
    %c0_66 = arith.constant 0 : index
    %c0_67 = arith.constant 0 : index
    %158 = vector.load %arg11[%c0_66, %c0_67] : memref<1x32xf32, #tpu.memory_space<vmem>>, vector<1x32xf32>
    %159 = vector.broadcast %158 : vector<1x32xf32> to vector<8x32xf32>
    %160 = arith.addf %157, %159 : vector<8x32xf32>
    %161 = arith.addf %7, %160 : vector<8x32xf32>
    %c0_68 = arith.constant 0 : index
    %c0_69 = arith.constant 0 : index
    %162 = vector.load %arg14[%c0_68, %c0_69] : memref<1x32xf32, #tpu.memory_space<vmem>>, vector<1x32xf32>
    %c0_70 = arith.constant 0 : index
    %c0_71 = arith.constant 0 : index
    %163 = vector.load %arg15[%c0_70, %c0_71] : memref<1x32xf32, #tpu.memory_space<vmem>>, vector<1x32xf32>
    %cst_72 = arith.constant dense<0.000000e+00> : vector<8xf32>
    %164 = vector.multi_reduction <add>, %161, %cst_72 [1] : vector<8x32xf32> to vector<8xf32>
    %165 = vector.shape_cast %164 : vector<8xf32> to vector<8x1xf32>
    %cst_73 = arith.constant 3.200000e+01 : f32
    %166 = vector.broadcast %cst_73 : f32 to vector<8x1xf32>
    %167 = arith.divf %165, %166 : vector<8x1xf32>
    %168 = vector.broadcast %167 : vector<8x1xf32> to vector<8x32xf32>
    %169 = arith.subf %161, %168 : vector<8x32xf32>
    %170 = arith.mulf %169, %169 : vector<8x32xf32>
    %cst_74 = arith.constant dense<0.000000e+00> : vector<8xf32>
    %171 = vector.multi_reduction <add>, %170, %cst_74 [1] : vector<8x32xf32> to vector<8xf32>
    %172 = vector.shape_cast %171 : vector<8xf32> to vector<8x1xf32>
    %cst_75 = arith.constant 3.200000e+01 : f32
    %173 = vector.broadcast %cst_75 : f32 to vector<8x1xf32>
    %174 = arith.divf %172, %173 : vector<8x1xf32>
    %cst_76 = arith.constant 9.99999974E-6 : f32
    %175 = vector.broadcast %cst_76 : f32 to vector<8x1xf32>
    %176 = arith.addf %174, %175 : vector<8x1xf32>
    %177 = math.rsqrt %176 : vector<8x1xf32>
    %178 = vector.broadcast %177 : vector<8x1xf32> to vector<8x32xf32>
    %179 = arith.mulf %169, %178 : vector<8x32xf32>
    %180 = vector.broadcast %162 : vector<1x32xf32> to vector<8x32xf32>
    %181 = arith.mulf %179, %180 : vector<8x32xf32>
    %182 = vector.broadcast %163 : vector<1x32xf32> to vector<8x32xf32>
    %183 = arith.addf %181, %182 : vector<8x32xf32>
    %184 = arith.truncf %183 : vector<8x32xf32> to vector<8x32xbf16>
    %c0_77 = arith.constant 0 : index
    %c0_78 = arith.constant 0 : index
    %185 = vector.load %arg16[%c0_77, %c0_78] : memref<32x64xbf16, #tpu.memory_space<vmem>>, vector<32x64xbf16>
    %cst_79 = arith.constant dense<0.000000e+00> : vector<8x64xf32>
    %186 = tpu.matmul %184, %185, %cst_79 {dimension_numbers = #tpu.dot_dimension_numbers<[1], [0], [0], [1], [0, 0, 1, 1], [], []>} : vector<8x32xbf16>, vector<32x64xbf16>, vector<8x64xf32> -> vector<8x64xf32>
    %c0_80 = arith.constant 0 : index
    %c0_81 = arith.constant 0 : index
    %187 = vector.load %arg17[%c0_80, %c0_81] : memref<1x64xf32, #tpu.memory_space<vmem>>, vector<1x64xf32>
    %188 = vector.broadcast %187 : vector<1x64xf32> to vector<8x64xf32>
    %189 = arith.addf %186, %188 : vector<8x64xf32>
    %cst_82 = arith.constant 0.000000e+00 : f32
    %190 = vector.broadcast %cst_82 : f32 to vector<8x64xf32>
    %191 = arith.maximumf %189, %190 : vector<8x64xf32>
    %192 = arith.truncf %191 : vector<8x64xf32> to vector<8x64xbf16>
    %c0_83 = arith.constant 0 : index
    %c0_84 = arith.constant 0 : index
    %193 = vector.load %arg18[%c0_83, %c0_84] : memref<64x32xbf16, #tpu.memory_space<vmem>>, vector<64x32xbf16>
    %cst_85 = arith.constant dense<0.000000e+00> : vector<8x32xf32>
    %194 = tpu.matmul %192, %193, %cst_85 {dimension_numbers = #tpu.dot_dimension_numbers<[1], [0], [0], [1], [0, 0, 1, 1], [], []>} : vector<8x64xbf16>, vector<64x32xbf16>, vector<8x32xf32> -> vector<8x32xf32>
    %c0_86 = arith.constant 0 : index
    %c0_87 = arith.constant 0 : index
    %195 = vector.load %arg19[%c0_86, %c0_87] : memref<1x32xf32, #tpu.memory_space<vmem>>, vector<1x32xf32>
    %196 = vector.broadcast %195 : vector<1x32xf32> to vector<8x32xf32>
    %197 = arith.addf %194, %196 : vector<8x32xf32>
    %198 = arith.addf %161, %197 : vector<8x32xf32>
    %c0_88 = arith.constant 0 : index
    %c0_89 = arith.constant 0 : index
    %c0_90 = arith.constant 0 : index
    %199 = vector.load %arg22[%c0_88, %c0_89, %c0_90] : memref<1x8x32xf32, #tpu.memory_space<vmem>>, vector<1x8x32xf32>
    %200 = vector.shape_cast %199 : vector<1x8x32xf32> to vector<8x32xf32>
    %201 = vector.shape_cast %198 : vector<8x32xf32> to vector<1x8x32xf32>
    tpu.vector_store %arg22[%c0_88, %c0_89, %c0_90], %201 {strides = array<i32>} : memref<1x8x32xf32, #tpu.memory_space<vmem>>, vector<1x8x32xf32>,
    return
  }
  func.func @transform_0(%arg0: i32, %arg1: i32) -> (i32, i32, i32) {
    %c0_i32 = arith.constant 0 : i32
    %c0_i32_0 = arith.constant 0 : i32
    %c0_i32_1 = arith.constant 0 : i32
    return %arg0, %c0_i32, %c0_i32_0 : i32, i32, i32
  }
  func.func @transform_1(%arg0: i32, %arg1: i32) -> (i32, i32, i32) {
    %c0_i32 = arith.constant 0 : i32
    %c0_i32_0 = arith.constant 0 : i32
    %c0_i32_1 = arith.constant 0 : i32
    return %arg0, %c0_i32, %c0_i32_0 : i32, i32, i32
  }
  func.func @transform_2(%arg0: i32, %arg1: i32) -> (i32, i32) {
    %c0_i32 = arith.constant 0 : i32
    %c0_i32_0 = arith.constant 0 : i32
    %c0_i32_1 = arith.constant 0 : i32
    return %c0_i32, %c0_i32_0 : i32, i32
  }
  func.func @transform_3(%arg0: i32, %arg1: i32) -> (i32, i32) {
    %c0_i32 = arith.constant 0 : i32
    %c0_i32_0 = arith.constant 0 : i32
    %c0_i32_1 = arith.constant 0 : i32
    return %c0_i32, %c0_i32_0 : i32, i32
  }
  func.func @transform_4(%arg0: i32, %arg1: i32) -> (i32, i32) {
    %c0_i32 = arith.constant 0 : i32
    %c0_i32_0 = arith.constant 0 : i32
    %c0_i32_1 = arith.constant 0 : i32
    return %c0_i32, %c0_i32_0 : i32, i32
  }
  func.func @transform_5(%arg0: i32, %arg1: i32) -> (i32, i32) {
    %c0_i32 = arith.constant 0 : i32
    %c0_i32_0 = arith.constant 0 : i32
    %c0_i32_1 = arith.constant 0 : i32
    return %c0_i32, %c0_i32_0 : i32, i32
  }
  func.func @transform_6(%arg0: i32, %arg1: i32) -> (i32, i32) {
    %c0_i32 = arith.constant 0 : i32
    %c0_i32_0 = arith.constant 0 : i32
    %c0_i32_1 = arith.constant 0 : i32
    return %c0_i32, %c0_i32_0 : i32, i32
  }
  func.func @transform_7(%arg0: i32, %arg1: i32) -> (i32, i32) {
    %c0_i32 = arith.constant 0 : i32
    %c0_i32_0 = arith.constant 0 : i32
    %c0_i32_1 = arith.constant 0 : i32
    return %c0_i32, %c0_i32_0 : i32, i32
  }
  func.func @transform_8(%arg0: i32, %arg1: i32) -> (i32, i32) {
    %c0_i32 = arith.constant 0 : i32
    %c0_i32_0 = arith.constant 0 : i32
    %c0_i32_1 = arith.constant 0 : i32
    return %c0_i32, %c0_i32_0 : i32, i32
  }
  func.func @transform_9(%arg0: i32, %arg1: i32) -> (i32, i32) {
    %c0_i32 = arith.constant 0 : i32
    %c0_i32_0 = arith.constant 0 : i32
    %c0_i32_1 = arith.constant 0 : i32
    return %c0_i32, %c0_i32_0 : i32, i32
  }
  func.func @transform_10(%arg0: i32, %arg1: i32) -> (i32, i32) {
    %c0_i32 = arith.constant 0 : i32
    %c0_i32_0 = arith.constant 0 : i32
    %c0_i32_1 = arith.constant 0 : i32
    return %c0_i32, %c0_i32_0 : i32, i32
  }
  func.func @transform_11(%arg0: i32, %arg1: i32) -> (i32, i32) {
    %c0_i32 = arith.constant 0 : i32
    %c0_i32_0 = arith.constant 0 : i32
    %c0_i32_1 = arith.constant 0 : i32
    return %c0_i32, %c0_i32_0 : i32, i32
  }
  func.func @transform_12(%arg0: i32, %arg1: i32) -> (i32, i32) {
    %c0_i32 = arith.constant 0 : i32
    %c0_i32_0 = arith.constant 0 : i32
    %c0_i32_1 = arith.constant 0 : i32
    return %c0_i32, %c0_i32_0 : i32, i32
  }
  func.func @transform_13(%arg0: i32, %arg1: i32) -> (i32, i32) {
    %c0_i32 = arith.constant 0 : i32
    %c0_i32_0 = arith.constant 0 : i32
    %c0_i32_1 = arith.constant 0 : i32
    return %c0_i32, %c0_i32_0 : i32, i32
  }
  func.func @transform_14(%arg0: i32, %arg1: i32) -> (i32, i32) {
    %c0_i32 = arith.constant 0 : i32
    %c0_i32_0 = arith.constant 0 : i32
    %c0_i32_1 = arith.constant 0 : i32
    return %c0_i32, %c0_i32_0 : i32, i32
  }
  func.func @transform_15(%arg0: i32, %arg1: i32) -> (i32, i32) {
    %c0_i32 = arith.constant 0 : i32
    %c0_i32_0 = arith.constant 0 : i32
    %c0_i32_1 = arith.constant 0 : i32
    return %c0_i32, %c0_i32_0 : i32, i32
  }
  func.func @transform_16(%arg0: i32, %arg1: i32) -> (i32, i32) {
    %c0_i32 = arith.constant 0 : i32
    %c0_i32_0 = arith.constant 0 : i32
    %c0_i32_1 = arith.constant 0 : i32
    return %c0_i32, %c0_i32_0 : i32, i32
  }
  func.func @transform_17(%arg0: i32, %arg1: i32) -> (i32, i32) {
    %c0_i32 = arith.constant 0 : i32
    %c0_i32_0 = arith.constant 0 : i32
    %c0_i32_1 = arith.constant 0 : i32
    return %c0_i32, %c0_i32_0 : i32, i32
  }
  func.func @transform_18(%arg0: i32, %arg1: i32) -> (i32, i32) {
    %c0_i32 = arith.constant 0 : i32
    %c0_i32_0 = arith.constant 0 : i32
    %c0_i32_1 = arith.constant 0 : i32
    return %c0_i32, %c0_i32_0 : i32, i32
  }
  func.func @transform_19(%arg0: i32, %arg1: i32) -> (i32, i32) {
    %c0_i32 = arith.constant 0 : i32
    %c0_i32_0 = arith.constant 0 : i32
    %c0_i32_1 = arith.constant 0 : i32
    return %c0_i32, %c0_i32_0 : i32, i32
  }
  func.func @transform_20(%arg0: i32, %arg1: i32) -> (i32, i32, i32) {
    %c0_i32 = arith.constant 0 : i32
    %c0_i32_0 = arith.constant 0 : i32
    return %arg0, %arg1, %c0_i32 : i32, i32, i32
  }
}

</mosaic_0001>

<bundles_post_ra>
// kernel: tpu_custom_call.1
= control target key start
LH: loop header
LB: loop body
LE: loop exit
PB: predicated region body
PF: predicated region fallthrough
CT: control target
= control target key end

     0   :  { %s3755_s0 = inlined_call_operand.vmem [shape: f32[2,16,32], index: 0, kind: input, shape index: {}]   ;;  %s3756_s1 = inlined_call_operand.hbm [shape: f32[2,1,16], index: 1, kind: input, shape index: {}]   ;;  %s3757_s2 = inlined_call_operand.vmem [shape: bf16[32,32], index: 2, kind: input, shape index: {}]   ;;  %s3758_s3 = inlined_call_operand.vmem [shape: f32[1,32], index: 3, kind: input, shape index: {}]   ;;  %s3759_s4 = inlined_call_operand.vmem [shape: bf16[32,32], index: 4, kind: input, shape index: {}]   ;;  %s3760_s5 = inlined_call_operand.hbm [shape: f32[1,32], index: 5, kind: input, shape index: {}]   ;;  %s3761_s6 = inlined_call_operand.vmem [shape: bf16[32,32], index: 6, kind: input, shape index: {}]   ;;  %s3762_s7 = inlined_call_operand.hbm [shape: f32[1,32], index: 7, kind: input, shape index: {}]   ;;  %s3763_s8 = inlined_call_operand.vmem [shape: bf16[32,32], index: 8, kind: input, shape index: {}]   ;;  %s3764_s9 = inlined_call_operand.hbm [shape: f32[1,32], index: 9, kind: input, shape index: {}]   ;;  %s3765_s10 = inlined_call_operand.hbm [shape: f32[1,32], index: 10, kind: input, shape index: {}]   ;;  %s3766_s11 = inlined_call_operand.hbm [shape: f32[1,32], index: 11, kind: input, shape index: {}]   ;;  %s3767_s12 = inlined_call_operand.hbm [shape: f32[1,32], index: 12, kind: input, shape index: {}]   ;;  %s3768_s13 = inlined_call_operand.hbm [shape: f32[1,32], index: 13, kind: input, shape index: {}]   ;;  %s3769_s14 = inlined_call_operand.vmem [shape: bf16[32,64], index: 14, kind: input, shape index: {}]   ;;  %s3770_s15 = inlined_call_operand.vmem [shape: f32[1,64], index: 15, kind: input, shape index: {}]   ;;  %s3771_s16 = inlined_call_operand.vmem [shape: bf16[64,32], index: 16, kind: input, shape index: {}]   ;;  %s3772_s17 = inlined_call_operand.vmem [shape: f32[1,32], index: 17, kind: input, shape index: {}]   ;;  %s3773_s18 = inlined_call_operand.vmem [shape: f32[16,8], index: 18, kind: input, shape index: {}]   ;;  %s3774_s19 = inlined_call_operand.vmem [shape: f32[16,8], index: 19, kind: input, shape index: {}]   ;;  %s3775_s20 = inlined_call_operand.hbm [shape: f32[2,16,32], index: 20, kind: output, shape index: {}]  }
   0x1   :  { %3800 = sst [smem:[#allocation29_spill]] %s3755_s0 }
   0x2   :  { %3801 = sst [smem:[#allocation30_spill]] %s3756_s1 }
   0x3   :  { %3802 = sst [smem:[#allocation31_spill]] %s3757_s2 }
   0x4   :  { %3803 = sst [smem:[#allocation32_spill]] %s3758_s3 }
   0x5   :  { %3804 = sst [smem:[#allocation33_spill]] %s3759_s4 }
   0x6   :  { %3805 = sst [smem:[#allocation34_spill]] %s3760_s5 }
   0x7   :  { %3806 = sst [smem:[#allocation35_spill]] %s3761_s6 }
   0x8   :  { %3807 = sst [smem:[#allocation36_spill]] %s3762_s7 }
   0x9   :  { %3808 = sst [smem:[#allocation37_spill]] %s3763_s8 }
   0xa   :  { %3809 = sst [smem:[#allocation38_spill]] %s3764_s9 }
   0xb   :  { %3810 = sst [smem:[#allocation39_spill]] %s3765_s10 }
   0xc   :  { %3811 = sst [smem:[#allocation40_spill]] %s3766_s11 }
   0xd   :  { %3812 = sst [smem:[#allocation41_spill]] %s3767_s12 }
   0xe   :  { %3813 = sst [smem:[#allocation42_spill]] %s3768_s13 }
   0xf   :  { %3814 = sst [smem:[#allocation43_spill]] %s3769_s14 }
  0x10   :  { %3815 = sst [smem:[#allocation44_spill]] %s3770_s15 }
  0x11   :  { %3816 = sst [smem:[#allocation45_spill]] %s3771_s16 }
  0x12   :  { %3817 = sst [smem:[#allocation46_spill]] %s3772_s17 }
  0x13   :  { %3818 = sst [smem:[#allocation47_spill]] %s3773_s18 }
  0x14   :  { %3819 = sst [smem:[#allocation48_spill]] %s3774_s19 }
  0x15   :  { %3820 = sst [smem:[#allocation49_spill]] %s3775_s20 }
  0x16   :  { %25 = vsyncpa [#allocation6], 0 }
  0x17   :  { %27 = vsyncpa [#allocation6 + $0x1], 0 }
  0x18   :  { %28 = vsyncpa [#allocation9], 0 }
  0x19   :  { %29 = vsyncpa [#allocation12], 0 }
  0x1a   :  { %30 = vsyncpa [#allocation15], 0 }
  0x1b   :  { %31 = vsyncpa [#allocation18], 0 }
  0x1c   :  { %32 = vsyncpa [#allocation7], 0 }
  0x1d   :  { %34 = vsyncpa [#allocation7 + $0x1], 0  ;;  %s3092_s1 = smov 0   ;;  %s3094_s22 = smov 0  }
  0x1e   :  { %s3096_s23 = smov 0   ;;  %s3098_s24 = smov 0  }
  0x1f   :  { %s3100_s2 = smov 0   ;;  %s3102_s25 = smov 0  }
  0x20   :  { %s3104_s3 = smov 0   ;;  %s3106_s26 = smov 0  }
  0x21   :  { %s3108_s27 = smov 0   ;;  %s3110_s28 = smov 0  }
  0x22   :  { %s3112_s4 = smov 0  }
  0x23 LB: > { %3821 = sst [smem:[#allocation26_spill]] %s2937_s3  ;;  %s3780_s29 = sadd.s32 4294967295, %s2953_s4   ;;  %s2953_s4 = sphi %s3112_s4, %s40_s4   ;;  %s2949_s28 = sphi %s3110_s28, %s3881_s28   ;;  %s2945_s27 = sphi %s3108_s27, %s3880_s27   ;;  %s2941_s26 = sphi %s3106_s26, %s3879_s26   ;;  %s2937_s3 = sphi %s3104_s3, %s3878_s3   ;;  %s2933_s25 = sphi %s3102_s25, %s3877_s25   ;;  %s2929_s2 = sphi %s3100_s2, %s3876_s2   ;;  %s2925_s24 = sphi %s3098_s24, %s3875_s24   ;;  %s2921_s23 = sphi %s3096_s23, %s3874_s23   ;;  %s2917_s22 = sphi %s3094_s22, %s3873_s22   ;;  %s2913_s1 = sphi %s3092_s1, %s3872_s1  }
  0x24   : > { %3822 = sst [smem:[#allocation27_spill]] %s2941_s26  ;;  %p2149_p0 = scmp.ge.s32.totalorder %s2953_s4, 1 }
  0x25   : > { %p3151_p1 = scmp.eq.s32.totalorder %s3780_s29, 0  ;;  %p515_p2 = scmp.lt.s32.totalorder %s2953_s4, 5 }
  0x26   : > { %s2955_s21 = smov [#allocation8]   ;;  %s2956_s17 = smov [#allocation11]  }
  0x27   : > { %s3823_s30 = scalar_select %p3151_p1, 1, 0 }
  0x28   : > { %p3156_p3 = pnand %p2149_p0, %p515_p2  ;;  %s537_s20 = sshll.u32 %s2955_s21, 4  ;;  %s538_s20 = int_to_ptr.vmem [resolvable:$true] %s537_s20 }
  0x29   : > { %s565_s15 = sshll.u32 %s2956_s17, 4  ;;  %s2957_s16 = smov [#allocation14]   ;;  %s3168_s15 = int_to_ptr.vmem [resolvable:$true] %s565_s15 }
  0x2a   : > { %s3824_s0 = scalar_select %p3156_p3, 1, 0 }
  0x2b   : > { %p2387_p4 = pneg %p3156_p3  ;;  %s587_s14 = sshll.u32 %s2957_s16, 4  ;;  %s3170_s14 = int_to_ptr.vmem [resolvable:$true] %s587_s14 }
  0x2c   : > { %3825 = sst [smem:[#allocation28_spill]] %s3824_s0  ;;  %s3827_s5 = sld [smem:[#allocation34_spill]] }
  0x2d   : > { %p3164_p5 = pnand %p2387_p4, %p3151_p1 }
  0x2f   : > { %p3180_p7 = pneg %p3164_p5 }
  0x32   : > { %s2589_s21 = scalar_lea.hbm %s3827_s5, 16 }
  0x33   : > { %p2590_p6 = scmp.ne.s32.totalorder %s3827_s5, %s2589_s21  ;;  %p2596_p10 = scmp.lt.u32.totalorder %s2589_s21, %s3827_s5 }
  0x35   : > { %p2592_p8 = pnand %p3180_p7, %p2590_p6 }
  0x37   : > { %p2593_p9 = pneg %p2592_p8 }
  0x39   : > { %p2598_p11 = pnand %p2596_p10, %p2593_p9 }
  0x3b   : > { %2601 = shalt.err (!%p2598_p11)
}
  0x3c   : > { %s2602_s8 = scalar_lea.vmem %s538_s20, 16  ;;  %s2609_s6 = scalar_lea.vmem %s538_s20, 32 }
  0x3d   : > { %p2603_p12 = scmp.ne.s32.totalorder %s538_s20, %s2602_s8  ;;  %p2610_p2 = scmp.lt.s32.totalorder %s538_s20, %s538_s20 }
  0x3e   : > { %p2611_p4 = scmp.lt.s32.totalorder %s2609_s6, %s2602_s8 }
  0x3f   : > { %p2605_p13 = pnand %p2603_p12, %p3180_p7 }
  0x40   : > { %p2612_p3 = por %p2611_p4, %p2610_p2 }
  0x41   : > { %p2606_p0 = pneg %p2605_p13 }
  0x43   : > { %p2613_p1 = pnand %p2612_p3, %p2606_p0 }
  0x45   : > { %2616 = shalt.err (!%p2613_p1)
}
  0x46   : > { %2390 = dma.hbm_to_vmem [thread:$0]  (!%p3164_p5), %s3827_s5, 16, %s538_s20, [#allocation9]  }
  0x47   : > { %s3829_s9 = sld [smem:[#allocation38_spill]] }
  0x4d   : > { %s2617_s16 = scalar_lea.hbm %s3829_s9, 16 }
  0x4e   : > { %p2618_p6 = scmp.ne.s32.totalorder %s3829_s9, %s2617_s16  ;;  %p2624_p1 = scmp.lt.u32.totalorder %s2617_s16, %s3829_s9 }
  0x50   : > { %p2620_p8 = pnand %p2618_p6, %p3180_p7 }
  0x52   : > { %p2621_p9 = pneg %p2620_p8 }
  0x54   : > { %p2626_p3 = pnand %p2624_p1, %p2621_p9 }
  0x56   : > { %2629 = shalt.err (!%p2626_p3)
}
  0x57   : > { %s2630_s20 = scalar_lea.vmem %s3168_s15, 16  ;;  %s2637_s26 = scalar_lea.vmem %s3168_s15, 32 }
  0x58   : > { %p2631_p10 = scmp.ne.s32.totalorder %s3168_s15, %s2630_s20  ;;  %p2638_p13 = scmp.lt.s32.totalorder %s3168_s15, %s3168_s15 }
  0x59   : > { %p2639_p0 = scmp.lt.s32.totalorder %s2637_s26, %s2630_s20 }
  0x5a   : > { %p2633_p11 = pnand %p2631_p10, %p3180_p7 }
  0x5b   : > { %p2640_p2 = por %p2639_p0, %p2638_p13 }
  0x5c   : > { %p2634_p12 = pneg %p2633_p11 }
  0x5e   : > { %p2641_p4 = pnand %p2640_p2, %p2634_p12 }
  0x60   : > { %2644 = shalt.err (!%p2641_p4)
}
  0x61   : > { %2396 = dma.hbm_to_vmem [thread:$0]  (!%p3164_p5), %s3829_s9, 16, %s3168_s15, [#allocation12]  }
  0x62   : > { %s3830_s11 = sld [smem:[#allocation40_spill]] }
  0x68   : > { %s2645_s21 = scalar_lea.hbm %s3830_s11, 16 }
  0x69   : > { %p2646_p6 = scmp.ne.s32.totalorder %s3830_s11, %s2645_s21  ;;  %p2652_p1 = scmp.lt.u32.totalorder %s2645_s21, %s3830_s11 }
  0x6b   : > { %p2648_p8 = pnand %p2646_p6, %p3180_p7 }
  0x6d   : > { %p2649_p9 = pneg %p2648_p8 }
  0x6f   : > { %p2654_p3 = pnand %p2652_p1, %p2649_p9 }
  0x71   : > { %2657 = shalt.err (!%p2654_p3)
}
  0x72   : > { %s2658_s15 = scalar_lea.vmem %s3170_s14, 16  ;;  %s2665_s26 = scalar_lea.vmem %s3170_s14, 32 }
  0x73   : > { %p2659_p10 = scmp.ne.s32.totalorder %s3170_s14, %s2658_s15  ;;  %p2666_p13 = scmp.lt.s32.totalorder %s3170_s14, %s3170_s14 }
  0x74   : > { %p2667_p0 = scmp.lt.s32.totalorder %s2665_s26, %s2658_s15 }
  0x75   : > { %p2661_p11 = pnand %p2659_p10, %p3180_p7 }
  0x76   : > { %p2668_p2 = por %p2667_p0, %p2666_p13 }
  0x77   : > { %p2662_p12 = pneg %p2661_p11 }
  0x79   : > { %p2669_p4 = pnand %p2668_p2, %p2662_p12 }
  0x7b   : > { %2672 = shalt.err (!%p2669_p4)
}
  0x7c   : > { %2402 = dma.hbm_to_vmem [thread:$0]  (!%p3164_p5), %s3830_s11, 16, %s3170_s14, [#allocation15]  }
  0x7d   : > { %s2958_s19 = smov [#allocation10]   ;;  %s2959_s21 = smov [#allocation13]  }
  0x7e   : > { %s551_s3 = sshll.u32 %s2958_s19, 4  ;;  %s576_s16 = sshll.u32 %s2959_s21, 4  ;;  %s552_s3 = int_to_ptr.vmem [resolvable:$true] %s551_s3  ;;  %s577_s16 = int_to_ptr.vmem [resolvable:$true] %s576_s16 }
  0x7f   : > { %s3831_s7 = sld [smem:[#allocation36_spill]] }
  0x85   : > { %s2673_s20 = scalar_lea.hbm %s3831_s7, 16 }
  0x86   : > { %p2674_p6 = scmp.ne.s32.totalorder %s3831_s7, %s2673_s20  ;;  %p2680_p1 = scmp.lt.u32.totalorder %s2673_s20, %s3831_s7 }
  0x88   : > { %p2676_p8 = pnand %p2674_p6, %p3180_p7 }
  0x8a   : > { %p2677_p9 = pneg %p2676_p8 }
  0x8c   : > { %p2682_p3 = pnand %p2680_p1, %p2677_p9 }
  0x8e   : > { %2685 = shalt.err (!%p2682_p3)
}
  0x8f   : > { %s2686_s14 = scalar_lea.vmem %s552_s3, 16  ;;  %s2693_s18 = scalar_lea.vmem %s552_s3, 32 }
  0x90   : > { %p2687_p10 = scmp.ne.s32.totalorder %s552_s3, %s2686_s14  ;;  %p2694_p13 = scmp.lt.s32.totalorder %s552_s3, %s552_s3 }
  0x91   : > { %p2695_p0 = scmp.lt.s32.totalorder %s2693_s18, %s2686_s14 }
  0x92   : > { %p2689_p11 = pnand %p2687_p10, %p3180_p7 }
  0x93   : > { %p2696_p2 = por %p2695_p0, %p2694_p13 }
  0x94   : > { %p2690_p12 = pneg %p2689_p11 }
  0x96   : > { %p2697_p4 = pnand %p2696_p2, %p2690_p12 }
  0x98   : > { %2700 = shalt.err (!%p2697_p4)
}
  0x99   : > { %2393 = dma.hbm_to_vmem [thread:$0]  (!%p3164_p5), %s3831_s7, 16, %s552_s3, [#allocation9]  }
  0x9a   : > { %s3832_s10 = sld [smem:[#allocation39_spill]] }
  0xa0   : > { %s2701_s6 = scalar_lea.hbm %s3832_s10, 16 }
  0xa1   : > { %p2702_p6 = scmp.ne.s32.totalorder %s3832_s10, %s2701_s6  ;;  %p2708_p1 = scmp.lt.u32.totalorder %s2701_s6, %s3832_s10 }
  0xa3   : > { %p2704_p8 = pnand %p2702_p6, %p3180_p7 }
  0xa5   : > { %p2705_p9 = pneg %p2704_p8 }
  0xa7   : > { %p2710_p3 = pnand %p2708_p1, %p2705_p9 }
  0xa9   : > { %2713 = shalt.err (!%p2710_p3)
}
  0xaa   : > { %s2714_s14 = scalar_lea.vmem %s577_s16, 16  ;;  %s2721_s3 = scalar_lea.vmem %s577_s16, 32 }
  0xab   : > { %p2715_p10 = scmp.ne.s32.totalorder %s577_s16, %s2714_s14  ;;  %p2722_p13 = scmp.lt.s32.totalorder %s577_s16, %s577_s16 }
  0xac   : > { %p2723_p0 = scmp.lt.s32.totalorder %s2721_s3, %s2714_s14 }
  0xad   : > { %p2717_p11 = pnand %p2715_p10, %p3180_p7 }
  0xae   : > { %p2724_p2 = por %p2723_p0, %p2722_p13 }
  0xaf   : > { %p2718_p12 = pneg %p2717_p11 }
  0xb1   : > { %p2725_p4 = pnand %p2724_p2, %p2718_p12 }
  0xb3   : > { %2728 = shalt.err (!%p2725_p4)
}
  0xb4   : > { %2399 = dma.hbm_to_vmem [thread:$0]  (!%p3164_p5), %s3832_s10, 16, %s577_s16, [#allocation12]  }
  0xb5   : > { %s2960_s21 = smov [#allocation16]   ;;  %s2961_s8 = smov [#allocation17]  }
  0xb6   : > { %s598_s5 = sshll.u32 %s2960_s21, 4  ;;  %s609_s6 = sshll.u32 %s2961_s8, 4  ;;  %s599_s5 = int_to_ptr.vmem [resolvable:$true] %s598_s5  ;;  %s610_s6 = int_to_ptr.vmem [resolvable:$true] %s609_s6 }
  0xb7   : > { %s3833_s12 = sld [smem:[#allocation41_spill]] }
  0xbd   : > { %s2729_s26 = scalar_lea.hbm %s3833_s12, 16 }
  0xbe   : > { %p2730_p6 = scmp.ne.s32.totalorder %s3833_s12, %s2729_s26  ;;  %p2736_p1 = scmp.lt.u32.totalorder %s2729_s26, %s3833_s12 }
  0xc0   : > { %p2732_p8 = pnand %p2730_p6, %p3180_p7 }
  0xc2   : > { %p2733_p9 = pneg %p2732_p8 }
  0xc4   : > { %p2738_p3 = pnand %p2736_p1, %p2733_p9 }
  0xc6   : > { %2741 = shalt.err (!%p2738_p3)
}
  0xc7   : > { %s2742_s16 = scalar_lea.vmem %s599_s5, 16  ;;  %s2749_s19 = scalar_lea.vmem %s599_s5, 32 }
  0xc8   : > { %p2743_p10 = scmp.ne.s32.totalorder %s599_s5, %s2742_s16  ;;  %p2750_p13 = scmp.lt.s32.totalorder %s599_s5, %s599_s5 }
  0xc9   : > { %p2751_p0 = scmp.lt.s32.totalorder %s2749_s19, %s2742_s16 }
  0xca   : > { %p2745_p11 = pnand %p2743_p10, %p3180_p7 }
  0xcb   : > { %p2752_p2 = por %p2751_p0, %p2750_p13 }
  0xcc   : > { %p2746_p12 = pneg %p2745_p11 }
  0xce   : > { %p2753_p4 = pnand %p2752_p2, %p2746_p12 }
  0xd0   : > { %2756 = shalt.err (!%p2753_p4)
}
  0xd1   : > { %2405 = dma.hbm_to_vmem [thread:$0]  (!%p3164_p5), %s3833_s12, 16, %s599_s5, [#allocation15]  }
  0xd2   : > { %s3834_s13 = sld [smem:[#allocation42_spill]] }
  0xd8   : > { %s2757_s26 = scalar_lea.hbm %s3834_s13, 16 }
  0xd9   : > { %p2758_p6 = scmp.ne.s32.totalorder %s3834_s13, %s2757_s26  ;;  %p2764_p1 = scmp.lt.u32.totalorder %s2757_s26, %s3834_s13 }
  0xdb   : > { %p2760_p8 = pnand %p2758_p6, %p3180_p7 }
  0xdd   : > { %p2761_p9 = pneg %p2760_p8 }
  0xdf   : > { %p2766_p3 = pnand %p2764_p1, %p2761_p9 }
  0xe1   : > { %2769 = shalt.err (!%p2766_p3)
}
  0xe2   : > { %s2770_s16 = scalar_lea.vmem %s610_s6, 16  ;;  %s2777_s5 = scalar_lea.vmem %s610_s6, 32 }
  0xe3   : > { %p2771_p10 = scmp.ne.s32.totalorder %s610_s6, %s2770_s16  ;;  %p2778_p13 = scmp.lt.s32.totalorder %s610_s6, %s610_s6 }
  0xe4   : > { %p2779_p0 = scmp.lt.s32.totalorder %s2777_s5, %s2770_s16 }
  0xe5   : > { %p2773_p11 = pnand %p2771_p10, %p3180_p7 }
  0xe6   : > { %p2780_p2 = por %p2779_p0, %p2778_p13 }
  0xe7   : > { %p2774_p12 = pneg %p2773_p11 }
  0xe9   : > { %p2781_p4 = pnand %p2780_p2, %p2774_p12 }
  0xeb   : > { %2784 = shalt.err (!%p2781_p4)
}
  0xec   : > { %2408 = dma.hbm_to_vmem [thread:$0]  (!%p3164_p5), %s3834_s13, 16, %s610_s6, [#allocation18]  }
  0xed   : > { %s2148_s17 = sadd.s32 4294967294, %s2953_s4   ;;  %s49_s29 = sadd.s32 1, %s2945_s27 }
  0xee   : > { %s52_s8 = sadd.s32 1, %s2949_s28  ;;  %p50_p7 = scmp.ge.s32.totalorder %s49_s29, 2 }
  0xef   : > { %s85_s20 = sadd.s32 1, %s2933_s25  ;;  %p92_p6 = scmp.ne.s32.totalorder %s2933_s25, %s2929_s2 }
  0xf0   : > { %p93_p8 = scmp.eq.s32.totalorder %s2953_s4, 0  ;;  %s3883_s29 = smov (%p50_p7, %s49_s29), 0 }
  0xf1   : > { %s3885_s8 = smov (!%p50_p7, %s52_s8), %s2949_s28  ;;  %p98_p5 = scmp.ne.s32.totalorder %s2929_s2, %s2925_s24 }
  0xf2   : > { %p3326_p9 = por %p93_p8, %p92_p6  ;;  %p54_p1 = scmp.ge.s32.totalorder %s3885_s8, 2 }
  0xf3   : > { %s487_s15 = ssub.s32 %s2945_s27, %s3883_s29  ;;  %p3836_p3 = scmp.ne.s32.totalorder %s3823_s30, 0 }
  0xf4   : > { %s491_s0 = sadd.s32 1, %s2921_s23  ;;  %s3887_s8 = smov (%p54_p1, %s3885_s8), 0 }
  0xf5   : > { %p3336_p10 = por %p3836_p3, %p98_p5  ;;  %p501_p11 = scmp.ne.s32.totalorder %s2921_s23, %s2917_s22 }
  0xf6   : > { %s3838_s14 = sadd.s32 4294967295, %s2953_s4   ;;  %s82_s3 = ssub.s32 %s2949_s28, %s3887_s8 }
  0xf7   : > { %p502_p12 = scmp.eq.s32.totalorder %s3838_s14, 3  ;;  %p507_p13 = scmp.ne.s32.totalorder %s2917_s22, %s2913_s1 }
  0xf8   : > { %p83_p0 = scmp.eq.s32.totalorder %s82_s3, 0  ;;  %s488_s24 = sor.u32 %s487_s15, %s82_s3 }
  0xf9   : > { %p489_p2 = scmp.eq.s32.totalorder %s488_s24, 0  ;;  %p3351_p4 = por %p502_p12, %p501_p11 }
  0xfa   : > { %s3356_s16 = scalar_select %p83_p0, %s2933_s25, %s85_s20  }
  0xfb   : > { %s3839_s18 = scalar_select %p3351_p4, 1, 0 }
  0xfc   : > { %s3359_s5 = scalar_select %p489_p2, %s2921_s23, %s491_s0  }
  0xfd   : > { %p508_p7 = scmp.eq.s32.totalorder %s2148_s17, 3  ;;  %p2424_p6 = scmp.lt.s32.totalorder %s2953_s4, 4 }
  0xfe   : > { %s646_s19 = sand.u32 1, %s2933_s25   ;;  %s2158_s21 = sshll.u32 %s2949_s28, 4 }
  0xff   : > { %p3364_p8 = por %p508_p7, %p507_p13  ;;  %s3841_s15 = sld [smem:[#allocation30_spill]] }
 0x100   : > { %s649_s20 = scalar_lea.vmem [#allocation5], %s646_s19  ;;  %p3375_p5 = pnand %p2424_p6, %p3326_p9 }
 0x101   : > { %s3840_s14 = scalar_select %p3364_p8, 1, 0 }
 0x102   : > { %s656_s0 = sshll.u32 %s649_s20, 4  ;;  %s647_s24 = scalar_lea.sflag [#allocation6], %s646_s19  ;;  %s3379_s0 = int_to_ptr.vmem [resolvable:$true] %s656_s0 }
 0x103   : > { %p2787_p3 = pneg %p3375_p5 }
 0x105   : > { %s3371_s3 = scalar_lea.hbm %s3841_s15, %s2158_s21  ;;  %s2790_s6 = scalar_lea.hbm %s3841_s15, 32 }
 0x106   : > { %s2785_s10 = scalar_lea.hbm %s3371_s3, 16  ;;  %p2791_p9 = scmp.lt.u32.totalorder %s3371_s3, %s3841_s15 }
 0x107   : > { %p2786_p1 = scmp.ne.s32.totalorder %s3371_s3, %s2785_s10  ;;  %p2792_p13 = scmp.lt.u32.totalorder %s2790_s6, %s2785_s10 }
 0x108   : > { %p2794_p2 = scmp.lt.u32.totalorder %s2785_s10, %s3371_s3 }
 0x109   : > { %p2788_p11 = pnand %p2787_p3, %p2786_p1  ;;  %p2793_p0 = por %p2792_p13, %p2791_p9 }
 0x10b   : > { %p2789_p12 = pneg %p2788_p11  ;;  %p2795_p7 = por %p2794_p2, %p2793_p0 }
 0x10d   : > { %p2796_p6 = pnand %p2795_p7, %p2789_p12 }
 0x10f   : > { %2799 = shalt.err (!%p2796_p6)
}
 0x110   : > { %s2800_s19 = scalar_lea.vmem %s3379_s0, 16  ;;  %s2962_s7 = smov [#allocation5]  }
 0x111   : > { %p2801_p1 = scmp.ne.s32.totalorder %s3379_s0, %s2800_s19  ;;  %s2805_s9 = sshll.u32 %s2962_s7, 4  ;;  %s2806_s9 = int_to_ptr.vmem [resolvable:$false] %s2805_s9 }
 0x112   : > { %s2807_s21 = scalar_lea.vmem %s2806_s9, 32  ;;  %p2808_p4 = scmp.lt.s32.totalorder %s3379_s0, %s2806_s9 }
 0x113   : > { %p2803_p11 = pnand %p2801_p1, %p2787_p3  ;;  %p2809_p9 = scmp.lt.s32.totalorder %s2807_s21, %s2800_s19 }
 0x115   : > { %p2804_p8 = pneg %p2803_p11  ;;  %p2810_p13 = por %p2809_p9, %p2808_p4 }
 0x117   : > { %p2811_p0 = pnand %p2810_p13, %p2804_p8 }
 0x119   : > { %2814 = shalt.err (!%p2811_p0)
}
 0x11a   : > { %2412 = dma.hbm_to_vmem [thread:$0]  (!%p3375_p5), %s3371_s3, 16, %s3379_s0, %s647_s24  }
 0x11b   : > { %s3843_s10 = sld [smem:[#allocation28_spill]] }
 0x121   : > { %p3844_p12 = scmp.ne.s32.totalorder %s3843_s10, 0 }
 0x122   : > { %s667_s6 = sand.u32 (!%p3844_p12), 1, %s2929_s2  }
 0x123   : > { %665 = sbr.rel (%p3844_p12) target bundleno = 3711 (0xe7f), region = 100  ;;  %s668_s20 = scalar_lea.sflag (!%p3844_p12), [#allocation6], %s667_s6 }
 0x124   : > { %s3409_s7 = scalar_lea.vmem (!%p3844_p12), [#allocation5], %s667_s6 }
 0x12a   : > { %2888 = dma.done.wait (%p3336_p10), %s668_s20, 16  }
 0x12b   : > { %2890 = vsyncadd (%p3336_p10), %s668_s20, 4294967280  ;;  %p3845_p4 = scmp.ne.s32.totalorder %s3823_s30, 0 }
 0x12d   : > { %2892 = dma.done.wait (%p3845_p4), [#allocation9], 32  }
 0x12e   : > { %2894 = vsyncadd (%p3845_p4), [#allocation9], 4294967264 }
 0x12f   : > { %2896 = dma.done.wait (%p3845_p4), [#allocation12], 32  }
 0x130   : > { %2898 = vsyncadd (%p3845_p4), [#allocation12], 4294967264 }
 0x131   : > { %2900 = dma.done.wait (%p3845_p4), [#allocation15], 32  }
 0x132   : > { %2902 = vsyncadd (%p3845_p4), [#allocation15], 4294967264 }
 0x133   : > { %2904 = dma.done.wait (%p3845_p4), [#allocation18], 16  }
 0x134   : > { %2906 = vsyncadd (%p3845_p4), [#allocation18], 4294967280  ;;  %s3846_s26 = sld [smem:[#allocation27_spill]]  ;;  %s3794_s3 = sand.u32 1, %s2917_s22  }
 0x135   : > { %s3435_s0 = sshll.u32 %s3794_s3, 3  ;;  %s3847_s9 = sld [smem:[#allocation29_spill]] }
 0x136   : > { %s3848_s30 = sld [smem:[#allocation26_spill]] }
 0x13a   : > { %p759_p10 = scmp.lt.s32.totalorder %s3846_s26, 1 }
 0x13c   : > { %s3889_s26 = smov (!%p759_p10, %s3846_s26), 1  ;;  %p2170_p8 = scmp.ne.s32.totalorder %s3848_s30, 0 }
 0x13d   : > { %s2218_s17 = sshll.u32 %s3889_s26, 4  ;;  %vm773_vm0 = vcmask (!%p2170_p8), 261120   ;;  %s3849_s26 = sld [smem:[#allocation33_spill]] (!%p2170_p8)  ;;  %v2963_v16 = vmov (!%p2170_p8), 0.0   ;;  %vm2964_vm1 = vmmov (!%p2170_p8), 0   ;;  %vm969_vm2 = vcmask (!%p2170_p8), 31744  }
 0x13e   : > { %s3441_s21 = scalar_lea.vmem %s3847_s9, %s2218_s17  ;;  %768 = sbr.rel (%p2170_p8) target bundleno = 1107 (0x453), region = 136  ;;  %2255 = vmatprep.subr.bf16.mxu0 (!%p2170_p8), %v2963_v16  ;;  %2263 = vmatprep.subr.bf16.mxu1 (!%p2170_p8), %v2963_v16  ;;  %v2171_v27 = vld [vmem:[#allocation13] ss:$0 sm:$0xff] (!%p2170_p8)  ;;  %v2172_v31 = vld [vmem:[#allocation14] ss:$0 sm:$0xff] (!%p2170_p8)  ;;  %vm979_vm3 = vcmask (!%p2170_p8), 64512  }
 0x13f   : > { %v769_v0 = vld [vmem:[%s3441_s21] sm:$0xff] (!%p2170_p8)  ;;  %v770_v1 = vld [vmem:[%s3441_s21 + $0x8] sm:$0xff] (!%p2170_p8)  ;;  %s3851_s9 = sld [smem:[#allocation35_spill]] (!%p2170_p8)  ;;  %2259 = vmatprep.mubr.msk.bf16.mxu0 (!%p2170_p8), %vm2964_vm1, %v2963_v16  ;;  %2267 = vmatprep.mubr.msk.bf16.mxu1 (!%p2170_p8), %vm2964_vm1, %v2963_v16  ;;  %v2173_v36 = vld [vmem:[#allocation8] ss:$0 sm:$0xff] (!%p2170_p8)  ;;  %s2965_s11 = smov (!%p2170_p8), 116  }
 0x140   : > { %v774_v2 = vsel (!%p2170_p8), %vm773_vm0, %v769_v0, 0.0  ;;  %v777_v3 = vsel (!%p2170_p8), %vm773_vm0, %v770_v1, 0.0  ;;  %v2177_v38 = vld [vmem:[#allocation10] ss:$0 sm:$0xff] (!%p2170_p8)  ;;  %s2966_s3 = smov (!%p2170_p8), 124   ;;  %s2967_s10 = smov (!%p2170_p8), 108  }
 0x141   : > { %775 = vadd.xlane.f32.xlu0 (!%p2170_p8), %v774_v2  ;;  %s2968_s6 = smov (!%p2170_p8), 100   ;;  %s2969_s20 = smov (!%p2170_p8), 4   ;;  %vm1012_vm4 = vcmask (!%p2170_p8), 130112   ;;  %vm1043_vm5 = vcmask (!%p2170_p8), 195712   ;;  %vm1074_vm6 = vcmask (!%p2170_p8), 261312  }
 0x142   : > { %s3852_s19 = sld [smem:[#allocation47_spill]] (!%p2170_p8)  ;;  %s2970_s30 = smov (!%p2170_p8), 8  }
 0x143   : > { %s3850_s17 = smov (!%p2170_p8), %s3849_s26  ;;  %v2551_v14 = vld [vmem:[%s3849_s26] sm:$0xff] (!%p2170_p8)   ;;  %s2971_s12 = smov (!%p2170_p8), 16  }
 0x144   : > { %2256 = vmatpush3.bf16.msra.mxu0 (!%p2170_p8), %v2551_v14  ;;  %v2553_v17 = vld [vmem:[%s3850_s17 + $0x8] sm:$0xff] (!%p2170_p8)   ;;  %s3853_s26 = sld [smem:[#allocation48_spill]] (!%p2170_p8) }
 0x145   : > { %778 = vadd.xlane.f32.xlu0 %v777_v3  ;;  %v2552_v15 = vld [vmem:[%s3851_s9] sm:$0xff]   ;;  %v2554_v18 = vld [vmem:[%s3851_s9 + $0x8] sm:$0xff]   ;;  %2257 = vmatprep.subr.bf16.mxu0 %v2963_v16 }
 0x146   : > { %2264 = vmatpush3.bf16.msra.mxu1 %v2552_v15 }
 0x147   : > { %2265 = vmatprep.subr.bf16.mxu1 %v2963_v16 }
 0x148   : > { %2258 = vmatpush3.bf16.msra.mxu0 %v2553_v17  ;;  %v951_v51 = vld [vmem:[%s3852_s19] sm:$0xff]  ;;  %v952_v52 = vld [vmem:[%s3852_s19 + $0x8] sm:$0xff] }
 0x14a   : > { %2266 = vmatpush3.bf16.msra.mxu1 %v2554_v18  ;;  %v953_v53 = vld [vmem:[%s3853_s26] sm:$0xff]  ;;  %v954_v62 = vld [vmem:[%s3853_s26 + $0x8] sm:$0xff] }
 0x1ce   : > { %v776_v4 = vpop.xlane.xlu0 %775 }
 0x1cf   : > { %v781_v5 = vmul.f32 0.03125, %v776_v4 }
 0x1d1   : > { %v783_v6 = vsub.f32 %v769_v0, %v781_v5 }
 0x1d2   : > { %v779_v7 = vpop.xlane.xlu0 %778 }
 0x1d3   : > { %v782_v8 = vmul.f32 0.03125, %v779_v7  ;;  %v785_v9 = vmul.f32 %v783_v6, %v783_v6 }
 0x1d5   : > { %v784_v10 = vsub.f32 %v770_v1, %v782_v8  ;;  %v787_v11 = vsel %vm773_vm0, %v785_v9, 0.0 }
 0x1d6   : > { %788 = vadd.xlane.f32.xlu1 %v787_v11 }
 0x1d7   : > { %v786_v12 = vmul.f32 %v784_v10, %v784_v10 }
 0x1d9   : > { %v790_v13 = vsel %vm773_vm0, %v786_v12, 0.0 }
 0x1da   : > { %791 = vadd.xlane.f32.xlu1 %v790_v13 }
 0x263   : > { %v789_v19 = vpop.xlane.xlu1 %788 }
 0x264   : > { %v793_v20 = vmul.f32 0.03125, %v789_v19 }
 0x266   : > { %v795_v21 = vadd.f32 1e-05, %v793_v20 }
 0x267   : > { %v792_v22 = vpop.xlane.xlu1 %791 }
 0x268   : > { %2555 = vrsqrt.f32 %v795_v21  ;;  %v794_v23 = vmul.f32 0.03125, %v792_v22 }
 0x26a   : > { %v796_v24 = vadd.f32 1e-05, %v794_v23 }
 0x26c   : > { %2557 = vrsqrt.f32 %v796_v24 }
 0x272   : > { %v2556_v25 = vpop.eup %2555 }
 0x273   : > { %v799_v26 = vmul.f32 %v2556_v25, %v783_v6 }
 0x275   : > { %v807_v30 = vmul.f32 %v2171_v27, %v799_v26 }
 0x276   : > { %v2558_v28 = vpop.eup %2557 }
 0x277   : > { %v800_v29 = vmul.f32 %v2558_v28, %v784_v10  ;;  %v815_v33 = vadd.f32 %v2172_v31, %v807_v30 }
 0x279   : > { %v808_v32 = vmul.f32 %v2171_v27, %v800_v29 }
 0x27b   : > { %v816_v34 = vadd.f32 %v2172_v31, %v808_v32 }
 0x27d   : > { %v817_v35 = vpack.c.bf16 %v816_v34, %v815_v33 }
 0x27f   : > { %2260 = vmatmul.mubr.msk.bf16.vlgmr.msra.gmra.mrb[0].mxu0 %vm773_vm0, %v817_v35  ;;  %2268 = vmatmul.mubr.msk.bf16.vlgmr.msra.gmra.mrb[0].mxu1 %vm773_vm0, %v817_v35 }
 0x352   : > { %v878_v37 = vpop.f32.mrb[0].mxu0  ;;  %v942_v39 = vpop.f32.mrb[0].mxu1 }
 0x353   : > { %v3465_v40 = vadd.f32 %v2173_v36, %v878_v37  ;;  %v2261_v41 = vpop.f32.mrb[1].mxu0  ;;  %v2269_v42 = vpop.f32.mrb[1].mxu1  ;;  %v943_v45 = vadd.f32 %v2177_v38, %v942_v39 }
 0x354   : > { %v881_v43 = vpop.f32.mrb[2].mxu0  ;;  %v945_v44 = vpop.f32.mrb[2].mxu1 }
 0x355   : > { %v946_v46 = vadd.f32 %v2177_v38, %v945_v44  ;;  %v2270_v47 = vpop.f32.mrb[3].mxu1  ;;  %981 = vrot.lane.b32.xlu1 %v3465_v40, %s2965_s11  ;;  %957 = vrot.lane.b32.xlu0 %v3465_v40, %s2966_s3  ;;  %v2262_v48 = vpop.f32.mrb[3].mxu0  ;;  %v3469_v49 = vadd.f32 %v2173_v36, %v881_v43  ;;  %v972_v19 = vmul.f32 %v951_v51, %v3465_v40 }
 0x357   : > { %v949_v50 = vpack.c.bf16 %v946_v46, %v943_v45  ;;  %v973_v20 = vmul.f32 %v952_v52, %v3469_v49 }
 0x359   : > { %950 = vst.msk [vmem:[#allocation3] sm:$0xff] %vm773_vm0, %v949_v50  ;;  %1014 = vrot.lane.b32.xlu0 %v3465_v40, %s2967_s10  ;;  %959 = vrot.lane.b32.xlu1 %v3469_v49, %s2966_s3 }
 0x35d   : > { %1045 = vrot.lane.b32.xlu0 %v3465_v40, %s2968_s6  ;;  %983 = vrot.lane.b32.xlu1 %v3469_v49, %s2965_s11  ;;  %s2972_s11 = smov 24  }
 0x361   : > { %963 = vrot.lane.b32.xlu0 %v3465_v40, %s2969_s20  ;;  %1016 = vrot.lane.b32.xlu1 %v3469_v49, %s2967_s10 }
 0x365   : > { %991 = vrot.lane.b32.xlu0 %v951_v51, %s2970_s30  ;;  %1047 = vrot.lane.b32.xlu1 %v3469_v49, %s2968_s6 }
 0x369   : > { %1022 = vrot.lane.b32.xlu0 %v951_v51, %s2971_s12  ;;  %993 = vrot.lane.b32.xlu1 %v952_v52, %s2970_s30 }
 0x36d   : > { %1053 = vrot.lane.b32.xlu0 %v951_v51, %s2972_s11  ;;  %1024 = vrot.lane.b32.xlu1 %v952_v52, %s2971_s12 }
 0x371   : > { %1055 = vrot.lane.b32.xlu1 %v952_v52, %s2972_s11 }
 0x375   : > { %965 = vrot.lane.b32.xlu1 %v3469_v49, %s2969_s20 }
 0x3c7   : > { %v982_v54 = vpop.permute.xlu1 %981  ;;  %v958_v55 = vpop.permute.xlu0 %957 }
 0x3c8   : > { %v987_v56 = vsel %vm969_vm2, %v982_v54, %v958_v55 }
 0x3c9   : > { %v999_v57 = vmul.f32 %v987_v56, %v953_v53 }
 0x3cb   : > { %1003 = vrot.lane.b32.xlu0 %v999_v57, %s2970_s30  ;;  %v1015_v58 = vpop.permute.xlu0 %1014  ;;  %v960_v59 = vpop.permute.xlu1 %959 }
 0x3cc   : > { %v1020_v60 = vsel %vm969_vm2, %v1015_v58, %v982_v54 }
 0x3cd   : > { %v1030_v61 = vmul.f32 %v1020_v60, %v953_v53 }
 0x3cf   : > { %1034 = vrot.lane.b32.xlu0 %v1030_v61, %s2971_s12  ;;  %v1046_v63 = vpop.permute.xlu0 %1045  ;;  %v984_v0 = vpop.permute.xlu1 %983 }
 0x3d0   : > { %v1051_v1 = vsel %vm969_vm2, %v1046_v63, %v1015_v58  ;;  %v988_v2 = vsel %vm969_vm2, %v984_v0, %v960_v59 }
 0x3d1   : > { %v1061_v3 = vmul.f32 %v1051_v1, %v953_v53  ;;  %v1000_v4 = vmul.f32 %v988_v2, %v954_v62 }
 0x3d3   : > { %1065 = vrot.lane.b32.xlu0 %v1061_v3, %s2972_s11  ;;  %1005 = vrot.lane.b32.xlu1 %v1000_v4, %s2970_s30  ;;  %v1017_v5 = vpop.permute.xlu1 %1016  ;;  %v964_v13 = vpop.permute.xlu0 %963 }
 0x3d4   : > { %v1021_v6 = vsel %vm969_vm2, %v1017_v5, %v984_v0  ;;  %v970_v15 = vsel %vm969_vm2, %v958_v55, %v964_v13 }
 0x3d5   : > { %v1031_v7 = vmul.f32 %v1021_v6, %v954_v62  ;;  %v974_v16 = vmul.f32 %v970_v15, %v953_v53 }
 0x3d7   : > { %1036 = vrot.lane.b32.xlu1 %v1031_v7, %s2971_s12  ;;  %v1048_v8 = vpop.permute.xlu1 %1047  ;;  %v976_v22 = vadd.f32 %v974_v16, %v972_v19  ;;  %v992_v25 = vpop.permute.xlu0 %991 }
 0x3d8   : > { %v1052_v9 = vsel %vm969_vm2, %v1048_v8, %v1017_v5  ;;  %v997_v29 = vmul.f32 %v992_v25, %v3465_v40 }
 0x3d9   : > { %v1062_v10 = vmul.f32 %v1052_v9, %v954_v62 }
 0x3db   : > { %1067 = vrot.lane.b32.xlu1 %v1062_v10, %s2972_s11  ;;  %v994_v11 = vpop.permute.xlu1 %993  ;;  %v1023_v26 = vpop.permute.xlu0 %1022 }
 0x3dc   : > { %v998_v30 = vmul.f32 %v994_v11, %v3469_v49  ;;  %v1028_v35 = vmul.f32 %v1023_v26, %v3465_v40 }
 0x3df   : > { %v1025_v12 = vpop.permute.xlu1 %1024  ;;  %v1054_v27 = vpop.permute.xlu0 %1053 }
 0x3e0   : > { %v1029_v36 = vmul.f32 %v1025_v12, %v3469_v49  ;;  %v1059_v43 = vmul.f32 %v1054_v27, %v3465_v40 }
 0x3e3   : > { %v1056_v14 = vpop.permute.xlu1 %1055 }
 0x3e4   : > { %v1060_v44 = vmul.f32 %v1056_v14, %v3469_v49 }
 0x3e7   : > { %v966_v17 = vpop.permute.xlu1 %965 }
 0x3e8   : > { %v971_v18 = vsel %vm969_vm2, %v960_v59, %v966_v17 }
 0x3e9   : > { %v975_v21 = vmul.f32 %v971_v18, %v954_v62 }
 0x3eb   : > { %v977_v23 = vadd.f32 %v975_v21, %v973_v20 }
 0x3ed   : > { %v978_v24 = vpack.c.bf16 %v977_v23, %v976_v22 }
 0x3ef   : > { %980 = vst.msk [vmem:[#allocation2] sm:$0xff] %vm979_vm3, %v978_v24 }
 0x43d   : > { %v1004_v28 = vpop.permute.xlu0 %1003 }
 0x43e   : > { %v1009_v33 = vadd.f32 %v1004_v28, %v997_v29 }
 0x441   : > { %v1035_v31 = vpop.permute.xlu0 %1034 }
 0x442   : > { %v1040_v39 = vadd.f32 %v1035_v31, %v1028_v35 }
 0x445   : > { %v1006_v32 = vpop.permute.xlu1 %1005  ;;  %v1066_v42 = vpop.permute.xlu0 %1065 }
 0x446   : > { %v1010_v34 = vadd.f32 %v1006_v32, %v998_v30  ;;  %v1071_v47 = vadd.f32 %v1066_v42, %v1059_v43 }
 0x448   : > { %v1011_v37 = vpack.c.bf16 %v1010_v34, %v1009_v33 }
 0x449   : > { %v1037_v38 = vpop.permute.xlu1 %1036 }
 0x44a   : > { %1013 = vst.msk [vmem:[#allocation2] sm:$0xff] %vm1012_vm4, %v1011_v37  ;;  %v1041_v41 = vadd.f32 %v1037_v38, %v1029_v36 }
 0x44c   : > { %v1042_v45 = vpack.c.bf16 %v1041_v41, %v1040_v39 }
 0x44d   : > { %v1068_v46 = vpop.permute.xlu1 %1067 }
 0x44e   : > { %1044 = vst.msk [vmem:[#allocation2] sm:$0xff] %vm1043_vm5, %v1042_v45  ;;  %v1072_v48 = vadd.f32 %v1068_v46, %v1060_v44 }
 0x450   : > { %v1073_v50 = vpack.c.bf16 %v1072_v48, %v1071_v47 }
 0x452   : > { %1075 = vst.msk [vmem:[#allocation2] sm:$0xff] %vm1074_vm6, %v1073_v50 }
 0x453 PF: > { %s3854_s12 = sld [smem:[#allocation26_spill]]  ;;  %vm1081_vm7 = vcmask 261120   ;;  %s3855_s11 = sld [smem:[#allocation31_spill]]  ;;  %v2973_v57 = vmov 0.0   ;;  %vm2974_vm8 = vmmov 0   ;;  %vm1189_vm9 = vcmask 31744  }
 0x454   : > { %2271 = vmatprep.subr.bf16.mxu0 %v2973_v57  ;;  %2275 = vmatprep.mubr.msk.bf16.mxu0 %vm2974_vm8, %v2973_v57  ;;  %v2182_v63 = vld [vmem:[#allocation13] ss:$0 sm:$0xff]  ;;  %v2183_v1 = vld [vmem:[#allocation14] ss:$0 sm:$0xff]  ;;  %s3856_s9 = sld [smem:[#allocation32_spill]]  ;;  %s2975_s24 = smov 108  }
 0x455   : > { %2279 = vmatprep.subr.bf16.mxu1 %v2973_v57  ;;  %2281 = vmatprep.mubr.msk.bf16.mxu1 %vm2974_vm8, %v2973_v57  ;;  %s2977_s30 = smov 116   ;;  %s2978_s3 = smov 100   ;;  %vm1204_vm10 = vcmask 64512   ;;  %vm1251_vm11 = vcmask 130048   ;;  %vm1442_vm12 = vcmask 130112   ;;  %vm1577_vm13 = vcmask 195712  }
 0x456   : > { %s3857_s6 = sld [smem:[#allocation47_spill]]  ;;  %s3858_s13 = sld [smem:[#allocation48_spill]]  ;;  %vm1712_vm14 = vcmask 261312   ;;  %vm1920_vm15 = vcmask 523264  }
 0x457   : > { %p3870_p3 = scmp.ne.s32.totalorder %s3839_s18, 0 }
 0x459   : > { %s3521_s20 = sshll.u32 %s3854_s12, 3  ;;  %v2559_v56 = vld [vmem:[%s3855_s11] sm:$0xff]   ;;  %v2560_v58 = vld [vmem:[%s3855_s11 + $0x8] sm:$0xff]   ;;  %s2980_s11 = smov 16  }
 0x45a   : > { %s1077_s19 = scalar_lea.vmem %s3441_s21, %s3521_s20  ;;  %2272 = vmatpush3.bf16.msra.mxu0 %v2559_v56  ;;  %v2184_v5 = vld [vmem:[%s3856_s9] ss:$0 sm:$0xff]  ;;  %s2979_s9 = smov 8  }
 0x45b   : > { %v3525_v51 = vld [vmem:[%s1077_s19] sm:$0xff]  ;;  %2273 = vmatprep.subr.bf16.mxu0 %v2973_v57  ;;  %s2976_s19 = smov 124   ;;  %s3859_s21 = sld [smem:[#allocation37_spill]] }
 0x45c   : > { %v1082_v40 = vsel %vm1081_vm7, %v3525_v51, 0.0  ;;  %s1177_s26 = scalar_lea.vmem %s3857_s6, %s3521_s20  ;;  %s1179_s15 = scalar_lea.vmem %s3858_s13, %s3521_s20  ;;  %v1325_v22 = vld [vmem:[#allocation2] sm:$0xff] }
 0x45d   : > { %1083 = vadd.xlane.f32.xlu0 %v1082_v40  ;;  %v1178_v11 = vld [vmem:[%s1177_s26] sm:$0xff]  ;;  %s2981_s13 = smov 24   ;;  %v1209_v23 = vsel %vm1204_vm10, %v1325_v22, 0  ;;  %s2983_s20 = smov 112  }
 0x45e   : > { %2274 = vmatpush3.bf16.msra.mxu0 %v2560_v58  ;;  %v1180_v13 = vld [vmem:[%s1179_s15] sm:$0xff]  ;;  %2280 = vmatpush3.bf16.xpose.msra.mxu1 %v1209_v23  ;;  %s2982_s15 = smov 120   ;;  %s3863_s26 = sld [smem:[#allocation27_spill]] }
 0x45f   : > { %2285 = vmatprep.subr.bf16.mxu0 %v2973_v57  ;;  %2291 = vmatprep.subr.bf16.mxu1 %v2973_v57  ;;  %s3865_s6 = sld [smem:[#allocation46_spill]] }
 0x4ea   : > { %v1084_v49 = vpop.xlane.xlu0 %1083 }
 0x4eb   : > { %v1086_v52 = vmul.f32 0.03125, %v1084_v49 }
 0x4ed   : > { %v1087_v53 = vsub.f32 %v3525_v51, %v1086_v52 }
 0x4ef   : > { %v1088_v54 = vmul.f32 %v1087_v53, %v1087_v53 }
 0x4f1   : > { %v1089_v55 = vsel %vm1081_vm7, %v1088_v54, 0.0 }
 0x4f2   : > { %1090 = vadd.xlane.f32.xlu0 %v1089_v55 }
 0x57f   : > { %v1091_v59 = vpop.xlane.xlu0 %1090 }
 0x580   : > { %v1092_v60 = vmul.f32 0.03125, %v1091_v59 }
 0x582   : > { %v1093_v61 = vadd.f32 1e-05, %v1092_v60 }
 0x584   : > { %2569 = vrsqrt.f32 %v1093_v61  ;;  %v1326_v61 = vld [vmem:[#allocation3] sm:$0xff] }
 0x58e   : > { %v2570_v62 = vpop.eup %2569 }
 0x58f   : > { %v1095_v0 = vmul.f32 %v2570_v62, %v1087_v53  ;;  %v2188_v62 = vld [vmem:[%s3409_s7] ss:$0 sm:$0xff] }
 0x591   : > { %v1102_v2 = vmul.f32 %v2182_v63, %v1095_v0 }
 0x593   : > { %v1109_v3 = vadd.f32 %v2183_v1, %v1102_v2 }
 0x595   : > { %v1110_v4 = vpack.c.bf16 %v1109_v3, %v1109_v3 }
 0x597   : > { %2276 = vmatmul.mubr.msk.bf16.vlgmr.msra.gmra.mrb[0].mxu0 %vm1081_vm7, %v1110_v4 }
 0x598   : > { %2287 = vmatprep.mubr.msk.bf16.mxu0 %vm2974_vm8, %v2973_v57  ;;  %2286 = vmatpush3.bf16.msra.mxu0 %v1326_v61 }
 0x599   : > { %2297 = vmatprep.subr.bf16.mxu0 %v2973_v57 }
 0x66a   : > { %v1171_v6 = vpop.f32.mrb[0].mxu0 }
 0x66b   : > { %v3551_v7 = vadd.f32 %v2184_v5, %v1171_v6  ;;  %v2277_v8 = vpop.f32.mrb[1].mxu0 }
 0x66c   : > { %v1174_v9 = vpop.f32.mrb[2].mxu0 }
 0x66d   : > { %1444 = vrot.lane.b32.xlu0 %v3551_v7, %s2975_s24  ;;  %1183 = vrot.lane.b32.xlu1 %v3551_v7, %s2976_s19  ;;  %v2278_v10 = vpop.f32.mrb[3].mxu0  ;;  %s2984_s19 = smov 4   ;;  %v1191_v45 = vmul.f32 %v1178_v11, %v3551_v7  ;;  %s3860_s24 = sld [smem:[#allocation43_spill]] }
 0x671   : > { %1308 = vrot.lane.b32.xlu1 %v3551_v7, %s2977_s30  ;;  %s2985_s30 = smov 104  }
 0x675   : > { %1579 = vrot.lane.b32.xlu1 %v3551_v7, %s2978_s3  ;;  %s2986_s3 = smov [#allocation19]  }
 0x676   : > { %s2819_s10 = sshll.u32 %s2986_s3, 4  ;;  %s2820_s10 = int_to_ptr.vmem [resolvable:$false] %s2819_s10 }
 0x679   : > { %1313 = vrot.lane.b32.xlu1 %v1178_v11, %s2979_s9 }
 0x6df   : > { %v1184_v12 = vpop.permute.xlu1 %1183  ;;  %v1445_v17 = vpop.permute.xlu0 %1444 }
 0x6e3   : > { %v1309_v14 = vpop.permute.xlu1 %1308 }
 0x6e4   : > { %v1311_v15 = vsel %vm1189_vm9, %v1309_v14, %v1184_v12  ;;  %v1447_v21 = vsel %vm1189_vm9, %v1445_v17, %v1309_v14 }
 0x6e5   : > { %v1317_v16 = vmul.f32 %v1311_v15, %v1180_v13  ;;  %v1452_v24 = vmul.f32 %v1447_v21, %v1180_v13 }
 0x6e7   : > { %1319 = vrot.lane.b32.xlu1 %v1317_v16, %s2979_s9  ;;  %v1580_v18 = vpop.permute.xlu1 %1579 }
 0x6e8   : > { %v1582_v19 = vsel %vm1189_vm9, %v1580_v18, %v1445_v17 }
 0x6e9   : > { %v1587_v20 = vmul.f32 %v1582_v19, %v1180_v13 }
 0x6eb   : > { %1448 = vrot.lane.b32.xlu1 %v1178_v11, %s2980_s11  ;;  %1589 = vrot.lane.b32.xlu0 %v1587_v20, %s2981_s13  ;;  %v1314_v25 = vpop.permute.xlu1 %1313 }
 0x6ec   : > { %v1316_v26 = vmul.f32 %v1314_v25, %v3551_v7 }
 0x6ef   : > { %1454 = vrot.lane.b32.xlu1 %v1452_v24, %s2980_s11  ;;  %1331 = vrot.lane.b32.xlu0 %v1325_v22, %s2982_s15 }
 0x6f3   : > { %1583 = vrot.lane.b32.xlu1 %v1178_v11, %s2981_s13  ;;  %1466 = vrot.lane.b32.xlu0 %v1325_v22, %s2983_s20 }
 0x6f7   : > { %1186 = vrot.lane.b32.xlu1 %v3551_v7, %s2984_s19  ;;  %1601 = vrot.lane.b32.xlu0 %v1325_v22, %s2985_s30  ;;  %s2214_s19 = sshll.u32 %s3863_s26, 1  ;;  %s3869_s26 = sand.u32 1, %s2917_s22  }
 0x6f8   : > { %s1978_s7 = sadd.s32 %s3854_s12, %s2214_s19  ;;  %s1967_s19 = scalar_lea.sflag [#allocation7], %s3869_s26 }
 0x759   : > { %v1320_v27 = vpop.permute.xlu1 %1319 }
 0x75a   : > { %v1322_v28 = vadd.f32 %v1320_v27, %v1316_v26 }
 0x75c   : > { %v1323_v29 = vmul.f32 0.35355338, %v1322_v28 }
 0x75d   : > { %v1449_v30 = vpop.permute.xlu1 %1448  ;;  %v1590_v39 = vpop.permute.xlu0 %1589 }
 0x75e   : > { %v1324_v31 = vpack.c.bf16 %v1323_v29, %v1323_v29  ;;  %v1451_v32 = vmul.f32 %v1449_v30, %v3551_v7 }
 0x760   : > { %1328 = vrot.lane.b32.xlu1 %v1324_v31, %s2982_s15 }
 0x761   : > { %v1455_v33 = vpop.permute.xlu1 %1454  ;;  %v1332_v50 = vpop.permute.xlu0 %1331 }
 0x762   : > { %v1457_v34 = vadd.f32 %v1455_v33, %v1451_v32  ;;  %v1337_v52 = vsel %vm1204_vm10, %v1332_v50, 0 }
 0x764   : > { %v1458_v35 = vmul.f32 0.35355338, %v1457_v34 }
 0x765   : > { %v1584_v36 = vpop.permute.xlu1 %1583  ;;  %v1467_v53 = vpop.permute.xlu0 %1466 }
 0x766   : > { %v1459_v37 = vpack.c.bf16 %v1458_v35, %v1458_v35  ;;  %v1586_v38 = vmul.f32 %v1584_v36, %v3551_v7  ;;  %v1472_v54 = vsel %vm1204_vm10, %v1467_v53, 0 }
 0x768   : > { %v1592_v41 = vadd.f32 %v1590_v39, %v1586_v38  ;;  %1463 = vrot.lane.b32.xlu1 %v1459_v37, %s2983_s20 }
 0x769   : > { %v1187_v42 = vpop.permute.xlu1 %1186  ;;  %v1602_v56 = vpop.permute.xlu0 %1601 }
 0x76a   : > { %v1593_v43 = vmul.f32 0.35355338, %v1592_v41  ;;  %v1190_v44 = vsel %vm1189_vm9, %v1184_v12, %v1187_v42  ;;  %v1607_v58 = vsel %vm1204_vm10, %v1602_v56, 0 }
 0x76b   : > { %v1192_v46 = vmul.f32 %v1190_v44, %v1180_v13 }
 0x76c   : > { %v1594_v47 = vpack.c.bf16 %v1593_v43, %v1593_v43 }
 0x76d   : > { %v1193_v48 = vadd.f32 %v1192_v46, %v1191_v45 }
 0x76e   : > { %1598 = vrot.lane.b32.xlu1 %v1594_v47, %s2985_s30 }
 0x76f   : > { %v1194_v40 = vmul.f32 0.35355338, %v1193_v48 }
 0x771   : > { %v1195_v49 = vpack.c.bf16 %v1194_v40, %v1194_v40 }
 0x773   : > { %2282 = vmatmul.mubr.msk.bf16.vlgmr.msra.gmra.mrb[0].mxu1 %vm1204_vm10, %v1195_v49 }
 0x774   : > { %2292 = vmatpush3.bf16.xpose.msra.mxu1 %v1337_v52  ;;  %2293 = vmatprep.mubr.msk.bf16.mxu1 %vm2974_vm8, %v2973_v57 }
 0x775   : > { %2303 = vmatprep.subr.bf16.mxu1 %v2973_v57 }
 0x7d2   : > { %v1329_v55 = vpop.permute.xlu1 %1328 }
 0x7d3   : > { %2294 = vmatmul.mubr.msk.bf16.vlgmr.msra.gmra.mrb[4].mxu1 %vm1204_vm10, %v1329_v55 }
 0x7d4   : > { %2304 = vmatpush3.bf16.xpose.msra.mxu1 %v1472_v54  ;;  %2305 = vmatprep.mubr.msk.bf16.mxu1 %vm2974_vm8, %v2973_v57 }
 0x7d5   : > { %2315 = vmatprep.subr.bf16.mxu1 %v2973_v57 }
 0x7da   : > { %v1464_v59 = vpop.permute.xlu1 %1463 }
 0x7db   : > { %2306 = vmatmul.mubr.msk.bf16.vlgmr.msra.gmra.mrb[8].mxu1 %vm1204_vm10, %v1464_v59 }
 0x7dc   : > { %2316 = vmatpush3.bf16.xpose.msra.mxu1 %v1607_v58  ;;  %2317 = vmatprep.mubr.msk.bf16.mxu1 %vm2974_vm8, %v2973_v57 }
 0x7dd   : > { %2327 = vmatprep.subr.bf16.mxu1 %v2973_v57 }
 0x7e0   : > { %v1599_v60 = vpop.permute.xlu1 %1598 }
 0x7e3   : > { %2318 = vmatmul.mubr.msk.bf16.vlgmr.msra.gmra.mrb[12].mxu1 %vm1204_vm10, %v1599_v60 }
 0x7e4   : > { %2331 = vmatprep.mubr.msk.bf16.mxu1 %vm2974_vm8, %v2973_v57 }
 0x846   : > { %v1245_v63 = vpop.f32.mrb[0].mxu1 }
 0x847   : > { %v1246_v0 = vadd.f32 %v2188_v62, %v1245_v63  ;;  %v2283_v1 = vpop.f32.mrb[1].mxu1 }
 0x848   : > { %v1248_v2 = vpop.f32.mrb[2].mxu1 }
 0x849   : > { %v2284_v3 = vpop.f32.mrb[3].mxu1  ;;  %v1252_v4 = vsel %vm1251_vm11, %v1246_v0, -inf }
 0x84a   : > { %1253 = vmax.xlane.f32.xlu0 %v1252_v4  ;;  %v2561_v4 = vld [vmem:[%s3859_s21] sm:$0xff]  }
 0x84b   : > { %2328 = vmatpush3.bf16.msra.mxu1 %v2561_v4 }
 0x84c   : > { %2329 = vmatprep.subr.bf16.mxu1 %v2973_v57 }
 0x8a6   : > { %v1373_v5 = vpop.f32.mrb[4].mxu1 }
 0x8a7   : > { %v1374_v6 = vadd.f32 %v2188_v62, %v1373_v5  ;;  %v2295_v7 = vpop.f32.mrb[5].mxu1 }
 0x8a8   : > { %v1376_v8 = vpop.f32.mrb[6].mxu1  ;;  %v2562_v7 = vld [vmem:[%s3859_s21 + $0x8] sm:$0xff]  }
 0x8a9   : > { %v2296_v9 = vpop.f32.mrb[7].mxu1  ;;  %v1379_v10 = vsel %vm1251_vm11, %v1374_v6, -inf  ;;  %2330 = vmatpush3.bf16.msra.mxu1 %v2562_v7 }
 0x8aa   : > { %1380 = vmax.xlane.f32.xlu1 %v1379_v10  ;;  %2343 = vmatprep.subr.bf16.mxu1 %v2973_v57 }
 0x8ae   : > { %v1508_v11 = vpop.f32.mrb[8].mxu1 }
 0x8af   : > { %v1509_v12 = vadd.f32 %v2188_v62, %v1508_v11  ;;  %v2307_v13 = vpop.f32.mrb[9].mxu1 }
 0x8b0   : > { %v1511_v14 = vpop.f32.mrb[10].mxu1 }
 0x8b1   : > { %v2308_v15 = vpop.f32.mrb[11].mxu1  ;;  %v1514_v16 = vsel %vm1251_vm11, %v1509_v12, -inf }
 0x8b2   : > { %1515 = vmax.xlane.f32.xlu0 %v1514_v16 }
 0x8b6   : > { %v1643_v17 = vpop.f32.mrb[12].mxu1 }
 0x8b7   : > { %v1644_v18 = vadd.f32 %v2188_v62, %v1643_v17  ;;  %v2319_v19 = vpop.f32.mrb[13].mxu1 }
 0x8b8   : > { %v1646_v20 = vpop.f32.mrb[14].mxu1 }
 0x8b9   : > { %v2320_v21 = vpop.f32.mrb[15].mxu1  ;;  %v1649_v22 = vsel %vm1251_vm11, %v1644_v18, -inf }
 0x8ba   : > { %1650 = vmax.xlane.f32.xlu0 %v1649_v22 }
 0x8bb   : > { %1390 = vrot.lane.b32.xlu1 %v1326_v61, %s2982_s15 }
 0x8bf   : > { %1660 = vrot.lane.b32.xlu1 %v1326_v61, %s2985_s30  ;;  %s3862_s30 = sld [smem:[#allocation45_spill]] }
 0x8d0   : > { %1525 = vrot.lane.b32.xlu0 %v1326_v61, %s2983_s20  ;;  %s3864_s20 = sld [smem:[#allocation44_spill]] }
 0x8d7   : > { %v1254_v23 = vpop.xlane.xlu0 %1253 }
 0x8d8   : > { %v1255_v24 = vsub.f32 %v1246_v0, %v1254_v23  ;;  %v2197_v23 = vld [vmem:[#allocation11] ss:$0 sm:$0xff] }
 0x8da   : > { %v1256_v25 = vmul.f32 1.442695, %v1255_v24 }
 0x8dc   : > { %2571 = vpow2.f32 %v1256_v25 }
 0x8e6   : > { %v2572_v26 = vpop.eup %2571 }
 0x8e7   : > { %v1261_v27 = vpack.c.bf16 %v2572_v26, %v2572_v26  ;;  %v1258_v43 = vsel %vm1251_vm11, %v2572_v26, 0.0 }
 0x8e9   : > { %2288 = vmatmul.mubr.msk.bf16.vlgmr.msra.gmra.mrb[4].mxu0 %vm1251_vm11, %v1261_v27 }
 0x8ea   : > { %2299 = vmatprep.mubr.msk.bf16.mxu0 %vm2974_vm8, %v2973_v57 }
 0x937   : > { %v1381_v28 = vpop.xlane.xlu1 %1380 }
 0x938   : > { %v1382_v29 = vsub.f32 %v1374_v6, %v1381_v28 }
 0x93a   : > { %v1383_v30 = vmul.f32 1.442695, %v1382_v29 }
 0x93b   : > { %v1391_v31 = vpop.permute.xlu1 %1390 }
 0x93c   : > { %2573 = vpow2.f32 %v1383_v30  ;;  %2298 = vmatpush3.bf16.msra.mxu0 %v1391_v31 }
 0x93d   : > { %2309 = vmatprep.subr.bf16.mxu0 %v2973_v57 }
 0x93f   : > { %v1516_v32 = vpop.xlane.xlu0 %1515  ;;  %v1661_v47 = vpop.permute.xlu1 %1660 }
 0x940   : > { %v1517_v33 = vsub.f32 %v1509_v12, %v1516_v32 }
 0x942   : > { %v1518_v34 = vmul.f32 1.442695, %v1517_v33 }
 0x944   : > { %2575 = vpow2.f32 %v1518_v34 }
 0x946   : > { %v2574_v35 = vpop.eup %2573 }
 0x947   : > { %v1651_v36 = vpop.xlane.xlu0 %1650  ;;  %v1385_v37 = vsel %vm1251_vm11, %v2574_v35, 0.0  ;;  %v1388_v38 = vpack.c.bf16 %v2574_v35, %v2574_v35 }
 0x948   : > { %v1652_v39 = vsub.f32 %v1644_v18, %v1651_v36  ;;  %1386 = vadd.xlane.f32.xlu1 %v1385_v37  ;;  %v2563_v36 = vld [vmem:[%s3860_s24] sm:$0xff]  }
 0x949   : > { %2300 = vmatmul.mubr.msk.bf16.vlgmr.msra.gmra.mrb[8].mxu0 %vm1251_vm11, %v1388_v38  ;;  %v2565_v37 = vld [vmem:[%s3862_s30] sm:$0xff]   ;;  %v2566_v38 = vld [vmem:[%s3862_s30 + $0x8] sm:$0xff]  }
 0x94a   : > { %v1653_v41 = vmul.f32 1.442695, %v1652_v39  ;;  %2311 = vmatprep.mubr.msk.bf16.mxu0 %vm2974_vm8, %v2973_v57 }
 0x94b   : > { %v1526_v42 = vpop.permute.xlu0 %1525 }
 0x94c   : > { %2577 = vpow2.f32 %v1653_v41  ;;  %1259 = vadd.xlane.f32.xlu1 %v1258_v43  ;;  %2310 = vmatpush3.bf16.msra.mxu0 %v1526_v42 }
 0x94d   : > { %2321 = vmatprep.subr.bf16.mxu0 %v2973_v57 }
 0x94e   : > { %v2576_v44 = vpop.eup %2575 }
 0x94f   : > { %v1520_v45 = vsel %vm1251_vm11, %v2576_v44, 0.0  ;;  %v1523_v46 = vpack.c.bf16 %v2576_v44, %v2576_v44  ;;  %v2201_v44 = vld [vmem:[#allocation16] ss:$0 sm:$0xff] }
 0x950   : > { %1521 = vadd.xlane.f32.xlu0 %v1520_v45 }
 0x951   : > { %2312 = vmatmul.mubr.msk.bf16.vlgmr.msra.gmra.mrb[12].mxu0 %vm1251_vm11, %v1523_v46  ;;  %v2202_v46 = vld [vmem:[#allocation17] ss:$0 sm:$0xff] }
 0x952   : > { %2322 = vmatpush3.bf16.msra.mxu0 %v1661_v47  ;;  %2323 = vmatprep.mubr.msk.bf16.mxu0 %vm2974_vm8, %v2973_v57 }
 0x953   : > { %2335 = vmatprep.subr.bf16.mxu0 %v2973_v57 }
 0x956   : > { %v2578_v48 = vpop.eup %2577 }
 0x957   : > { %v1655_v50 = vsel %vm1251_vm11, %v2578_v48, 0.0  ;;  %v1658_v40 = vpack.c.bf16 %v2578_v48, %v2578_v48 }
 0x958   : > { %1656 = vadd.xlane.f32.xlu0 %v1655_v50 }
 0x959   : > { %2324 = vmatmul.mubr.msk.bf16.vlgmr.msra.gmra.mrb[16].mxu0 %vm1251_vm11, %v1658_v40  ;;  %v2567_v40 = vld [vmem:[%s3862_s30 + $0x10] sm:$0xff]  }
 0x95a   : > { %2339 = vmatprep.mubr.msk.bf16.mxu0 %vm2974_vm8, %v2973_v57  ;;  %2336 = vmatpush3.bf16.msra.mxu0 %v2563_v36 }
 0x95b   : > { %2337 = vmatprep.subr.bf16.mxu0 %v2973_v57 }
 0x9bc   : > { %v1299_v49 = vpop.f32.mrb[4].mxu0 }
 0x9bd   : > { %v2289_v52 = vpop.f32.mrb[5].mxu0 }
 0x9be   : > { %v1302_v53 = vpop.f32.mrb[6].mxu0  ;;  %v2203_v52 = vld [vmem:[%s3864_s20] ss:$0 sm:$0xff] }
 0x9bf   : > { %v2290_v54 = vpop.f32.mrb[7].mxu0 }
 0x9d5   : > { %v1387_v55 = vpop.xlane.xlu1 %1386 }
 0x9d9   : > { %v1260_v56 = vpop.xlane.xlu1 %1259 }
 0x9da   : > { %2579 = vrcp.f32 %v1260_v56 }
 0x9db   : > { %2581 = vrcp.f32 %v1387_v55 }
 0x9dd   : > { %v1522_v60 = vpop.xlane.xlu0 %1521 }
 0x9de   : > { %2583 = vrcp.f32 %v1522_v60 }
 0x9e4   : > { %v2580_v58 = vpop.eup %2579 }
 0x9e5   : > { %v1306_v59 = vmul.f32 %v2580_v58, %v1299_v49  ;;  %v2582_v61 = vpop.eup %2581  ;;  %v1657_v2 = vpop.xlane.xlu0 %1656  ;;  %v2568_v49 = vld [vmem:[%s3862_s30 + $0x18] sm:$0xff]  }
 0x9e6   : > { %2585 = vrcp.f32 %v1657_v2 }
 0x9e7   : > { %1307 = vst.msk [vmem:[#allocation4] sm:$0xff] %vm1204_vm10, %v1306_v59 }
 0x9e8   : > { %v2584_v5 = vpop.eup %2583 }
 0x9f0   : > { %v2586_v12 = vpop.eup %2585 }
 0xa1c   : > { %v1430_v62 = vpop.f32.mrb[8].mxu0 }
 0xa1d   : > { %v1437_v63 = vmul.f32 %v2582_v61, %v1430_v62  ;;  %v2301_v0 = vpop.f32.mrb[9].mxu0 }
 0xa1e   : > { %v1433_v1 = vpop.f32.mrb[10].mxu0 }
 0xa1f   : > { %1439 = vrot.lane.b32.xlu0 %v1437_v63, %s2979_s9  ;;  %v2302_v3 = vpop.f32.mrb[11].mxu0  ;;  %s2215_s9 = sshll.u32 %s1978_s7, 7 }
 0xa24   : > { %v1565_v6 = vpop.f32.mrb[12].mxu0 }
 0xa25   : > { %v1572_v8 = vmul.f32 %v2584_v5, %v1565_v6  ;;  %v2313_v9 = vpop.f32.mrb[13].mxu0 }
 0xa26   : > { %v1568_v10 = vpop.f32.mrb[14].mxu0 }
 0xa27   : > { %1574 = vrot.lane.b32.xlu1 %v1572_v8, %s2980_s11  ;;  %v2314_v11 = vpop.f32.mrb[15].mxu0  ;;  %s3861_s11 = smov %s3860_s24  ;;  %s3866_s24 = scalar_lea.vmem [#allocation19], %s3435_s0 }
 0xa28   : > { %s3868_s12 = smov %s3866_s24 }
 0xa2c   : > { %v1700_v13 = vpop.f32.mrb[16].mxu0 }
 0xa2d   : > { %v1707_v14 = vmul.f32 %v2586_v12, %v1700_v13  ;;  %v2325_v15 = vpop.f32.mrb[17].mxu0 }
 0xa2e   : > { %v1703_v16 = vpop.f32.mrb[18].mxu0 }
 0xa2f   : > { %1709 = vrot.lane.b32.xlu1 %v1707_v14, %s2981_s13  ;;  %v2326_v17 = vpop.f32.mrb[19].mxu0  ;;  %s1982_s13 = sshll.u32 %s3866_s24, 4  ;;  %s3690_s13 = int_to_ptr.vmem [resolvable:$true] %s1982_s13 }
 0xa30   : > { %s2815_s7 = scalar_lea.vmem %s3690_s13, 128  ;;  %p2822_p6 = scmp.lt.s32.totalorder %s3690_s13, %s2820_s10 }
 0xa31   : > { %p2816_p5 = scmp.ne.s32.totalorder %s3690_s13, %s2815_s7 }
 0xa33   : > { %p2817_p2 = pnand %p2816_p5, %p3870_p3 }
 0xa35   : > { %p2818_p7 = pneg %p2817_p2 }
 0xa91   : > { %v1440_v18 = vpop.permute.xlu0 %1439 }
 0xa92   : > { %1443 = vst.msk [vmem:[#allocation4] sm:$0xff] %vm1442_vm12, %v1440_v18 }
 0xa99   : > { %v1575_v19 = vpop.permute.xlu1 %1574 }
 0xa9a   : > { %1578 = vst.msk [vmem:[#allocation4] sm:$0xff] %vm1577_vm13, %v1575_v19 }
 0xaa1   : > { %v1710_v20 = vpop.permute.xlu1 %1709 }
 0xaa2   : > { %1713 = vst.msk [vmem:[#allocation4] sm:$0xff] %vm1712_vm14, %v1710_v20 }
 0xaa9   : > { %v1714_v21 = vld [vmem:[#allocation4] sm:$0xff] }
 0xaaa   : > { %v1715_v22 = vpack.c.bf16 %v1714_v21, %v1714_v21 }
 0xaac   : > { %2332 = vmatmul.mubr.msk.bf16.vlgmr.msra.gmra.mrb[16].mxu1 %vm1081_vm7, %v1715_v22 }
 0xaad   : > { %2351 = vmatprep.mubr.msk.bf16.mxu1 %vm2974_vm8, %v2973_v57  ;;  %2344 = vmatpush3.bf16.msra.mxu1 %v2565_v37 }
 0xaae   : > { %2345 = vmatprep.subr.bf16.mxu1 %v2973_v57 }
 0xab1   : > { %2346 = vmatpush3.bf16.msra.mxu1 %v2566_v38 }
 0xab2   : > { %2347 = vmatprep.subr.bf16.mxu1 %v2973_v57 }
 0xab5   : > { %2348 = vmatpush3.bf16.msra.mxu1 %v2567_v40 }
 0xab6   : > { %2349 = vmatprep.subr.bf16.mxu1 %v2973_v57  ;;  %v2207_v57 = vld [vmem:[%s3865_s6] ss:$0 sm:$0xff]  ;;  %s2821_s6 = scalar_lea.vmem %s2820_s10, 256 }
 0xab7   : > { %p2823_p1 = scmp.lt.s32.totalorder %s2821_s6, %s2815_s7 }
 0xab9   : > { %2350 = vmatpush3.bf16.msra.mxu1 %v2568_v49  ;;  %p2824_p11 = por %p2823_p1, %p2822_p6 }
 0xabb   : > { %p2825_p9 = pnand %p2824_p11, %p2818_p7 }
 0xb7f   : > { %v1776_v24 = vpop.f32.mrb[16].mxu1 }
 0xb80   : > { %v1777_v25 = vadd.f32 %v2197_v23, %v1776_v24  ;;  %v2333_v26 = vpop.f32.mrb[17].mxu1 }
 0xb81   : > { %v1779_v27 = vpop.f32.mrb[18].mxu1 }
 0xb82   : > { %v1782_v28 = vadd.f32 %v1777_v25, %v3525_v51  ;;  %v2334_v29 = vpop.f32.mrb[19].mxu1  ;;  %v2564_v51 = vld [vmem:[%s3861_s11 + $0x8] sm:$0xff]   ;;  %s3867_s11 = sld [smem:[#allocation49_spill]] }
 0xb83   : > { %2338 = vmatpush3.bf16.msra.mxu0 %v2564_v51 }
 0xb84   : > { %v1785_v30 = vsel %vm1081_vm7, %v1782_v28, 0.0 }
 0xb85   : > { %1786 = vadd.xlane.f32.xlu0 %v1785_v30 }
 0xb88   : > { %s3688_s17 = scalar_lea.hbm %s3867_s11, %s2215_s9 }
 0xc12   : > { %v1787_v31 = vpop.xlane.xlu0 %1786 }
 0xc13   : > { %v1788_v32 = vmul.f32 0.03125, %v1787_v31 }
 0xc15   : > { %v1789_v33 = vsub.f32 %v1782_v28, %v1788_v32 }
 0xc17   : > { %v1790_v34 = vmul.f32 %v1789_v33, %v1789_v33 }
 0xc19   : > { %v1791_v35 = vsel %vm1081_vm7, %v1790_v34, 0.0 }
 0xc1a   : > { %1792 = vadd.xlane.f32.xlu1 %v1791_v35 }
 0xca7   : > { %v1793_v39 = vpop.xlane.xlu1 %1792 }
 0xca8   : > { %v1794_v41 = vmul.f32 0.03125, %v1793_v39 }
 0xcaa   : > { %v1795_v42 = vadd.f32 1e-05, %v1794_v41 }
 0xcac   : > { %2587 = vrsqrt.f32 %v1795_v42 }
 0xcb6   : > { %v2588_v43 = vpop.eup %2587 }
 0xcb7   : > { %v1797_v45 = vmul.f32 %v2588_v43, %v1789_v33 }
 0xcb9   : > { %v1804_v47 = vmul.f32 %v2201_v44, %v1797_v45 }
 0xcbb   : > { %v1811_v48 = vadd.f32 %v2202_v46, %v1804_v47 }
 0xcbd   : > { %v1812_v50 = vpack.c.bf16 %v1811_v48, %v1811_v48 }
 0xcbf   : > { %2340 = vmatmul.mubr.msk.bf16.vlgmr.msra.gmra.mrb[20].mxu0 %vm1081_vm7, %v1812_v50 }
 0xd92   : > { %v1873_v53 = vpop.f32.mrb[20].mxu0 }
 0xd93   : > { %v1874_v54 = vadd.f32 %v2203_v52, %v1873_v53  ;;  %v2341_v55 = vpop.f32.mrb[21].mxu0 }
 0xd94   : > { %v1876_v56 = vpop.f32.mrb[22].mxu0 }
 0xd95   : > { %v1879_v58 = vmax.f32 %v1874_v54, 0.0  ;;  %v2342_v59 = vpop.f32.mrb[23].mxu0 }
 0xd97   : > { %v1880_v60 = vpack.c.bf16 %v1879_v58, %v1879_v58 }
 0xd99   : > { %2352 = vmatmul.mubr.msk.bf16.vlgmr.msra.gmra.mrb[20].mxu1 %vm1920_vm15, %v1880_v60 }
 0xe6c   : > { %v1958_v61 = vpop.f32.mrb[20].mxu1 }
 0xe6d   : > { %v1959_v62 = vadd.f32 %v2207_v57, %v1958_v61  ;;  %v2353_v63 = vpop.f32.mrb[21].mxu1 }
 0xe6e   : > { %v1961_v0 = vpop.f32.mrb[22].mxu1 }
 0xe6f   : > { %v1964_v1 = vadd.f32 %v1959_v62, %v1782_v28  ;;  %v2354_v2 = vpop.f32.mrb[23].mxu1 }
 0xe71   : > { %1965 = vst.msk [vmem:[%s3868_s12] sm:$0xff] %vm1081_vm7, %v1964_v1 }
 0xe72   : > { %2828 = shalt.err (!%p2825_p9)
}
 0xe73   : > { %s2829_s0 = scalar_lea.hbm %s3688_s17, 128  ;;  %s2833_s15 = scalar_lea.hbm %s3867_s11, 512 }
 0xe74   : > { %p2830_p13 = scmp.ne.s32.totalorder %s3688_s17, %s2829_s0  ;;  %p2834_p4 = scmp.lt.u32.totalorder %s3688_s17, %s3867_s11 }
 0xe75   : > { %p2835_p10 = scmp.lt.u32.totalorder %s2833_s15, %s2829_s0  ;;  %p2837_p5 = scmp.lt.u32.totalorder %s2829_s0, %s3688_s17 }
 0xe76   : > { %p2831_p0 = pnand %p2830_p13, %p3870_p3 }
 0xe77   : > { %p2836_p8 = por %p2835_p10, %p2834_p4 }
 0xe78   : > { %p2832_p12 = pneg %p2831_p0 }
 0xe79   : > { %p2838_p2 = por %p2837_p5, %p2836_p8 }
 0xe7b   : > { %p2839_p7 = pnand %p2838_p2, %p2832_p12 }
 0xe7d   : > { %2842 = shalt.err (!%p2839_p7)
}
 0xe7e   : > { %2385 = dma.vmem_to_hbm [thread:$0]  (%p3870_p3), %s3690_s13, 128, %s3688_s17, %s1967_s19  }
 0xe7f PF: > { %p2432_p6 = scmp.ge.s32.totalorder %s2953_s4, 2  ;;  %s1994_s26 = sand.u32 1, %s2913_s1  }
 0xe80   : > { %p3871_p1 = scmp.ne.s32.totalorder %s3840_s14, 0  ;;  %s1995_s7 = scalar_lea.sflag [#allocation7], %s1994_s26 }
 0xe82   : > { %p2414_p11 = pnand %p2432_p6, %p3871_p1 }
 0xe84   : > { %2908 = dma.done.wait (!%p2414_p11), %s1995_s7, 128  }
 0xe85   : > { %2910 = vsyncadd (!%p2414_p11), %s1995_s7, 4294967168  ;;  %s40_s4 = sadd.s32 1, %s2953_s4   ;;  %s3872_s1 = smov %s2917_s22 }
 0xe86   : > { %p37_p9 = scmp.ge.s32.totalorder %s40_s4, 6   ;;  %s3873_s22 = smov %s2921_s23 }
 0xe87   : > { %s3874_s23 = smov %s3359_s5  ;;  %s3875_s24 = smov %s2929_s2 }
 0xe88   : > { %s3876_s2 = smov %s2933_s25  ;;  %s3877_s25 = smov %s3356_s16 }
 0xe89   : > { %s3878_s3 = smov %s2945_s27  ;;  %s3879_s26 = smov %s2949_s28 }
 0xe8a   : > { %s3880_s27 = smov %s3883_s29  ;;  %s3881_s28 = smov %s3887_s8 }
 0xe8b   :  { %39 = sbr.rel (!%p37_p9) target bundleno = 35 (0x23), region = 183 }
 0xe92   :  { %2000 = vsyncpa [#allocation6], 1 }
 0xe93   :  { %2002 = vsyncpa [#allocation6 + $0x1], 1 }
 0xe94   :  { %2003 = vsyncpa [#allocation9], 1 }
 0xe95   :  { %2004 = vsyncpa [#allocation12], 1 }
 0xe96   :  { %2005 = vsyncpa [#allocation15], 1 }
 0xe97   :  { %2006 = vsyncpa [#allocation18], 1 }
 0xe98   :  { %2007 = vsyncpa [#allocation7], 1 }
 0xe99   :  { %2009 = vsyncpa [#allocation7 + $0x1], 1 }

// kernel: tpu_custom_call.1
= control target key start
LH: loop header
LB: loop body
LE: loop exit
PB: predicated region body
PF: predicated region fallthrough
CT: control target
= control target key end

     0   :  { %s3755_s0 = inlined_call_operand.vmem [shape: f32[2,16,32], index: 0, kind: input, shape index: {}]   ;;  %s3756_s1 = inlined_call_operand.hbm [shape: f32[2,1,16], index: 1, kind: input, shape index: {}]   ;;  %s3757_s2 = inlined_call_operand.vmem [shape: bf16[32,32], index: 2, kind: input, shape index: {}]   ;;  %s3758_s3 = inlined_call_operand.vmem [shape: f32[1,32], index: 3, kind: input, shape index: {}]   ;;  %s3759_s4 = inlined_call_operand.vmem [shape: bf16[32,32], index: 4, kind: input, shape index: {}]   ;;  %s3760_s5 = inlined_call_operand.hbm [shape: f32[1,32], index: 5, kind: input, shape index: {}]   ;;  %s3761_s6 = inlined_call_operand.vmem [shape: bf16[32,32], index: 6, kind: input, shape index: {}]   ;;  %s3762_s7 = inlined_call_operand.hbm [shape: f32[1,32], index: 7, kind: input, shape index: {}]   ;;  %s3763_s8 = inlined_call_operand.vmem [shape: bf16[32,32], index: 8, kind: input, shape index: {}]   ;;  %s3764_s9 = inlined_call_operand.hbm [shape: f32[1,32], index: 9, kind: input, shape index: {}]   ;;  %s3765_s10 = inlined_call_operand.hbm [shape: f32[1,32], index: 10, kind: input, shape index: {}]   ;;  %s3766_s11 = inlined_call_operand.hbm [shape: f32[1,32], index: 11, kind: input, shape index: {}]   ;;  %s3767_s12 = inlined_call_operand.hbm [shape: f32[1,32], index: 12, kind: input, shape index: {}]   ;;  %s3768_s13 = inlined_call_operand.hbm [shape: f32[1,32], index: 13, kind: input, shape index: {}]   ;;  %s3769_s14 = inlined_call_operand.vmem [shape: bf16[32,64], index: 14, kind: input, shape index: {}]   ;;  %s3770_s15 = inlined_call_operand.vmem [shape: f32[1,64], index: 15, kind: input, shape index: {}]   ;;  %s3771_s16 = inlined_call_operand.vmem [shape: bf16[64,32], index: 16, kind: input, shape index: {}]   ;;  %s3772_s17 = inlined_call_operand.vmem [shape: f32[1,32], index: 17, kind: input, shape index: {}]   ;;  %s3773_s18 = inlined_call_operand.vmem [shape: f32[16,8], index: 18, kind: input, shape index: {}]   ;;  %s3774_s19 = inlined_call_operand.vmem [shape: f32[16,8], index: 19, kind: input, shape index: {}]   ;;  %s3775_s20 = inlined_call_operand.hbm [shape: f32[2,16,32], index: 20, kind: output, shape index: {}]  }
   0x1   :  { %3800 = sst [smem:[#allocation29_spill]] %s3755_s0 }
   0x2   :  { %3801 = sst [smem:[#allocation30_spill]] %s3756_s1 }
   0x3   :  { %3802 = sst [smem:[#allocation31_spill]] %s3757_s2 }
   0x4   :  { %3803 = sst [smem:[#allocation32_spill]] %s3758_s3 }
   0x5   :  { %3804 = sst [smem:[#allocation33_spill]] %s3759_s4 }
   0x6   :  { %3805 = sst [smem:[#allocation34_spill]] %s3760_s5 }
   0x7   :  { %3806 = sst [smem:[#allocation35_spill]] %s3761_s6 }
   0x8   :  { %3807 = sst [smem:[#allocation36_spill]] %s3762_s7 }
   0x9   :  { %3808 = sst [smem:[#allocation37_spill]] %s3763_s8 }
   0xa   :  { %3809 = sst [smem:[#allocation38_spill]] %s3764_s9 }
   0xb   :  { %3810 = sst [smem:[#allocation39_spill]] %s3765_s10 }
   0xc   :  { %3811 = sst [smem:[#allocation40_spill]] %s3766_s11 }
   0xd   :  { %3812 = sst [smem:[#allocation41_spill]] %s3767_s12 }
   0xe   :  { %3813 = sst [smem:[#allocation42_spill]] %s3768_s13 }
   0xf   :  { %3814 = sst [smem:[#allocation43_spill]] %s3769_s14 }
  0x10   :  { %3815 = sst [smem:[#allocation44_spill]] %s3770_s15 }
  0x11   :  { %3816 = sst [smem:[#allocation45_spill]] %s3771_s16 }
  0x12   :  { %3817 = sst [smem:[#allocation46_spill]] %s3772_s17 }
  0x13   :  { %3818 = sst [smem:[#allocation47_spill]] %s3773_s18 }
  0x14   :  { %3819 = sst [smem:[#allocation48_spill]] %s3774_s19 }
  0x15   :  { %3820 = sst [smem:[#allocation49_spill]] %s3775_s20 }
  0x16   :  { %25 = vsyncpa [#allocation6], 0 }
  0x17   :  { %27 = vsyncpa [#allocation6 + $0x1], 0 }
  0x18   :  { %28 = vsyncpa [#allocation9], 0 }
  0x19   :  { %29 = vsyncpa [#allocation12], 0 }
  0x1a   :  { %30 = vsyncpa [#allocation15], 0 }
  0x1b   :  { %31 = vsyncpa [#allocation18], 0 }
  0x1c   :  { %32 = vsyncpa [#allocation7], 0 }
  0x1d   :  { %34 = vsyncpa [#allocation7 + $0x1], 0  ;;  %s3092_s1 = smov 0   ;;  %s3094_s22 = smov 0  }
  0x1e   :  { %s3096_s23 = smov 0   ;;  %s3098_s24 = smov 0  }
  0x1f   :  { %s3100_s2 = smov 0   ;;  %s3102_s25 = smov 0  }
  0x20   :  { %s3104_s3 = smov 0   ;;  %s3106_s26 = smov 0  }
  0x21   :  { %s3108_s27 = smov 0   ;;  %s3110_s28 = smov 0  }
  0x22   :  { %s3112_s4 = smov 0  }
  0x23 LB: > { %3821 = sst [smem:[#allocation26_spill]] %s2937_s3  ;;  %s3780_s29 = sadd.s32 4294967295, %s2953_s4   ;;  %s2953_s4 = sphi %s3112_s4, %s40_s4   ;;  %s2949_s28 = sphi %s3110_s28, %s3881_s28   ;;  %s2945_s27 = sphi %s3108_s27, %s3880_s27   ;;  %s2941_s26 = sphi %s3106_s26, %s3879_s26   ;;  %s2937_s3 = sphi %s3104_s3, %s3878_s3   ;;  %s2933_s25 = sphi %s3102_s25, %s3877_s25   ;;  %s2929_s2 = sphi %s3100_s2, %s3876_s2   ;;  %s2925_s24 = sphi %s3098_s24, %s3875_s24   ;;  %s2921_s23 = sphi %s3096_s23, %s3874_s23   ;;  %s2917_s22 = sphi %s3094_s22, %s3873_s22   ;;  %s2913_s1 = sphi %s3092_s1, %s3872_s1  }
  0x24   : > { %3822 = sst [smem:[#allocation27_spill]] %s2941_s26  ;;  %p2149_p0 = scmp.ge.s32.totalorder %s2953_s4, 1 }
  0x25   : > { %p3151_p1 = scmp.eq.s32.totalorder %s3780_s29, 0  ;;  %p515_p2 = scmp.lt.s32.totalorder %s2953_s4, 5 }
  0x26   : > { %s2955_s21 = smov [#allocation8]   ;;  %s2956_s17 = smov [#allocation11]  }
  0x27   : > { %s3823_s30 = scalar_select %p3151_p1, 1, 0 }
  0x28   : > { %p3156_p3 = pnand %p2149_p0, %p515_p2  ;;  %s537_s20 = sshll.u32 %s2955_s21, 4  ;;  %s538_s20 = int_to_ptr.vmem [resolvable:$true] %s537_s20 }
  0x29   : > { %s565_s15 = sshll.u32 %s2956_s17, 4  ;;  %s2957_s16 = smov [#allocation14]   ;;  %s3168_s15 = int_to_ptr.vmem [resolvable:$true] %s565_s15 }
  0x2a   : > { %s3824_s0 = scalar_select %p3156_p3, 1, 0 }
  0x2b   : > { %p2387_p4 = pneg %p3156_p3  ;;  %s587_s14 = sshll.u32 %s2957_s16, 4  ;;  %s3170_s14 = int_to_ptr.vmem [resolvable:$true] %s587_s14 }
  0x2c   : > { %3825 = sst [smem:[#allocation28_spill]] %s3824_s0  ;;  %s3827_s5 = sld [smem:[#allocation34_spill]] }
  0x2d   : > { %p3164_p5 = pnand %p2387_p4, %p3151_p1 }
  0x2f   : > { %p3180_p7 = pneg %p3164_p5 }
  0x32   : > { %s2589_s21 = scalar_lea.hbm %s3827_s5, 16 }
  0x33   : > { %p2590_p6 = scmp.ne.s32.totalorder %s3827_s5, %s2589_s21  ;;  %p2596_p10 = scmp.lt.u32.totalorder %s2589_s21, %s3827_s5 }
  0x35   : > { %p2592_p8 = pnand %p3180_p7, %p2590_p6 }
  0x37   : > { %p2593_p9 = pneg %p2592_p8 }
  0x39   : > { %p2598_p11 = pnand %p2596_p10, %p2593_p9 }
  0x3b   : > { %2601 = shalt.err (!%p2598_p11)
}
  0x3c   : > { %s2602_s8 = scalar_lea.vmem %s538_s20, 16  ;;  %s2609_s6 = scalar_lea.vmem %s538_s20, 32 }
  0x3d   : > { %p2603_p12 = scmp.ne.s32.totalorder %s538_s20, %s2602_s8  ;;  %p2610_p2 = scmp.lt.s32.totalorder %s538_s20, %s538_s20 }
  0x3e   : > { %p2611_p4 = scmp.lt.s32.totalorder %s2609_s6, %s2602_s8 }
  0x3f   : > { %p2605_p13 = pnand %p2603_p12, %p3180_p7 }
  0x40   : > { %p2612_p3 = por %p2611_p4, %p2610_p2 }
  0x41   : > { %p2606_p0 = pneg %p2605_p13 }
  0x43   : > { %p2613_p1 = pnand %p2612_p3, %p2606_p0 }
  0x45   : > { %2616 = shalt.err (!%p2613_p1)
}
  0x46   : > { %2390 = dma.hbm_to_vmem [thread:$0]  (!%p3164_p5), %s3827_s5, 16, %s538_s20, [#allocation9]  }
  0x47   : > { %s3829_s9 = sld [smem:[#allocation38_spill]] }
  0x4d   : > { %s2617_s16 = scalar_lea.hbm %s3829_s9, 16 }
  0x4e   : > { %p2618_p6 = scmp.ne.s32.totalorder %s3829_s9, %s2617_s16  ;;  %p2624_p1 = scmp.lt.u32.totalorder %s2617_s16, %s3829_s9 }
  0x50   : > { %p2620_p8 = pnand %p2618_p6, %p3180_p7 }
  0x52   : > { %p2621_p9 = pneg %p2620_p8 }
  0x54   : > { %p2626_p3 = pnand %p2624_p1, %p2621_p9 }
  0x56   : > { %2629 = shalt.err (!%p2626_p3)
}
  0x57   : > { %s2630_s20 = scalar_lea.vmem %s3168_s15, 16  ;;  %s2637_s26 = scalar_lea.vmem %s3168_s15, 32 }
  0x58   : > { %p2631_p10 = scmp.ne.s32.totalorder %s3168_s15, %s2630_s20  ;;  %p2638_p13 = scmp.lt.s32.totalorder %s3168_s15, %s3168_s15 }
  0x59   : > { %p2639_p0 = scmp.lt.s32.totalorder %s2637_s26, %s2630_s20 }
  0x5a   : > { %p2633_p11 = pnand %p2631_p10, %p3180_p7 }
  0x5b   : > { %p2640_p2 = por %p2639_p0, %p2638_p13 }
  0x5c   : > { %p2634_p12 = pneg %p2633_p11 }
  0x5e   : > { %p2641_p4 = pnand %p2640_p2, %p2634_p12 }
  0x60   : > { %2644 = shalt.err (!%p2641_p4)
}
  0x61   : > { %2396 = dma.hbm_to_vmem [thread:$0]  (!%p3164_p5), %s3829_s9, 16, %s3168_s15, [#allocation12]  }
  0x62   : > { %s3830_s11 = sld [smem:[#allocation40_spill]] }
  0x68   : > { %s2645_s21 = scalar_lea.hbm %s3830_s11, 16 }
  0x69   : > { %p2646_p6 = scmp.ne.s32.totalorder %s3830_s11, %s2645_s21  ;;  %p2652_p1 = scmp.lt.u32.totalorder %s2645_s21, %s3830_s11 }
  0x6b   : > { %p2648_p8 = pnand %p2646_p6, %p3180_p7 }
  0x6d   : > { %p2649_p9 = pneg %p2648_p8 }
  0x6f   : > { %p2654_p3 = pnand %p2652_p1, %p2649_p9 }
  0x71   : > { %2657 = shalt.err (!%p2654_p3)
}
  0x72   : > { %s2658_s15 = scalar_lea.vmem %s3170_s14, 16  ;;  %s2665_s26 = scalar_lea.vmem %s3170_s14, 32 }
  0x73   : > { %p2659_p10 = scmp.ne.s32.totalorder %s3170_s14, %s2658_s15  ;;  %p2666_p13 = scmp.lt.s32.totalorder %s3170_s14, %s3170_s14 }
  0x74   : > { %p2667_p0 = scmp.lt.s32.totalorder %s2665_s26, %s2658_s15 }
  0x75   : > { %p2661_p11 = pnand %p2659_p10, %p3180_p7 }
  0x76   : > { %p2668_p2 = por %p2667_p0, %p2666_p13 }
  0x77   : > { %p2662_p12 = pneg %p2661_p11 }
  0x79   : > { %p2669_p4 = pnand %p2668_p2, %p2662_p12 }
  0x7b   : > { %2672 = shalt.err (!%p2669_p4)
}
  0x7c   : > { %2402 = dma.hbm_to_vmem [thread:$0]  (!%p3164_p5), %s3830_s11, 16, %s3170_s14, [#allocation15]  }
  0x7d   : > { %s2958_s19 = smov [#allocation10]   ;;  %s2959_s21 = smov [#allocation13]  }
  0x7e   : > { %s551_s3 = sshll.u32 %s2958_s19, 4  ;;  %s576_s16 = sshll.u32 %s2959_s21, 4  ;;  %s552_s3 = int_to_ptr.vmem [resolvable:$true] %s551_s3  ;;  %s577_s16 = int_to_ptr.vmem [resolvable:$true] %s576_s16 }
  0x7f   : > { %s3831_s7 = sld [smem:[#allocation36_spill]] }
  0x85   : > { %s2673_s20 = scalar_lea.hbm %s3831_s7, 16 }
  0x86   : > { %p2674_p6 = scmp.ne.s32.totalorder %s3831_s7, %s2673_s20  ;;  %p2680_p1 = scmp.lt.u32.totalorder %s2673_s20, %s3831_s7 }
  0x88   : > { %p2676_p8 = pnand %p2674_p6, %p3180_p7 }
  0x8a   : > { %p2677_p9 = pneg %p2676_p8 }
  0x8c   : > { %p2682_p3 = pnand %p2680_p1, %p2677_p9 }
  0x8e   : > { %2685 = shalt.err (!%p2682_p3)
}
  0x8f   : > { %s2686_s14 = scalar_lea.vmem %s552_s3, 16  ;;  %s2693_s18 = scalar_lea.vmem %s552_s3, 32 }
  0x90   : > { %p2687_p10 = scmp.ne.s32.totalorder %s552_s3, %s2686_s14  ;;  %p2694_p13 = scmp.lt.s32.totalorder %s552_s3, %s552_s3 }
  0x91   : > { %p2695_p0 = scmp.lt.s32.totalorder %s2693_s18, %s2686_s14 }
  0x92   : > { %p2689_p11 = pnand %p2687_p10, %p3180_p7 }
  0x93   : > { %p2696_p2 = por %p2695_p0, %p2694_p13 }
  0x94   : > { %p2690_p12 = pneg %p2689_p11 }
  0x96   : > { %p2697_p4 = pnand %p2696_p2, %p2690_p12 }
  0x98   : > { %2700 = shalt.err (!%p2697_p4)
}
  0x99   : > { %2393 = dma.hbm_to_vmem [thread:$0]  (!%p3164_p5), %s3831_s7, 16, %s552_s3, [#allocation9]  }
  0x9a   : > { %s3832_s10 = sld [smem:[#allocation39_spill]] }
  0xa0   : > { %s2701_s6 = scalar_lea.hbm %s3832_s10, 16 }
  0xa1   : > { %p2702_p6 = scmp.ne.s32.totalorder %s3832_s10, %s2701_s6  ;;  %p2708_p1 = scmp.lt.u32.totalorder %s2701_s6, %s3832_s10 }
  0xa3   : > { %p2704_p8 = pnand %p2702_p6, %p3180_p7 }
  0xa5   : > { %p2705_p9 = pneg %p2704_p8 }
  0xa7   : > { %p2710_p3 = pnand %p2708_p1, %p2705_p9 }
  0xa9   : > { %2713 = shalt.err (!%p2710_p3)
}
  0xaa   : > { %s2714_s14 = scalar_lea.vmem %s577_s16, 16  ;;  %s2721_s3 = scalar_lea.vmem %s577_s16, 32 }
  0xab   : > { %p2715_p10 = scmp.ne.s32.totalorder %s577_s16, %s2714_s14  ;;  %p2722_p13 = scmp.lt.s32.totalorder %s577_s16, %s577_s16 }
  0xac   : > { %p2723_p0 = scmp.lt.s32.totalorder %s2721_s3, %s2714_s14 }
  0xad   : > { %p2717_p11 = pnand %p2715_p10, %p3180_p7 }
  0xae   : > { %p2724_p2 = por %p2723_p0, %p2722_p13 }
  0xaf   : > { %p2718_p12 = pneg %p2717_p11 }
  0xb1   : > { %p2725_p4 = pnand %p2724_p2, %p2718_p12 }
  0xb3   : > { %2728 = shalt.err (!%p2725_p4)
}
  0xb4   : > { %2399 = dma.hbm_to_vmem [thread:$0]  (!%p3164_p5), %s3832_s10, 16, %s577_s16, [#allocation12]  }
  0xb5   : > { %s2960_s21 = smov [#allocation16]   ;;  %s2961_s8 = smov [#allocation17]  }
  0xb6   : > { %s598_s5 = sshll.u32 %s2960_s21, 4  ;;  %s609_s6 = sshll.u32 %s2961_s8, 4  ;;  %s599_s5 = int_to_ptr.vmem [resolvable:$true] %s598_s5  ;;  %s610_s6 = int_to_ptr.vmem [resolvable:$true] %s609_s6 }
  0xb7   : > { %s3833_s12 = sld [smem:[#allocation41_spill]] }
  0xbd   : > { %s2729_s26 = scalar_lea.hbm %s3833_s12, 16 }
  0xbe   : > { %p2730_p6 = scmp.ne.s32.totalorder %s3833_s12, %s2729_s26  ;;  %p2736_p1 = scmp.lt.u32.totalorder %s2729_s26, %s3833_s12 }
  0xc0   : > { %p2732_p8 = pnand %p2730_p6, %p3180_p7 }
  0xc2   : > { %p2733_p9 = pneg %p2732_p8 }
  0xc4   : > { %p2738_p3 = pnand %p2736_p1, %p2733_p9 }
  0xc6   : > { %2741 = shalt.err (!%p2738_p3)
}
  0xc7   : > { %s2742_s16 = scalar_lea.vmem %s599_s5, 16  ;;  %s2749_s19 = scalar_lea.vmem %s599_s5, 32 }
  0xc8   : > { %p2743_p10 = scmp.ne.s32.totalorder %s599_s5, %s2742_s16  ;;  %p2750_p13 = scmp.lt.s32.totalorder %s599_s5, %s599_s5 }
  0xc9   : > { %p2751_p0 = scmp.lt.s32.totalorder %s2749_s19, %s2742_s16 }
  0xca   : > { %p2745_p11 = pnand %p2743_p10, %p3180_p7 }
  0xcb   : > { %p2752_p2 = por %p2751_p0, %p2750_p13 }
  0xcc   : > { %p2746_p12 = pneg %p2745_p11 }
  0xce   : > { %p2753_p4 = pnand %p2752_p2, %p2746_p12 }
  0xd0   : > { %2756 = shalt.err (!%p2753_p4)
}
  0xd1   : > { %2405 = dma.hbm_to_vmem [thread:$0]  (!%p3164_p5), %s3833_s12, 16, %s599_s5, [#allocation15]  }
  0xd2   : > { %s3834_s13 = sld [smem:[#allocation42_spill]] }
  0xd8   : > { %s2757_s26 = scalar_lea.hbm %s3834_s13, 16 }
  0xd9   : > { %p2758_p6 = scmp.ne.s32.totalorder %s3834_s13, %s2757_s26  ;;  %p2764_p1 = scmp.lt.u32.totalorder %s2757_s26, %s3834_s13 }
  0xdb   : > { %p2760_p8 = pnand %p2758_p6, %p3180_p7 }
  0xdd   : > { %p2761_p9 = pneg %p2760_p8 }
  0xdf   : > { %p2766_p3 = pnand %p2764_p1, %p2761_p9 }
  0xe1   : > { %2769 = shalt.err (!%p2766_p3)
}
  0xe2   : > { %s2770_s16 = scalar_lea.vmem %s610_s6, 16  ;;  %s2777_s5 = scalar_lea.vmem %s610_s6, 32 }
  0xe3   : > { %p2771_p10 = scmp.ne.s32.totalorder %s610_s6, %s2770_s16  ;;  %p2778_p13 = scmp.lt.s32.totalorder %s610_s6, %s610_s6 }
  0xe4   : > { %p2779_p0 = scmp.lt.s32.totalorder %s2777_s5, %s2770_s16 }
  0xe5   : > { %p2773_p11 = pnand %p2771_p10, %p3180_p7 }
  0xe6   : > { %p2780_p2 = por %p2779_p0, %p2778_p13 }
  0xe7   : > { %p2774_p12 = pneg %p2773_p11 }
  0xe9   : > { %p2781_p4 = pnand %p2780_p2, %p2774_p12 }
  0xeb   : > { %2784 = shalt.err (!%p2781_p4)
}
  0xec   : > { %2408 = dma.hbm_to_vmem [thread:$0]  (!%p3164_p5), %s3834_s13, 16, %s610_s6, [#allocation18]  }
  0xed   : > { %s2148_s17 = sadd.s32 4294967294, %s2953_s4   ;;  %s49_s29 = sadd.s32 1, %s2945_s27 }
  0xee   : > { %s52_s8 = sadd.s32 1, %s2949_s28  ;;  %p50_p7 = scmp.ge.s32.totalorder %s49_s29, 2 }
  0xef   : > { %s85_s20 = sadd.s32 1, %s2933_s25  ;;  %p92_p6 = scmp.ne.s32.totalorder %s2933_s25, %s2929_s2 }
  0xf0   : > { %p93_p8 = scmp.eq.s32.totalorder %s2953_s4, 0  ;;  %s3883_s29 = smov (%p50_p7, %s49_s29), 0 }
  0xf1   : > { %s3885_s8 = smov (!%p50_p7, %s52_s8), %s2949_s28  ;;  %p98_p5 = scmp.ne.s32.totalorder %s2929_s2, %s2925_s24 }
  0xf2   : > { %p3326_p9 = por %p93_p8, %p92_p6  ;;  %p54_p1 = scmp.ge.s32.totalorder %s3885_s8, 2 }
  0xf3   : > { %s487_s15 = ssub.s32 %s2945_s27, %s3883_s29  ;;  %p3836_p3 = scmp.ne.s32.totalorder %s3823_s30, 0 }
  0xf4   : > { %s491_s0 = sadd.s32 1, %s2921_s23  ;;  %s3887_s8 = smov (%p54_p1, %s3885_s8), 0 }
  0xf5   : > { %p3336_p10 = por %p3836_p3, %p98_p5  ;;  %p501_p11 = scmp.ne.s32.totalorder %s2921_s23, %s2917_s22 }
  0xf6   : > { %s3838_s14 = sadd.s32 4294967295, %s2953_s4   ;;  %s82_s3 = ssub.s32 %s2949_s28, %s3887_s8 }
  0xf7   : > { %p502_p12 = scmp.eq.s32.totalorder %s3838_s14, 3  ;;  %p507_p13 = scmp.ne.s32.totalorder %s2917_s22, %s2913_s1 }
  0xf8   : > { %p83_p0 = scmp.eq.s32.totalorder %s82_s3, 0  ;;  %s488_s24 = sor.u32 %s487_s15, %s82_s3 }
  0xf9   : > { %p489_p2 = scmp.eq.s32.totalorder %s488_s24, 0  ;;  %p3351_p4 = por %p502_p12, %p501_p11 }
  0xfa   : > { %s3356_s16 = scalar_select %p83_p0, %s2933_s25, %s85_s20  }
  0xfb   : > { %s3839_s18 = scalar_select %p3351_p4, 1, 0 }
  0xfc   : > { %s3359_s5 = scalar_select %p489_p2, %s2921_s23, %s491_s0  }
  0xfd   : > { %p508_p7 = scmp.eq.s32.totalorder %s2148_s17, 3  ;;  %p2424_p6 = scmp.lt.s32.totalorder %s2953_s4, 4 }
  0xfe   : > { %s646_s19 = sand.u32 1, %s2933_s25   ;;  %s2158_s21 = sshll.u32 %s2949_s28, 4 }
  0xff   : > { %p3364_p8 = por %p508_p7, %p507_p13  ;;  %s3841_s15 = sld [smem:[#allocation30_spill]] }
 0x100   : > { %s649_s20 = scalar_lea.vmem [#allocation5], %s646_s19  ;;  %p3375_p5 = pnand %p2424_p6, %p3326_p9 }
 0x101   : > { %s3840_s14 = scalar_select %p3364_p8, 1, 0 }
 0x102   : > { %s656_s0 = sshll.u32 %s649_s20, 4  ;;  %s647_s24 = scalar_lea.sflag [#allocation6], %s646_s19  ;;  %s3379_s0 = int_to_ptr.vmem [resolvable:$true] %s656_s0 }
 0x103   : > { %p2787_p3 = pneg %p3375_p5 }
 0x105   : > { %s3371_s3 = scalar_lea.hbm %s3841_s15, %s2158_s21  ;;  %s2790_s6 = scalar_lea.hbm %s3841_s15, 32 }
 0x106   : > { %s2785_s10 = scalar_lea.hbm %s3371_s3, 16  ;;  %p2791_p9 = scmp.lt.u32.totalorder %s3371_s3, %s3841_s15 }
 0x107   : > { %p2786_p1 = scmp.ne.s32.totalorder %s3371_s3, %s2785_s10  ;;  %p2792_p13 = scmp.lt.u32.totalorder %s2790_s6, %s2785_s10 }
 0x108   : > { %p2794_p2 = scmp.lt.u32.totalorder %s2785_s10, %s3371_s3 }
 0x109   : > { %p2788_p11 = pnand %p2787_p3, %p2786_p1  ;;  %p2793_p0 = por %p2792_p13, %p2791_p9 }
 0x10b   : > { %p2789_p12 = pneg %p2788_p11  ;;  %p2795_p7 = por %p2794_p2, %p2793_p0 }
 0x10d   : > { %p2796_p6 = pnand %p2795_p7, %p2789_p12 }
 0x10f   : > { %2799 = shalt.err (!%p2796_p6)
}
 0x110   : > { %s2800_s19 = scalar_lea.vmem %s3379_s0, 16  ;;  %s2962_s7 = smov [#allocation5]  }
 0x111   : > { %p2801_p1 = scmp.ne.s32.totalorder %s3379_s0, %s2800_s19  ;;  %s2805_s9 = sshll.u32 %s2962_s7, 4  ;;  %s2806_s9 = int_to_ptr.vmem [resolvable:$false] %s2805_s9 }
 0x112   : > { %s2807_s21 = scalar_lea.vmem %s2806_s9, 32  ;;  %p2808_p4 = scmp.lt.s32.totalorder %s3379_s0, %s2806_s9 }
 0x113   : > { %p2803_p11 = pnand %p2801_p1, %p2787_p3  ;;  %p2809_p9 = scmp.lt.s32.totalorder %s2807_s21, %s2800_s19 }
 0x115   : > { %p2804_p8 = pneg %p2803_p11  ;;  %p2810_p13 = por %p2809_p9, %p2808_p4 }
 0x117   : > { %p2811_p0 = pnand %p2810_p13, %p2804_p8 }
 0x119   : > { %2814 = shalt.err (!%p2811_p0)
}
 0x11a   : > { %2412 = dma.hbm_to_vmem [thread:$0]  (!%p3375_p5), %s3371_s3, 16, %s3379_s0, %s647_s24  }
 0x11b   : > { %s3843_s10 = sld [smem:[#allocation28_spill]] }
 0x121   : > { %p3844_p12 = scmp.ne.s32.totalorder %s3843_s10, 0 }
 0x122   : > { %s667_s6 = sand.u32 (!%p3844_p12), 1, %s2929_s2  }
 0x123   : > { %665 = sbr.rel (%p3844_p12) target bundleno = 3711 (0xe7f), region = 100  ;;  %s668_s20 = scalar_lea.sflag (!%p3844_p12), [#allocation6], %s667_s6 }
 0x124   : > { %s3409_s7 = scalar_lea.vmem (!%p3844_p12), [#allocation5], %s667_s6 }
 0x12a   : > { %2888 = dma.done.wait (%p3336_p10), %s668_s20, 16  }
 0x12b   : > { %2890 = vsyncadd (%p3336_p10), %s668_s20, 4294967280  ;;  %p3845_p4 = scmp.ne.s32.totalorder %s3823_s30, 0 }
 0x12d   : > { %2892 = dma.done.wait (%p3845_p4), [#allocation9], 32  }
 0x12e   : > { %2894 = vsyncadd (%p3845_p4), [#allocation9], 4294967264 }
 0x12f   : > { %2896 = dma.done.wait (%p3845_p4), [#allocation12], 32  }
 0x130   : > { %2898 = vsyncadd (%p3845_p4), [#allocation12], 4294967264 }
 0x131   : > { %2900 = dma.done.wait (%p3845_p4), [#allocation15], 32  }
 0x132   : > { %2902 = vsyncadd (%p3845_p4), [#allocation15], 4294967264 }
 0x133   : > { %2904 = dma.done.wait (%p3845_p4), [#allocation18], 16  }
 0x134   : > { %2906 = vsyncadd (%p3845_p4), [#allocation18], 4294967280  ;;  %s3846_s26 = sld [smem:[#allocation27_spill]]  ;;  %s3794_s3 = sand.u32 1, %s2917_s22  }
 0x135   : > { %s3435_s0 = sshll.u32 %s3794_s3, 3  ;;  %s3847_s9 = sld [smem:[#allocation29_spill]] }
 0x136   : > { %s3848_s30 = sld [smem:[#allocation26_spill]] }
 0x13a   : > { %p759_p10 = scmp.lt.s32.totalorder %s3846_s26, 1 }
 0x13c   : > { %s3889_s26 = smov (!%p759_p10, %s3846_s26), 1  ;;  %p2170_p8 = scmp.ne.s32.totalorder %s3848_s30, 0 }
 0x13d   : > { %s2218_s17 = sshll.u32 %s3889_s26, 4  ;;  %vm773_vm0 = vcmask (!%p2170_p8), 261120   ;;  %s3849_s26 = sld [smem:[#allocation33_spill]] (!%p2170_p8)  ;;  %v2963_v16 = vmov (!%p2170_p8), 0.0   ;;  %vm2964_vm1 = vmmov (!%p2170_p8), 0   ;;  %vm969_vm2 = vcmask (!%p2170_p8), 31744  }
 0x13e   : > { %s3441_s21 = scalar_lea.vmem %s3847_s9, %s2218_s17  ;;  %768 = sbr.rel (%p2170_p8) target bundleno = 1107 (0x453), region = 136  ;;  %2255 = vmatprep.subr.bf16.mxu0 (!%p2170_p8), %v2963_v16  ;;  %2263 = vmatprep.subr.bf16.mxu1 (!%p2170_p8), %v2963_v16  ;;  %v2171_v27 = vld [vmem:[#allocation13] ss:$0 sm:$0xff] (!%p2170_p8)  ;;  %v2172_v31 = vld [vmem:[#allocation14] ss:$0 sm:$0xff] (!%p2170_p8)  ;;  %vm979_vm3 = vcmask (!%p2170_p8), 64512  }
 0x13f   : > { %v769_v0 = vld [vmem:[%s3441_s21] sm:$0xff] (!%p2170_p8)  ;;  %v770_v1 = vld [vmem:[%s3441_s21 + $0x8] sm:$0xff] (!%p2170_p8)  ;;  %s3851_s9 = sld [smem:[#allocation35_spill]] (!%p2170_p8)  ;;  %2259 = vmatprep.mubr.msk.bf16.mxu0 (!%p2170_p8), %vm2964_vm1, %v2963_v16  ;;  %2267 = vmatprep.mubr.msk.bf16.mxu1 (!%p2170_p8), %vm2964_vm1, %v2963_v16  ;;  %v2173_v36 = vld [vmem:[#allocation8] ss:$0 sm:$0xff] (!%p2170_p8)  ;;  %s2965_s11 = smov (!%p2170_p8), 116  }
 0x140   : > { %v774_v2 = vsel (!%p2170_p8), %vm773_vm0, %v769_v0, 0.0  ;;  %v777_v3 = vsel (!%p2170_p8), %vm773_vm0, %v770_v1, 0.0  ;;  %v2177_v38 = vld [vmem:[#allocation10] ss:$0 sm:$0xff] (!%p2170_p8)  ;;  %s2966_s3 = smov (!%p2170_p8), 124   ;;  %s2967_s10 = smov (!%p2170_p8), 108  }
 0x141   : > { %775 = vadd.xlane.f32.xlu0 (!%p2170_p8), %v774_v2  ;;  %s2968_s6 = smov (!%p2170_p8), 100   ;;  %s2969_s20 = smov (!%p2170_p8), 4   ;;  %vm1012_vm4 = vcmask (!%p2170_p8), 130112   ;;  %vm1043_vm5 = vcmask (!%p2170_p8), 195712   ;;  %vm1074_vm6 = vcmask (!%p2170_p8), 261312  }
 0x142   : > { %s3852_s19 = sld [smem:[#allocation47_spill]] (!%p2170_p8)  ;;  %s2970_s30 = smov (!%p2170_p8), 8  }
 0x143   : > { %s3850_s17 = smov (!%p2170_p8), %s3849_s26  ;;  %v2551_v14 = vld [vmem:[%s3849_s26] sm:$0xff] (!%p2170_p8)   ;;  %s2971_s12 = smov (!%p2170_p8), 16  }
 0x144   : > { %2256 = vmatpush3.bf16.msra.mxu0 (!%p2170_p8), %v2551_v14  ;;  %v2553_v17 = vld [vmem:[%s3850_s17 + $0x8] sm:$0xff] (!%p2170_p8)   ;;  %s3853_s26 = sld [smem:[#allocation48_spill]] (!%p2170_p8) }
 0x145   : > { %778 = vadd.xlane.f32.xlu0 %v777_v3  ;;  %v2552_v15 = vld [vmem:[%s3851_s9] sm:$0xff]   ;;  %v2554_v18 = vld [vmem:[%s3851_s9 + $0x8] sm:$0xff]   ;;  %2257 = vmatprep.subr.bf16.mxu0 %v2963_v16 }
 0x146   : > { %2264 = vmatpush3.bf16.msra.mxu1 %v2552_v15 }
 0x147   : > { %2265 = vmatprep.subr.bf16.mxu1 %v2963_v16 }
 0x148   : > { %2258 = vmatpush3.bf16.msra.mxu0 %v2553_v17  ;;  %v951_v51 = vld [vmem:[%s3852_s19] sm:$0xff]  ;;  %v952_v52 = vld [vmem:[%s3852_s19 + $0x8] sm:$0xff] }
 0x14a   : > { %2266 = vmatpush3.bf16.msra.mxu1 %v2554_v18  ;;  %v953_v53 = vld [vmem:[%s3853_s26] sm:$0xff]  ;;  %v954_v62 = vld [vmem:[%s3853_s26 + $0x8] sm:$0xff] }
 0x1ce   : > { %v776_v4 = vpop.xlane.xlu0 %775 }
 0x1cf   : > { %v781_v5 = vmul.f32 0.03125, %v776_v4 }
 0x1d1   : > { %v783_v6 = vsub.f32 %v769_v0, %v781_v5 }
 0x1d2   : > { %v779_v7 = vpop.xlane.xlu0 %778 }
 0x1d3   : > { %v782_v8 = vmul.f32 0.03125, %v779_v7  ;;  %v785_v9 = vmul.f32 %v783_v6, %v783_v6 }
 0x1d5   : > { %v784_v10 = vsub.f32 %v770_v1, %v782_v8  ;;  %v787_v11 = vsel %vm773_vm0, %v785_v9, 0.0 }
 0x1d6   : > { %788 = vadd.xlane.f32.xlu1 %v787_v11 }
 0x1d7   : > { %v786_v12 = vmul.f32 %v784_v10, %v784_v10 }
 0x1d9   : > { %v790_v13 = vsel %vm773_vm0, %v786_v12, 0.0 }
 0x1da   : > { %791 = vadd.xlane.f32.xlu1 %v790_v13 }
 0x263   : > { %v789_v19 = vpop.xlane.xlu1 %788 }
 0x264   : > { %v793_v20 = vmul.f32 0.03125, %v789_v19 }
 0x266   : > { %v795_v21 = vadd.f32 1e-05, %v793_v20 }
 0x267   : > { %v792_v22 = vpop.xlane.xlu1 %791 }
 0x268   : > { %2555 = vrsqrt.f32 %v795_v21  ;;  %v794_v23 = vmul.f32 0.03125, %v792_v22 }
 0x26a   : > { %v796_v24 = vadd.f32 1e-05, %v794_v23 }
 0x26c   : > { %2557 = vrsqrt.f32 %v796_v24 }
 0x272   : > { %v2556_v25 = vpop.eup %2555 }
 0x273   : > { %v799_v26 = vmul.f32 %v2556_v25, %v783_v6 }
 0x275   : > { %v807_v30 = vmul.f32 %v2171_v27, %v799_v26 }
 0x276   : > { %v2558_v28 = vpop.eup %2557 }
 0x277   : > { %v800_v29 = vmul.f32 %v2558_v28, %v784_v10  ;;  %v815_v33 = vadd.f32 %v2172_v31, %v807_v30 }
 0x279   : > { %v808_v32 = vmul.f32 %v2171_v27, %v800_v29 }
 0x27b   : > { %v816_v34 = vadd.f32 %v2172_v31, %v808_v32 }
 0x27d   : > { %v817_v35 = vpack.c.bf16 %v816_v34, %v815_v33 }
 0x27f   : > { %2260 = vmatmul.mubr.msk.bf16.vlgmr.msra.gmra.mrb[0].mxu0 %vm773_vm0, %v817_v35  ;;  %2268 = vmatmul.mubr.msk.bf16.vlgmr.msra.gmra.mrb[0].mxu1 %vm773_vm0, %v817_v35 }
 0x352   : > { %v878_v37 = vpop.f32.mrb[0].mxu0  ;;  %v942_v39 = vpop.f32.mrb[0].mxu1 }
 0x353   : > { %v3465_v40 = vadd.f32 %v2173_v36, %v878_v37  ;;  %v2261_v41 = vpop.f32.mrb[1].mxu0  ;;  %v2269_v42 = vpop.f32.mrb[1].mxu1  ;;  %v943_v45 = vadd.f32 %v2177_v38, %v942_v39 }
 0x354   : > { %v881_v43 = vpop.f32.mrb[2].mxu0  ;;  %v945_v44 = vpop.f32.mrb[2].mxu1 }
 0x355   : > { %v946_v46 = vadd.f32 %v2177_v38, %v945_v44  ;;  %v2270_v47 = vpop.f32.mrb[3].mxu1  ;;  %981 = vrot.lane.b32.xlu1 %v3465_v40, %s2965_s11  ;;  %957 = vrot.lane.b32.xlu0 %v3465_v40, %s2966_s3  ;;  %v2262_v48 = vpop.f32.mrb[3].mxu0  ;;  %v3469_v49 = vadd.f32 %v2173_v36, %v881_v43  ;;  %v972_v19 = vmul.f32 %v951_v51, %v3465_v40 }
 0x357   : > { %v949_v50 = vpack.c.bf16 %v946_v46, %v943_v45  ;;  %v973_v20 = vmul.f32 %v952_v52, %v3469_v49 }
 0x359   : > { %950 = vst.msk [vmem:[#allocation3] sm:$0xff] %vm773_vm0, %v949_v50  ;;  %1014 = vrot.lane.b32.xlu0 %v3465_v40, %s2967_s10  ;;  %959 = vrot.lane.b32.xlu1 %v3469_v49, %s2966_s3 }
 0x35d   : > { %1045 = vrot.lane.b32.xlu0 %v3465_v40, %s2968_s6  ;;  %983 = vrot.lane.b32.xlu1 %v3469_v49, %s2965_s11  ;;  %s2972_s11 = smov 24  }
 0x361   : > { %963 = vrot.lane.b32.xlu0 %v3465_v40, %s2969_s20  ;;  %1016 = vrot.lane.b32.xlu1 %v3469_v49, %s2967_s10 }
 0x365   : > { %991 = vrot.lane.b32.xlu0 %v951_v51, %s2970_s30  ;;  %1047 = vrot.lane.b32.xlu1 %v3469_v49, %s2968_s6 }
 0x369   : > { %1022 = vrot.lane.b32.xlu0 %v951_v51, %s2971_s12  ;;  %993 = vrot.lane.b32.xlu1 %v952_v52, %s2970_s30 }
 0x36d   : > { %1053 = vrot.lane.b32.xlu0 %v951_v51, %s2972_s11  ;;  %1024 = vrot.lane.b32.xlu1 %v952_v52, %s2971_s12 }
 0x371   : > { %1055 = vrot.lane.b32.xlu1 %v952_v52, %s2972_s11 }
 0x375   : > { %965 = vrot.lane.b32.xlu1 %v3469_v49, %s2969_s20 }
 0x3c7   : > { %v982_v54 = vpop.permute.xlu1 %981  ;;  %v958_v55 = vpop.permute.xlu0 %957 }
 0x3c8   : > { %v987_v56 = vsel %vm969_vm2, %v982_v54, %v958_v55 }
 0x3c9   : > { %v999_v57 = vmul.f32 %v987_v56, %v953_v53 }
 0x3cb   : > { %1003 = vrot.lane.b32.xlu0 %v999_v57, %s2970_s30  ;;  %v1015_v58 = vpop.permute.xlu0 %1014  ;;  %v960_v59 = vpop.permute.xlu1 %959 }
 0x3cc   : > { %v1020_v60 = vsel %vm969_vm2, %v1015_v58, %v982_v54 }
 0x3cd   : > { %v1030_v61 = vmul.f32 %v1020_v60, %v953_v53 }
 0x3cf   : > { %1034 = vrot.lane.b32.xlu0 %v1030_v61, %s2971_s12  ;;  %v1046_v63 = vpop.permute.xlu0 %1045  ;;  %v984_v0 = vpop.permute.xlu1 %983 }
 0x3d0   : > { %v1051_v1 = vsel %vm969_vm2, %v1046_v63, %v1015_v58  ;;  %v988_v2 = vsel %vm969_vm2, %v984_v0, %v960_v59 }
 0x3d1   : > { %v1061_v3 = vmul.f32 %v1051_v1, %v953_v53  ;;  %v1000_v4 = vmul.f32 %v988_v2, %v954_v62 }
 0x3d3   : > { %1065 = vrot.lane.b32.xlu0 %v1061_v3, %s2972_s11  ;;  %1005 = vrot.lane.b32.xlu1 %v1000_v4, %s2970_s30  ;;  %v1017_v5 = vpop.permute.xlu1 %1016  ;;  %v964_v13 = vpop.permute.xlu0 %963 }
 0x3d4   : > { %v1021_v6 = vsel %vm969_vm2, %v1017_v5, %v984_v0  ;;  %v970_v15 = vsel %vm969_vm2, %v958_v55, %v964_v13 }
 0x3d5   : > { %v1031_v7 = vmul.f32 %v1021_v6, %v954_v62  ;;  %v974_v16 = vmul.f32 %v970_v15, %v953_v53 }
 0x3d7   : > { %1036 = vrot.lane.b32.xlu1 %v1031_v7, %s2971_s12  ;;  %v1048_v8 = vpop.permute.xlu1 %1047  ;;  %v976_v22 = vadd.f32 %v974_v16, %v972_v19  ;;  %v992_v25 = vpop.permute.xlu0 %991 }
 0x3d8   : > { %v1052_v9 = vsel %vm969_vm2, %v1048_v8, %v1017_v5  ;;  %v997_v29 = vmul.f32 %v992_v25, %v3465_v40 }
 0x3d9   : > { %v1062_v10 = vmul.f32 %v1052_v9, %v954_v62 }
 0x3db   : > { %1067 = vrot.lane.b32.xlu1 %v1062_v10, %s2972_s11  ;;  %v994_v11 = vpop.permute.xlu1 %993  ;;  %v1023_v26 = vpop.permute.xlu0 %1022 }
 0x3dc   : > { %v998_v30 = vmul.f32 %v994_v11, %v3469_v49  ;;  %v1028_v35 = vmul.f32 %v1023_v26, %v3465_v40 }
 0x3df   : > { %v1025_v12 = vpop.permute.xlu1 %1024  ;;  %v1054_v27 = vpop.permute.xlu0 %1053 }
 0x3e0   : > { %v1029_v36 = vmul.f32 %v1025_v12, %v3469_v49  ;;  %v1059_v43 = vmul.f32 %v1054_v27, %v3465_v40 }
 0x3e3   : > { %v1056_v14 = vpop.permute.xlu1 %1055 }
 0x3e4   : > { %v1060_v44 = vmul.f32 %v1056_v14, %v3469_v49 }
 0x3e7   : > { %v966_v17 = vpop.permute.xlu1 %965 }
 0x3e8   : > { %v971_v18 = vsel %vm969_vm2, %v960_v59, %v966_v17 }
 0x3e9   : > { %v975_v21 = vmul.f32 %v971_v18, %v954_v62 }
 0x3eb   : > { %v977_v23 = vadd.f32 %v975_v21, %v973_v20 }
 0x3ed   : > { %v978_v24 = vpack.c.bf16 %v977_v23, %v976_v22 }
 0x3ef   : > { %980 = vst.msk [vmem:[#allocation2] sm:$0xff] %vm979_vm3, %v978_v24 }
 0x43d   : > { %v1004_v28 = vpop.permute.xlu0 %1003 }
 0x43e   : > { %v1009_v33 = vadd.f32 %v1004_v28, %v997_v29 }
 0x441   : > { %v1035_v31 = vpop.permute.xlu0 %1034 }
 0x442   : > { %v1040_v39 = vadd.f32 %v1035_v31, %v1028_v35 }
 0x445   : > { %v1006_v32 = vpop.permute.xlu1 %1005  ;;  %v1066_v42 = vpop.permute.xlu0 %1065 }
 0x446   : > { %v1010_v34 = vadd.f32 %v1006_v32, %v998_v30  ;;  %v1071_v47 = vadd.f32 %v1066_v42, %v1059_v43 }
 0x448   : > { %v1011_v37 = vpack.c.bf16 %v1010_v34, %v1009_v33 }
 0x449   : > { %v1037_v38 = vpop.permute.xlu1 %1036 }
 0x44a   : > { %1013 = vst.msk [vmem:[#allocation2] sm:$0xff] %vm1012_vm4, %v1011_v37  ;;  %v1041_v41 = vadd.f32 %v1037_v38, %v1029_v36 }
 0x44c   : > { %v1042_v45 = vpack.c.bf16 %v1041_v41, %v1040_v39 }
 0x44d   : > { %v1068_v46 = vpop.permute.xlu1 %1067 }
 0x44e   : > { %1044 = vst.msk [vmem:[#allocation2] sm:$0xff] %vm1043_vm5, %v1042_v45  ;;  %v1072_v48 = vadd.f32 %v1068_v46, %v1060_v44 }
 0x450   : > { %v1073_v50 = vpack.c.bf16 %v1072_v48, %v1071_v47 }
 0x452   : > { %1075 = vst.msk [vmem:[#allocation2] sm:$0xff] %vm1074_vm6, %v1073_v50 }
 0x453 PF: > { %s3854_s12 = sld [smem:[#allocation26_spill]]  ;;  %vm1081_vm7 = vcmask 261120   ;;  %s3855_s11 = sld [smem:[#allocation31_spill]]  ;;  %v2973_v57 = vmov 0.0   ;;  %vm2974_vm8 = vmmov 0   ;;  %vm1189_vm9 = vcmask 31744  }
 0x454   : > { %2271 = vmatprep.subr.bf16.mxu0 %v2973_v57  ;;  %2275 = vmatprep.mubr.msk.bf16.mxu0 %vm2974_vm8, %v2973_v57  ;;  %v2182_v63 = vld [vmem:[#allocation13] ss:$0 sm:$0xff]  ;;  %v2183_v1 = vld [vmem:[#allocation14] ss:$0 sm:$0xff]  ;;  %s3856_s9 = sld [smem:[#allocation32_spill]]  ;;  %s2975_s24 = smov 108  }
 0x455   : > { %2279 = vmatprep.subr.bf16.mxu1 %v2973_v57  ;;  %2281 = vmatprep.mubr.msk.bf16.mxu1 %vm2974_vm8, %v2973_v57  ;;  %s2977_s30 = smov 116   ;;  %s2978_s3 = smov 100   ;;  %vm1204_vm10 = vcmask 64512   ;;  %vm1251_vm11 = vcmask 130048   ;;  %vm1442_vm12 = vcmask 130112   ;;  %vm1577_vm13 = vcmask 195712  }
 0x456   : > { %s3857_s6 = sld [smem:[#allocation47_spill]]  ;;  %s3858_s13 = sld [smem:[#allocation48_spill]]  ;;  %vm1712_vm14 = vcmask 261312   ;;  %vm1920_vm15 = vcmask 523264  }
 0x457   : > { %p3870_p3 = scmp.ne.s32.totalorder %s3839_s18, 0 }
 0x459   : > { %s3521_s20 = sshll.u32 %s3854_s12, 3  ;;  %v2559_v56 = vld [vmem:[%s3855_s11] sm:$0xff]   ;;  %v2560_v58 = vld [vmem:[%s3855_s11 + $0x8] sm:$0xff]   ;;  %s2980_s11 = smov 16  }
 0x45a   : > { %s1077_s19 = scalar_lea.vmem %s3441_s21, %s3521_s20  ;;  %2272 = vmatpush3.bf16.msra.mxu0 %v2559_v56  ;;  %v2184_v5 = vld [vmem:[%s3856_s9] ss:$0 sm:$0xff]  ;;  %s2979_s9 = smov 8  }
 0x45b   : > { %v3525_v51 = vld [vmem:[%s1077_s19] sm:$0xff]  ;;  %2273 = vmatprep.subr.bf16.mxu0 %v2973_v57  ;;  %s2976_s19 = smov 124   ;;  %s3859_s21 = sld [smem:[#allocation37_spill]] }
 0x45c   : > { %v1082_v40 = vsel %vm1081_vm7, %v3525_v51, 0.0  ;;  %s1177_s26 = scalar_lea.vmem %s3857_s6, %s3521_s20  ;;  %s1179_s15 = scalar_lea.vmem %s3858_s13, %s3521_s20  ;;  %v1325_v22 = vld [vmem:[#allocation2] sm:$0xff] }
 0x45d   : > { %1083 = vadd.xlane.f32.xlu0 %v1082_v40  ;;  %v1178_v11 = vld [vmem:[%s1177_s26] sm:$0xff]  ;;  %s2981_s13 = smov 24   ;;  %v1209_v23 = vsel %vm1204_vm10, %v1325_v22, 0  ;;  %s2983_s20 = smov 112  }
 0x45e   : > { %2274 = vmatpush3.bf16.msra.mxu0 %v2560_v58  ;;  %v1180_v13 = vld [vmem:[%s1179_s15] sm:$0xff]  ;;  %2280 = vmatpush3.bf16.xpose.msra.mxu1 %v1209_v23  ;;  %s2982_s15 = smov 120   ;;  %s3863_s26 = sld [smem:[#allocation27_spill]] }
 0x45f   : > { %2285 = vmatprep.subr.bf16.mxu0 %v2973_v57  ;;  %2291 = vmatprep.subr.bf16.mxu1 %v2973_v57  ;;  %s3865_s6 = sld [smem:[#allocation46_spill]] }
 0x4ea   : > { %v1084_v49 = vpop.xlane.xlu0 %1083 }
 0x4eb   : > { %v1086_v52 = vmul.f32 0.03125, %v1084_v49 }
 0x4ed   : > { %v1087_v53 = vsub.f32 %v3525_v51, %v1086_v52 }
 0x4ef   : > { %v1088_v54 = vmul.f32 %v1087_v53, %v1087_v53 }
 0x4f1   : > { %v1089_v55 = vsel %vm1081_vm7, %v1088_v54, 0.0 }
 0x4f2   : > { %1090 = vadd.xlane.f32.xlu0 %v1089_v55 }
 0x57f   : > { %v1091_v59 = vpop.xlane.xlu0 %1090 }
 0x580   : > { %v1092_v60 = vmul.f32 0.03125, %v1091_v59 }
 0x582   : > { %v1093_v61 = vadd.f32 1e-05, %v1092_v60 }
 0x584   : > { %2569 = vrsqrt.f32 %v1093_v61  ;;  %v1326_v61 = vld [vmem:[#allocation3] sm:$0xff] }
 0x58e   : > { %v2570_v62 = vpop.eup %2569 }
 0x58f   : > { %v1095_v0 = vmul.f32 %v2570_v62, %v1087_v53  ;;  %v2188_v62 = vld [vmem:[%s3409_s7] ss:$0 sm:$0xff] }
 0x591   : > { %v1102_v2 = vmul.f32 %v2182_v63, %v1095_v0 }
 0x593   : > { %v1109_v3 = vadd.f32 %v2183_v1, %v1102_v2 }
 0x595   : > { %v1110_v4 = vpack.c.bf16 %v1109_v3, %v1109_v3 }
 0x597   : > { %2276 = vmatmul.mubr.msk.bf16.vlgmr.msra.gmra.mrb[0].mxu0 %vm1081_vm7, %v1110_v4 }
 0x598   : > { %2287 = vmatprep.mubr.msk.bf16.mxu0 %vm2974_vm8, %v2973_v57  ;;  %2286 = vmatpush3.bf16.msra.mxu0 %v1326_v61 }
 0x599   : > { %2297 = vmatprep.subr.bf16.mxu0 %v2973_v57 }
 0x66a   : > { %v1171_v6 = vpop.f32.mrb[0].mxu0 }
 0x66b   : > { %v3551_v7 = vadd.f32 %v2184_v5, %v1171_v6  ;;  %v2277_v8 = vpop.f32.mrb[1].mxu0 }
 0x66c   : > { %v1174_v9 = vpop.f32.mrb[2].mxu0 }
 0x66d   : > { %1444 = vrot.lane.b32.xlu0 %v3551_v7, %s2975_s24  ;;  %1183 = vrot.lane.b32.xlu1 %v3551_v7, %s2976_s19  ;;  %v2278_v10 = vpop.f32.mrb[3].mxu0  ;;  %s2984_s19 = smov 4   ;;  %v1191_v45 = vmul.f32 %v1178_v11, %v3551_v7  ;;  %s3860_s24 = sld [smem:[#allocation43_spill]] }
 0x671   : > { %1308 = vrot.lane.b32.xlu1 %v3551_v7, %s2977_s30  ;;  %s2985_s30 = smov 104  }
 0x675   : > { %1579 = vrot.lane.b32.xlu1 %v3551_v7, %s2978_s3  ;;  %s2986_s3 = smov [#allocation19]  }
 0x676   : > { %s2819_s10 = sshll.u32 %s2986_s3, 4  ;;  %s2820_s10 = int_to_ptr.vmem [resolvable:$false] %s2819_s10 }
 0x679   : > { %1313 = vrot.lane.b32.xlu1 %v1178_v11, %s2979_s9 }
 0x6df   : > { %v1184_v12 = vpop.permute.xlu1 %1183  ;;  %v1445_v17 = vpop.permute.xlu0 %1444 }
 0x6e3   : > { %v1309_v14 = vpop.permute.xlu1 %1308 }
 0x6e4   : > { %v1311_v15 = vsel %vm1189_vm9, %v1309_v14, %v1184_v12  ;;  %v1447_v21 = vsel %vm1189_vm9, %v1445_v17, %v1309_v14 }
 0x6e5   : > { %v1317_v16 = vmul.f32 %v1311_v15, %v1180_v13  ;;  %v1452_v24 = vmul.f32 %v1447_v21, %v1180_v13 }
 0x6e7   : > { %1319 = vrot.lane.b32.xlu1 %v1317_v16, %s2979_s9  ;;  %v1580_v18 = vpop.permute.xlu1 %1579 }
 0x6e8   : > { %v1582_v19 = vsel %vm1189_vm9, %v1580_v18, %v1445_v17 }
 0x6e9   : > { %v1587_v20 = vmul.f32 %v1582_v19, %v1180_v13 }
 0x6eb   : > { %1448 = vrot.lane.b32.xlu1 %v1178_v11, %s2980_s11  ;;  %1589 = vrot.lane.b32.xlu0 %v1587_v20, %s2981_s13  ;;  %v1314_v25 = vpop.permute.xlu1 %1313 }
 0x6ec   : > { %v1316_v26 = vmul.f32 %v1314_v25, %v3551_v7 }
 0x6ef   : > { %1454 = vrot.lane.b32.xlu1 %v1452_v24, %s2980_s11  ;;  %1331 = vrot.lane.b32.xlu0 %v1325_v22, %s2982_s15 }
 0x6f3   : > { %1583 = vrot.lane.b32.xlu1 %v1178_v11, %s2981_s13  ;;  %1466 = vrot.lane.b32.xlu0 %v1325_v22, %s2983_s20 }
 0x6f7   : > { %1186 = vrot.lane.b32.xlu1 %v3551_v7, %s2984_s19  ;;  %1601 = vrot.lane.b32.xlu0 %v1325_v22, %s2985_s30  ;;  %s2214_s19 = sshll.u32 %s3863_s26, 1  ;;  %s3869_s26 = sand.u32 1, %s2917_s22  }
 0x6f8   : > { %s1978_s7 = sadd.s32 %s3854_s12, %s2214_s19  ;;  %s1967_s19 = scalar_lea.sflag [#allocation7], %s3869_s26 }
 0x759   : > { %v1320_v27 = vpop.permute.xlu1 %1319 }
 0x75a   : > { %v1322_v28 = vadd.f32 %v1320_v27, %v1316_v26 }
 0x75c   : > { %v1323_v29 = vmul.f32 0.35355338, %v1322_v28 }
 0x75d   : > { %v1449_v30 = vpop.permute.xlu1 %1448  ;;  %v1590_v39 = vpop.permute.xlu0 %1589 }
 0x75e   : > { %v1324_v31 = vpack.c.bf16 %v1323_v29, %v1323_v29  ;;  %v1451_v32 = vmul.f32 %v1449_v30, %v3551_v7 }
 0x760   : > { %1328 = vrot.lane.b32.xlu1 %v1324_v31, %s2982_s15 }
 0x761   : > { %v1455_v33 = vpop.permute.xlu1 %1454  ;;  %v1332_v50 = vpop.permute.xlu0 %1331 }
 0x762   : > { %v1457_v34 = vadd.f32 %v1455_v33, %v1451_v32  ;;  %v1337_v52 = vsel %vm1204_vm10, %v1332_v50, 0 }
 0x764   : > { %v1458_v35 = vmul.f32 0.35355338, %v1457_v34 }
 0x765   : > { %v1584_v36 = vpop.permute.xlu1 %1583  ;;  %v1467_v53 = vpop.permute.xlu0 %1466 }
 0x766   : > { %v1459_v37 = vpack.c.bf16 %v1458_v35, %v1458_v35  ;;  %v1586_v38 = vmul.f32 %v1584_v36, %v3551_v7  ;;  %v1472_v54 = vsel %vm1204_vm10, %v1467_v53, 0 }
 0x768   : > { %v1592_v41 = vadd.f32 %v1590_v39, %v1586_v38  ;;  %1463 = vrot.lane.b32.xlu1 %v1459_v37, %s2983_s20 }
 0x769   : > { %v1187_v42 = vpop.permute.xlu1 %1186  ;;  %v1602_v56 = vpop.permute.xlu0 %1601 }
 0x76a   : > { %v1593_v43 = vmul.f32 0.35355338, %v1592_v41  ;;  %v1190_v44 = vsel %vm1189_vm9, %v1184_v12, %v1187_v42  ;;  %v1607_v58 = vsel %vm1204_vm10, %v1602_v56, 0 }
 0x76b   : > { %v1192_v46 = vmul.f32 %v1190_v44, %v1180_v13 }
 0x76c   : > { %v1594_v47 = vpack.c.bf16 %v1593_v43, %v1593_v43 }
 0x76d   : > { %v1193_v48 = vadd.f32 %v1192_v46, %v1191_v45 }
 0x76e   : > { %1598 = vrot.lane.b32.xlu1 %v1594_v47, %s2985_s30 }
 0x76f   : > { %v1194_v40 = vmul.f32 0.35355338, %v1193_v48 }
 0x771   : > { %v1195_v49 = vpack.c.bf16 %v1194_v40, %v1194_v40 }
 0x773   : > { %2282 = vmatmul.mubr.msk.bf16.vlgmr.msra.gmra.mrb[0].mxu1 %vm1204_vm10, %v1195_v49 }
 0x774   : > { %2292 = vmatpush3.bf16.xpose.msra.mxu1 %v1337_v52  ;;  %2293 = vmatprep.mubr.msk.bf16.mxu1 %vm2974_vm8, %v2973_v57 }
 0x775   : > { %2303 = vmatprep.subr.bf16.mxu1 %v2973_v57 }
 0x7d2   : > { %v1329_v55 = vpop.permute.xlu1 %1328 }
 0x7d3   : > { %2294 = vmatmul.mubr.msk.bf16.vlgmr.msra.gmra.mrb[4].mxu1 %vm1204_vm10, %v1329_v55 }
 0x7d4   : > { %2304 = vmatpush3.bf16.xpose.msra.mxu1 %v1472_v54  ;;  %2305 = vmatprep.mubr.msk.bf16.mxu1 %vm2974_vm8, %v2973_v57 }
 0x7d5   : > { %2315 = vmatprep.subr.bf16.mxu1 %v2973_v57 }
 0x7da   : > { %v1464_v59 = vpop.permute.xlu1 %1463 }
 0x7db   : > { %2306 = vmatmul.mubr.msk.bf16.vlgmr.msra.gmra.mrb[8].mxu1 %vm1204_vm10, %v1464_v59 }
 0x7dc   : > { %2316 = vmatpush3.bf16.xpose.msra.mxu1 %v1607_v58  ;;  %2317 = vmatprep.mubr.msk.bf16.mxu1 %vm2974_vm8, %v2973_v57 }
 0x7dd   : > { %2327 = vmatprep.subr.bf16.mxu1 %v2973_v57 }
 0x7e0   : > { %v1599_v60 = vpop.permute.xlu1 %1598 }
 0x7e3   : > { %2318 = vmatmul.mubr.msk.bf16.vlgmr.msra.gmra.mrb[12].mxu1 %vm1204_vm10, %v1599_v60 }
 0x7e4   : > { %2331 = vmatprep.mubr.msk.bf16.mxu1 %vm2974_vm8, %v2973_v57 }
 0x846   : > { %v1245_v63 = vpop.f32.mrb[0].mxu1 }
 0x847   : > { %v1246_v0 = vadd.f32 %v2188_v62, %v1245_v63  ;;  %v2283_v1 = vpop.f32.mrb[1].mxu1 }
 0x848   : > { %v1248_v2 = vpop.f32.mrb[2].mxu1 }
 0x849   : > { %v2284_v3 = vpop.f32.mrb[3].mxu1  ;;  %v1252_v4 = vsel %vm1251_vm11, %v1246_v0, -inf }
 0x84a   : > { %1253 = vmax.xlane.f32.xlu0 %v1252_v4  ;;  %v2561_v4 = vld [vmem:[%s3859_s21] sm:$0xff]  }
 0x84b   : > { %2328 = vmatpush3.bf16.msra.mxu1 %v2561_v4 }
 0x84c   : > { %2329 = vmatprep.subr.bf16.mxu1 %v2973_v57 }
 0x8a6   : > { %v1373_v5 = vpop.f32.mrb[4].mxu1 }
 0x8a7   : > { %v1374_v6 = vadd.f32 %v2188_v62, %v1373_v5  ;;  %v2295_v7 = vpop.f32.mrb[5].mxu1 }
 0x8a8   : > { %v1376_v8 = vpop.f32.mrb[6].mxu1  ;;  %v2562_v7 = vld [vmem:[%s3859_s21 + $0x8] sm:$0xff]  }
 0x8a9   : > { %v2296_v9 = vpop.f32.mrb[7].mxu1  ;;  %v1379_v10 = vsel %vm1251_vm11, %v1374_v6, -inf  ;;  %2330 = vmatpush3.bf16.msra.mxu1 %v2562_v7 }
 0x8aa   : > { %1380 = vmax.xlane.f32.xlu1 %v1379_v10  ;;  %2343 = vmatprep.subr.bf16.mxu1 %v2973_v57 }
 0x8ae   : > { %v1508_v11 = vpop.f32.mrb[8].mxu1 }
 0x8af   : > { %v1509_v12 = vadd.f32 %v2188_v62, %v1508_v11  ;;  %v2307_v13 = vpop.f32.mrb[9].mxu1 }
 0x8b0   : > { %v1511_v14 = vpop.f32.mrb[10].mxu1 }
 0x8b1   : > { %v2308_v15 = vpop.f32.mrb[11].mxu1  ;;  %v1514_v16 = vsel %vm1251_vm11, %v1509_v12, -inf }
 0x8b2   : > { %1515 = vmax.xlane.f32.xlu0 %v1514_v16 }
 0x8b6   : > { %v1643_v17 = vpop.f32.mrb[12].mxu1 }
 0x8b7   : > { %v1644_v18 = vadd.f32 %v2188_v62, %v1643_v17  ;;  %v2319_v19 = vpop.f32.mrb[13].mxu1 }
 0x8b8   : > { %v1646_v20 = vpop.f32.mrb[14].mxu1 }
 0x8b9   : > { %v2320_v21 = vpop.f32.mrb[15].mxu1  ;;  %v1649_v22 = vsel %vm1251_vm11, %v1644_v18, -inf }
 0x8ba   : > { %1650 = vmax.xlane.f32.xlu0 %v1649_v22 }
 0x8bb   : > { %1390 = vrot.lane.b32.xlu1 %v1326_v61, %s2982_s15 }
 0x8bf   : > { %1660 = vrot.lane.b32.xlu1 %v1326_v61, %s2985_s30  ;;  %s3862_s30 = sld [smem:[#allocation45_spill]] }
 0x8d0   : > { %1525 = vrot.lane.b32.xlu0 %v1326_v61, %s2983_s20  ;;  %s3864_s20 = sld [smem:[#allocation44_spill]] }
 0x8d7   : > { %v1254_v23 = vpop.xlane.xlu0 %1253 }
 0x8d8   : > { %v1255_v24 = vsub.f32 %v1246_v0, %v1254_v23  ;;  %v2197_v23 = vld [vmem:[#allocation11] ss:$0 sm:$0xff] }
 0x8da   : > { %v1256_v25 = vmul.f32 1.442695, %v1255_v24 }
 0x8dc   : > { %2571 = vpow2.f32 %v1256_v25 }
 0x8e6   : > { %v2572_v26 = vpop.eup %2571 }
 0x8e7   : > { %v1261_v27 = vpack.c.bf16 %v2572_v26, %v2572_v26  ;;  %v1258_v43 = vsel %vm1251_vm11, %v2572_v26, 0.0 }
 0x8e9   : > { %2288 = vmatmul.mubr.msk.bf16.vlgmr.msra.gmra.mrb[4].mxu0 %vm1251_vm11, %v1261_v27 }
 0x8ea   : > { %2299 = vmatprep.mubr.msk.bf16.mxu0 %vm2974_vm8, %v2973_v57 }
 0x937   : > { %v1381_v28 = vpop.xlane.xlu1 %1380 }
 0x938   : > { %v1382_v29 = vsub.f32 %v1374_v6, %v1381_v28 }
 0x93a   : > { %v1383_v30 = vmul.f32 1.442695, %v1382_v29 }
 0x93b   : > { %v1391_v31 = vpop.permute.xlu1 %1390 }
 0x93c   : > { %2573 = vpow2.f32 %v1383_v30  ;;  %2298 = vmatpush3.bf16.msra.mxu0 %v1391_v31 }
 0x93d   : > { %2309 = vmatprep.subr.bf16.mxu0 %v2973_v57 }
 0x93f   : > { %v1516_v32 = vpop.xlane.xlu0 %1515  ;;  %v1661_v47 = vpop.permute.xlu1 %1660 }
 0x940   : > { %v1517_v33 = vsub.f32 %v1509_v12, %v1516_v32 }
 0x942   : > { %v1518_v34 = vmul.f32 1.442695, %v1517_v33 }
 0x944   : > { %2575 = vpow2.f32 %v1518_v34 }
 0x946   : > { %v2574_v35 = vpop.eup %2573 }
 0x947   : > { %v1651_v36 = vpop.xlane.xlu0 %1650  ;;  %v1385_v37 = vsel %vm1251_vm11, %v2574_v35, 0.0  ;;  %v1388_v38 = vpack.c.bf16 %v2574_v35, %v2574_v35 }
 0x948   : > { %v1652_v39 = vsub.f32 %v1644_v18, %v1651_v36  ;;  %1386 = vadd.xlane.f32.xlu1 %v1385_v37  ;;  %v2563_v36 = vld [vmem:[%s3860_s24] sm:$0xff]  }
 0x949   : > { %2300 = vmatmul.mubr.msk.bf16.vlgmr.msra.gmra.mrb[8].mxu0 %vm1251_vm11, %v1388_v38  ;;  %v2565_v37 = vld [vmem:[%s3862_s30] sm:$0xff]   ;;  %v2566_v38 = vld [vmem:[%s3862_s30 + $0x8] sm:$0xff]  }
 0x94a   : > { %v1653_v41 = vmul.f32 1.442695, %v1652_v39  ;;  %2311 = vmatprep.mubr.msk.bf16.mxu0 %vm2974_vm8, %v2973_v57 }
 0x94b   : > { %v1526_v42 = vpop.permute.xlu0 %1525 }
 0x94c   : > { %2577 = vpow2.f32 %v1653_v41  ;;  %1259 = vadd.xlane.f32.xlu1 %v1258_v43  ;;  %2310 = vmatpush3.bf16.msra.mxu0 %v1526_v42 }
 0x94d   : > { %2321 = vmatprep.subr.bf16.mxu0 %v2973_v57 }
 0x94e   : > { %v2576_v44 = vpop.eup %2575 }
 0x94f   : > { %v1520_v45 = vsel %vm1251_vm11, %v2576_v44, 0.0  ;;  %v1523_v46 = vpack.c.bf16 %v2576_v44, %v2576_v44  ;;  %v2201_v44 = vld [vmem:[#allocation16] ss:$0 sm:$0xff] }
 0x950   : > { %1521 = vadd.xlane.f32.xlu0 %v1520_v45 }
 0x951   : > { %2312 = vmatmul.mubr.msk.bf16.vlgmr.msra.gmra.mrb[12].mxu0 %vm1251_vm11, %v1523_v46  ;;  %v2202_v46 = vld [vmem:[#allocation17] ss:$0 sm:$0xff] }
 0x952   : > { %2322 = vmatpush3.bf16.msra.mxu0 %v1661_v47  ;;  %2323 = vmatprep.mubr.msk.bf16.mxu0 %vm2974_vm8, %v2973_v57 }
 0x953   : > { %2335 = vmatprep.subr.bf16.mxu0 %v2973_v57 }
 0x956   : > { %v2578_v48 = vpop.eup %2577 }
 0x957   : > { %v1655_v50 = vsel %vm1251_vm11, %v2578_v48, 0.0  ;;  %v1658_v40 = vpack.c.bf16 %v2578_v48, %v2578_v48 }
 0x958   : > { %1656 = vadd.xlane.f32.xlu0 %v1655_v50 }
 0x959   : > { %2324 = vmatmul.mubr.msk.bf16.vlgmr.msra.gmra.mrb[16].mxu0 %vm1251_vm11, %v1658_v40  ;;  %v2567_v40 = vld [vmem:[%s3862_s30 + $0x10] sm:$0xff]  }
 0x95a   : > { %2339 = vmatprep.mubr.msk.bf16.mxu0 %vm2974_vm8, %v2973_v57  ;;  %2336 = vmatpush3.bf16.msra.mxu0 %v2563_v36 }
 0x95b   : > { %2337 = vmatprep.subr.bf16.mxu0 %v2973_v57 }
 0x9bc   : > { %v1299_v49 = vpop.f32.mrb[4].mxu0 }
 0x9bd   : > { %v2289_v52 = vpop.f32.mrb[5].mxu0 }
 0x9be   : > { %v1302_v53 = vpop.f32.mrb[6].mxu0  ;;  %v2203_v52 = vld [vmem:[%s3864_s20] ss:$0 sm:$0xff] }
 0x9bf   : > { %v2290_v54 = vpop.f32.mrb[7].mxu0 }
 0x9d5   : > { %v1387_v55 = vpop.xlane.xlu1 %1386 }
 0x9d9   : > { %v1260_v56 = vpop.xlane.xlu1 %1259 }
 0x9da   : > { %2579 = vrcp.f32 %v1260_v56 }
 0x9db   : > { %2581 = vrcp.f32 %v1387_v55 }
 0x9dd   : > { %v1522_v60 = vpop.xlane.xlu0 %1521 }
 0x9de   : > { %2583 = vrcp.f32 %v1522_v60 }
 0x9e4   : > { %v2580_v58 = vpop.eup %2579 }
 0x9e5   : > { %v1306_v59 = vmul.f32 %v2580_v58, %v1299_v49  ;;  %v2582_v61 = vpop.eup %2581  ;;  %v1657_v2 = vpop.xlane.xlu0 %1656  ;;  %v2568_v49 = vld [vmem:[%s3862_s30 + $0x18] sm:$0xff]  }
 0x9e6   : > { %2585 = vrcp.f32 %v1657_v2 }
 0x9e7   : > { %1307 = vst.msk [vmem:[#allocation4] sm:$0xff] %vm1204_vm10, %v1306_v59 }
 0x9e8   : > { %v2584_v5 = vpop.eup %2583 }
 0x9f0   : > { %v2586_v12 = vpop.eup %2585 }
 0xa1c   : > { %v1430_v62 = vpop.f32.mrb[8].mxu0 }
 0xa1d   : > { %v1437_v63 = vmul.f32 %v2582_v61, %v1430_v62  ;;  %v2301_v0 = vpop.f32.mrb[9].mxu0 }
 0xa1e   : > { %v1433_v1 = vpop.f32.mrb[10].mxu0 }
 0xa1f   : > { %1439 = vrot.lane.b32.xlu0 %v1437_v63, %s2979_s9  ;;  %v2302_v3 = vpop.f32.mrb[11].mxu0  ;;  %s2215_s9 = sshll.u32 %s1978_s7, 7 }
 0xa24   : > { %v1565_v6 = vpop.f32.mrb[12].mxu0 }
 0xa25   : > { %v1572_v8 = vmul.f32 %v2584_v5, %v1565_v6  ;;  %v2313_v9 = vpop.f32.mrb[13].mxu0 }
 0xa26   : > { %v1568_v10 = vpop.f32.mrb[14].mxu0 }
 0xa27   : > { %1574 = vrot.lane.b32.xlu1 %v1572_v8, %s2980_s11  ;;  %v2314_v11 = vpop.f32.mrb[15].mxu0  ;;  %s3861_s11 = smov %s3860_s24  ;;  %s3866_s24 = scalar_lea.vmem [#allocation19], %s3435_s0 }
 0xa28   : > { %s3868_s12 = smov %s3866_s24 }
 0xa2c   : > { %v1700_v13 = vpop.f32.mrb[16].mxu0 }
 0xa2d   : > { %v1707_v14 = vmul.f32 %v2586_v12, %v1700_v13  ;;  %v2325_v15 = vpop.f32.mrb[17].mxu0 }
 0xa2e   : > { %v1703_v16 = vpop.f32.mrb[18].mxu0 }
 0xa2f   : > { %1709 = vrot.lane.b32.xlu1 %v1707_v14, %s2981_s13  ;;  %v2326_v17 = vpop.f32.mrb[19].mxu0  ;;  %s1982_s13 = sshll.u32 %s3866_s24, 4  ;;  %s3690_s13 = int_to_ptr.vmem [resolvable:$true] %s1982_s13 }
 0xa30   : > { %s2815_s7 = scalar_lea.vmem %s3690_s13, 128  ;;  %p2822_p6 = scmp.lt.s32.totalorder %s3690_s13, %s2820_s10 }
 0xa31   : > { %p2816_p5 = scmp.ne.s32.totalorder %s3690_s13, %s2815_s7 }
 0xa33   : > { %p2817_p2 = pnand %p2816_p5, %p3870_p3 }
 0xa35   : > { %p2818_p7 = pneg %p2817_p2 }
 0xa91   : > { %v1440_v18 = vpop.permute.xlu0 %1439 }
 0xa92   : > { %1443 = vst.msk [vmem:[#allocation4] sm:$0xff] %vm1442_vm12, %v1440_v18 }
 0xa99   : > { %v1575_v19 = vpop.permute.xlu1 %1574 }
 0xa9a   : > { %1578 = vst.msk [vmem:[#allocation4] sm:$0xff] %vm1577_vm13, %v1575_v19 }
 0xaa1   : > { %v1710_v20 = vpop.permute.xlu1 %1709 }
 0xaa2   : > { %1713 = vst.msk [vmem:[#allocation4] sm:$0xff] %vm1712_vm14, %v1710_v20 }
 0xaa9   : > { %v1714_v21 = vld [vmem:[#allocation4] sm:$0xff] }
 0xaaa   : > { %v1715_v22 = vpack.c.bf16 %v1714_v21, %v1714_v21 }
 0xaac   : > { %2332 = vmatmul.mubr.msk.bf16.vlgmr.msra.gmra.mrb[16].mxu1 %vm1081_vm7, %v1715_v22 }
 0xaad   : > { %2351 = vmatprep.mubr.msk.bf16.mxu1 %vm2974_vm8, %v2973_v57  ;;  %2344 = vmatpush3.bf16.msra.mxu1 %v2565_v37 }
 0xaae   : > { %2345 = vmatprep.subr.bf16.mxu1 %v2973_v57 }
 0xab1   : > { %2346 = vmatpush3.bf16.msra.mxu1 %v2566_v38 }
 0xab2   : > { %2347 = vmatprep.subr.bf16.mxu1 %v2973_v57 }
 0xab5   : > { %2348 = vmatpush3.bf16.msra.mxu1 %v2567_v40 }
 0xab6   : > { %2349 = vmatprep.subr.bf16.mxu1 %v2973_v57  ;;  %v2207_v57 = vld [vmem:[%s3865_s6] ss:$0 sm:$0xff]  ;;  %s2821_s6 = scalar_lea.vmem %s2820_s10, 256 }
 0xab7   : > { %p2823_p1 = scmp.lt.s32.totalorder %s2821_s6, %s2815_s7 }
 0xab9   : > { %2350 = vmatpush3.bf16.msra.mxu1 %v2568_v49  ;;  %p2824_p11 = por %p2823_p1, %p2822_p6 }
 0xabb   : > { %p2825_p9 = pnand %p2824_p11, %p2818_p7 }
 0xb7f   : > { %v1776_v24 = vpop.f32.mrb[16].mxu1 }
 0xb80   : > { %v1777_v25 = vadd.f32 %v2197_v23, %v1776_v24  ;;  %v2333_v26 = vpop.f32.mrb[17].mxu1 }
 0xb81   : > { %v1779_v27 = vpop.f32.mrb[18].mxu1 }
 0xb82   : > { %v1782_v28 = vadd.f32 %v1777_v25, %v3525_v51  ;;  %v2334_v29 = vpop.f32.mrb[19].mxu1  ;;  %v2564_v51 = vld [vmem:[%s3861_s11 + $0x8] sm:$0xff]   ;;  %s3867_s11 = sld [smem:[#allocation49_spill]] }
 0xb83   : > { %2338 = vmatpush3.bf16.msra.mxu0 %v2564_v51 }
 0xb84   : > { %v1785_v30 = vsel %vm1081_vm7, %v1782_v28, 0.0 }
 0xb85   : > { %1786 = vadd.xlane.f32.xlu0 %v1785_v30 }
 0xb88   : > { %s3688_s17 = scalar_lea.hbm %s3867_s11, %s2215_s9 }
 0xc12   : > { %v1787_v31 = vpop.xlane.xlu0 %1786 }
 0xc13   : > { %v1788_v32 = vmul.f32 0.03125, %v1787_v31 }
 0xc15   : > { %v1789_v33 = vsub.f32 %v1782_v28, %v1788_v32 }
 0xc17   : > { %v1790_v34 = vmul.f32 %v1789_v33, %v1789_v33 }
 0xc19   : > { %v1791_v35 = vsel %vm1081_vm7, %v1790_v34, 0.0 }
 0xc1a   : > { %1792 = vadd.xlane.f32.xlu1 %v1791_v35 }
 0xca7   : > { %v1793_v39 = vpop.xlane.xlu1 %1792 }
 0xca8   : > { %v1794_v41 = vmul.f32 0.03125, %v1793_v39 }
 0xcaa   : > { %v1795_v42 = vadd.f32 1e-05, %v1794_v41 }
 0xcac   : > { %2587 = vrsqrt.f32 %v1795_v42 }
 0xcb6   : > { %v2588_v43 = vpop.eup %2587 }
 0xcb7   : > { %v1797_v45 = vmul.f32 %v2588_v43, %v1789_v33 }
 0xcb9   : > { %v1804_v47 = vmul.f32 %v2201_v44, %v1797_v45 }
 0xcbb   : > { %v1811_v48 = vadd.f32 %v2202_v46, %v1804_v47 }
 0xcbd   : > { %v1812_v50 = vpack.c.bf16 %v1811_v48, %v1811_v48 }
 0xcbf   : > { %2340 = vmatmul.mubr.msk.bf16.vlgmr.msra.gmra.mrb[20].mxu0 %vm1081_vm7, %v1812_v50 }
 0xd92   : > { %v1873_v53 = vpop.f32.mrb[20].mxu0 }
 0xd93   : > { %v1874_v54 = vadd.f32 %v2203_v52, %v1873_v53  ;;  %v2341_v55 = vpop.f32.mrb[21].mxu0 }
 0xd94   : > { %v1876_v56 = vpop.f32.mrb[22].mxu0 }
 0xd95   : > { %v1879_v58 = vmax.f32 %v1874_v54, 0.0  ;;  %v2342_v59 = vpop.f32.mrb[23].mxu0 }
 0xd97   : > { %v1880_v60 = vpack.c.bf16 %v1879_v58, %v1879_v58 }
 0xd99   : > { %2352 = vmatmul.mubr.msk.bf16.vlgmr.msra.gmra.mrb[20].mxu1 %vm1920_vm15, %v1880_v60 }
 0xe6c   : > { %v1958_v61 = vpop.f32.mrb[20].mxu1 }
 0xe6d   : > { %v1959_v62 = vadd.f32 %v2207_v57, %v1958_v61  ;;  %v2353_v63 = vpop.f32.mrb[21].mxu1 }
 0xe6e   : > { %v1961_v0 = vpop.f32.mrb[22].mxu1 }
 0xe6f   : > { %v1964_v1 = vadd.f32 %v1959_v62, %v1782_v28  ;;  %v2354_v2 = vpop.f32.mrb[23].mxu1 }
 0xe71   : > { %1965 = vst.msk [vmem:[%s3868_s12] sm:$0xff] %vm1081_vm7, %v1964_v1 }
 0xe72   : > { %2828 = shalt.err (!%p2825_p9)
}
 0xe73   : > { %s2829_s0 = scalar_lea.hbm %s3688_s17, 128  ;;  %s2833_s15 = scalar_lea.hbm %s3867_s11, 512 }
 0xe74   : > { %p2830_p13 = scmp.ne.s32.totalorder %s3688_s17, %s2829_s0  ;;  %p2834_p4 = scmp.lt.u32.totalorder %s3688_s17, %s3867_s11 }
 0xe75   : > { %p2835_p10 = scmp.lt.u32.totalorder %s2833_s15, %s2829_s0  ;;  %p2837_p5 = scmp.lt.u32.totalorder %s2829_s0, %s3688_s17 }
 0xe76   : > { %p2831_p0 = pnand %p2830_p13, %p3870_p3 }
 0xe77   : > { %p2836_p8 = por %p2835_p10, %p2834_p4 }
 0xe78   : > { %p2832_p12 = pneg %p2831_p0 }
 0xe79   : > { %p2838_p2 = por %p2837_p5, %p2836_p8 }
 0xe7b   : > { %p2839_p7 = pnand %p2838_p2, %p2832_p12 }
 0xe7d   : > { %2842 = shalt.err (!%p2839_p7)
}
 0xe7e   : > { %2385 = dma.vmem_to_hbm [thread:$0]  (%p3870_p3), %s3690_s13, 128, %s3688_s17, %s1967_s19  }
 0xe7f PF: > { %p2432_p6 = scmp.ge.s32.totalorder %s2953_s4, 2  ;;  %s1994_s26 = sand.u32 1, %s2913_s1  }
 0xe80   : > { %p3871_p1 = scmp.ne.s32.totalorder %s3840_s14, 0  ;;  %s1995_s7 = scalar_lea.sflag [#allocation7], %s1994_s26 }
 0xe82   : > { %p2414_p11 = pnand %p2432_p6, %p3871_p1 }
 0xe84   : > { %2908 = dma.done.wait (!%p2414_p11), %s1995_s7, 128  }
 0xe85   : > { %2910 = vsyncadd (!%p2414_p11), %s1995_s7, 4294967168  ;;  %s40_s4 = sadd.s32 1, %s2953_s4   ;;  %s3872_s1 = smov %s2917_s22 }
 0xe86   : > { %p37_p9 = scmp.ge.s32.totalorder %s40_s4, 6   ;;  %s3873_s22 = smov %s2921_s23 }
 0xe87   : > { %s3874_s23 = smov %s3359_s5  ;;  %s3875_s24 = smov %s2929_s2 }
 0xe88   : > { %s3876_s2 = smov %s2933_s25  ;;  %s3877_s25 = smov %s3356_s16 }
 0xe89   : > { %s3878_s3 = smov %s2945_s27  ;;  %s3879_s26 = smov %s2949_s28 }
 0xe8a   : > { %s3880_s27 = smov %s3883_s29  ;;  %s3881_s28 = smov %s3887_s8 }
 0xe8b   :  { %39 = sbr.rel (!%p37_p9) target bundleno = 35 (0x23), region = 183 }
 0xe92   :  { %2000 = vsyncpa [#allocation6], 1 }
 0xe93   :  { %2002 = vsyncpa [#allocation6 + $0x1], 1 }
 0xe94   :  { %2003 = vsyncpa [#allocation9], 1 }
 0xe95   :  { %2004 = vsyncpa [#allocation12], 1 }
 0xe96   :  { %2005 = vsyncpa [#allocation15], 1 }
 0xe97   :  { %2006 = vsyncpa [#allocation18], 1 }
 0xe98   :  { %2007 = vsyncpa [#allocation7], 1 }
 0xe99   :  { %2009 = vsyncpa [#allocation7 + $0x1], 1 }

</bundles_post_ra>
